<compile_context>
chip_gen: v5e
topology: v5e:2x2
jax: 0.10.0
libtpu: 0.0.40
codegen_flags: <defaults>
</compile_context>

<pallas_src>
import functools

import jax
import jax.numpy as jnp
from jax.experimental import pallas as pl
from jax.experimental.pallas import tpu as pltpu


def _round_up(x, m):
    return (x + m - 1) // m * m


def _int_power(x, n):
    """Exact square-and-multiply chain: VPU multiplies only, no EUP exp/log."""
    assert n >= 1
    result = None
    base = x
    while n:
        if n & 1:
            result = base if result is None else result * base
        n >>= 1
        if n:
            base = base * base
    return result


# --------------------------- fused Pallas kernel -----------------------------

def _landmark_fused_kernel(eps_ref, x_ref, w_bb_ref, b_bb_ref, w_fc_t_ref,
                           b_fc_ref, o_ref, *, tb, hw, p, inv_p, inv_hw):
    # eps_ref:    (1, 1)            SMEM scalar
    # x_ref:      (TB*HW, Cin)      bf16, channels-last
    # w_bb_ref:   (Cin, Cf)         bf16
    # b_bb_ref:   (1, Cf)           f32
    # w_fc_t_ref: (Cf, Ncp)         bf16 (pre-transposed, zero-padded cols)
    # b_fc_ref:   (1, Ncp)          f32  (zero-padded)
    # o_ref:      (TB, Ncp)         f32  lane-dense output slab
    x = x_ref[...]                                               # (TB*HW, Cin)

    # Backbone stand-in: 1x1 conv + ReLU (MXU, bf16 operands, f32 accumulate).
    feat = jnp.dot(x, w_bb_ref[...], preferred_element_type=jnp.float32)
    feat = jnp.maximum(feat + b_bb_ref[...], 0.0)                # (TB*HW, Cf)

    # GeM pooling: clamp -> x**p (VPU multiply chain for integer p) -> mean
    # over HW per batch element -> root (tiny EUP work on (TB, Cf)).
    c = jnp.maximum(feat, eps_ref[0, 0])
    if float(p).is_integer() and p >= 1.0:
        cp = _int_power(c, int(round(p)))
    else:
        # TODO(synk): non-integer p -> exp/log per element on the single EUP.
        cp = c ** p
    m = jnp.sum(cp.reshape(tb, hw, cp.shape[-1]), axis=1) * inv_hw   # (TB, Cf)
    pooled = m ** inv_p                                              # (TB, Cf)

    # Final Linear (softmax loss module -> plain Linear; label unused).
    logits = jnp.dot(pooled.astype(jnp.bfloat16), w_fc_t_ref[...],
                     preferred_element_type=jnp.float32) + b_fc_ref[...]
    o_ref[...] = logits                                          # (TB, Ncp)


# --------------------------- pallas_call wrapper ------------------------------

@functools.partial(jax.jit, static_argnames=("p", "n_classes", "batch_tile"))
def landmark_forward(x_nchw, w_bb, b_bb, w_fc_t, b_fc, eps, *, p,
                     n_classes, batch_tile=8):
    b, cin, h, w = x_nchw.shape
    hw = h * w
    cf = w_bb.shape[1]
    ncp = w_fc_t.shape[1]

    tb = int(batch_tile)
    b_pad = _round_up(b, tb)

    # NCHW -> (B, HW, Cin) channels-last; cast the matmul operand to bf16
    # (halves DMA bytes, full-rate MXU on v5e/v6e/v7x); pad batch to TB so the
    # whole block is one grid step and the output store is a dense (TB, Ncp)
    # slab.
    x_bhwc = jnp.transpose(x_nchw, (0, 2, 3, 1)).reshape(b, hw, cin)
    x_bhwc = x_bhwc.astype(jnp.bfloat16)
    if b_pad != b:
        x_bhwc = jnp.pad(x_bhwc, ((0, b_pad - b), (0, 0), (0, 0)))
    x_flat = x_bhwc.reshape(b_pad * hw, cin)

    kern = functools.partial(_landmark_fused_kernel, tb=tb, hw=hw,
                             p=float(p), inv_p=1.0 / float(p), inv_hw=1.0 / hw)

    out = pl.pallas_call(
        kern,
        out_shape=jax.ShapeDtypeStruct((b_pad, ncp), jnp.float32),
        grid=(b_pad // tb,),
        in_specs=[
            pl.BlockSpec(memory_space=pltpu.MemorySpace.SMEM),      # eps
            pl.BlockSpec((tb * hw, cin), lambda i: (i, 0)),          # x
            pl.BlockSpec((cin, cf), lambda i: (0, 0)),               # w_bb
            pl.BlockSpec((1, cf), lambda i: (0, 0)),                 # b_bb
            pl.BlockSpec((cf, ncp), lambda i: (0, 0)),               # w_fc_t
            pl.BlockSpec((1, ncp), lambda i: (0, 0)),                # b_fc
        ],
        out_specs=pl.BlockSpec((tb, ncp), lambda i: (i, 0)),
        compiler_params=pltpu.CompilerParams(
            dimension_semantics=("parallel",)),
    )(eps, x_flat, w_bb, b_bb, w_fc_t, b_fc)

    # Slice off batch padding and the zero-padded class columns.
    return out[:b, :n_classes]


# --------------------------- LandmarkNet (JAX) -------------------------------

class LandmarkNetPallas:
    """Defaults: pooling='GeM', use_fc=False, loss_module='softmax'."""

    DIVIDABLE_BY = 32

    def __init__(self, n_classes, in_channels=4, feat_channels=128,
                 gem_p=3.0, gem_eps=1e-6, key=None):
        if key is None:
            key = jax.random.PRNGKey(0)
        k1, k2, k3, k4 = jax.random.split(key, 4)
        self.n_classes = int(n_classes)
        self.cf = int(feat_channels)
        self.gem_p = float(gem_p)
        self.gem_eps = float(gem_eps)
        self.ncp = _round_up(self.n_classes, 128)   # lane-dense padded classes

        # Backbone stand-in params (1x1 conv): bf16 weight, f32 bias.
        self.w_bb = (jax.random.normal(k1, (in_channels, feat_channels),
                                       jnp.float32) * 0.1).astype(jnp.bfloat16)
        self.b_bb = jax.random.normal(k2, (1, feat_channels), jnp.float32) * 0.01

        # Final nn.Linear(feat_channels, n_classes): torch layout (out, in).
        w_fc = jax.random.normal(k3, (n_classes, feat_channels),
                                 jnp.float32) * 0.1
        b_fc = jax.random.normal(k4, (1, n_classes), jnp.float32) * 0.01
        # Pre-transposed, bf16, zero-padded to Ncp (padding columns stay zero).
        self.w_fc_t = jnp.zeros((feat_channels, self.ncp), jnp.bfloat16
                                ).at[:, :n_classes].set(
                                    w_fc.T.astype(jnp.bfloat16))
        self.b_fc = jnp.zeros((1, self.ncp), jnp.float32
                              ).at[:, :n_classes].set(b_fc)

        # eps as a runtime SMEM scalar (no recompile per eps value).
        self.eps_arr = jnp.full((1, 1), self.gem_eps, jnp.float32)

    def __call__(self, x, label):
        # loss_module == 'softmax' -> plain Linear; label unused.
        return landmark_forward(x, self.w_bb, self.b_bb, self.w_fc_t,
                                self.b_fc, self.eps_arr, p=self.gem_p,
                                n_classes=self.n_classes)


# --------------------------- reference (plain jnp) ---------------------------

def reference_forward(model, x):
    b, c, h, w = x.shape
    x2d = jnp.transpose(x, (0, 2, 3, 1)).reshape(b * h * w, c)
    x2d = x2d.astype(jnp.bfloat16)
    feat = jnp.dot(x2d, model.w_bb, preferred_element_type=jnp.float32)
    feat = jnp.maximum(feat + model.b_bb, 0.0)
    fmap = feat.reshape(b, h * w, model.cf)
    clamped = jnp.maximum(fmap, model.gem_eps) ** model.gem_p
    pooled = jnp.mean(clamped, axis=1) ** (1.0 / model.gem_p)        # (B, Cf)
    logits = jnp.dot(pooled.astype(jnp.bfloat16), model.w_fc_t,
                     preferred_element_type=jnp.float32) + model.b_fc
    return logits[:, :model.n_classes]


# --------------------------- main ---------------------------------------------

if __name__ == "__main__":
    B, C_IN, H, W = 2, 4, 16, 16
    N_CLASSES = 16

    key = jax.random.PRNGKey(0)
    kx, kl, kp = jax.random.split(key, 3)
    x = jax.random.normal(kx, (B, C_IN, H, W), jnp.float32)
    label = jax.random.randint(kl, (B,), 0, N_CLASSES)

    model = LandmarkNetPallas(n_classes=N_CLASSES, in_channels=C_IN,
                              feat_channels=128, key=kp)

    logits = model(x, label)
    logits = jax.block_until_ready(logits)

    ref = reference_forward(model, x)
    assert logits.shape == (B, N_CLASSES)
    assert jnp.allclose(logits, ref, atol=2e-3, rtol=2e-3), \
        float(jnp.max(jnp.abs(logits - ref)))

    print("KERNEL_OK")
</pallas_src>

<mosaic_0001>
module attributes {stable_mosaic.version = 11 : i64} {
  func.func @_landmark_fused_kernel(%arg0: i32, %arg1: memref<1x1xf32, #tpu.memory_space<smem>>, %arg2: memref<2048x4xbf16, #tpu.memory_space<vmem>>, %arg3: memref<4x128xbf16, #tpu.memory_space<vmem>>, %arg4: memref<1x128xf32, #tpu.memory_space<vmem>>, %arg5: memref<128x128xbf16, #tpu.memory_space<vmem>>, %arg6: memref<1x128xf32, #tpu.memory_space<vmem>>, %arg7: memref<8x128xf32, #tpu.memory_space<vmem>>) attributes {dimension_semantics = [#tpu.dimension_semantics<parallel>], iteration_bounds = array<i64: 1>, scalar_prefetch = 0 : i64, scratch_operands = 0 : i64, tpu.core_type = #tpu.core_type<tc>, window_params = [{transform_indices = @transform_0, window_bounds = array<i64: 1, 1>}, {transform_indices = @transform_1, window_bounds = array<i64: 2048, 4>}, {pipeline_mode = #tpu.pipeline_mode<synchronous>, transform_indices = @transform_2, window_bounds = array<i64: 4, 128>}, {pipeline_mode = #tpu.pipeline_mode<synchronous>, transform_indices = @transform_3, window_bounds = array<i64: 1, 128>}, {pipeline_mode = #tpu.pipeline_mode<synchronous>, transform_indices = @transform_4, window_bounds = array<i64: 128, 128>}, {pipeline_mode = #tpu.pipeline_mode<synchronous>, transform_indices = @transform_5, window_bounds = array<i64: 1, 128>}, {transform_indices = @transform_6, window_bounds = array<i64: 8, 128>}]} {
    %c0 = arith.constant 0 : index
    %c0_0 = arith.constant 0 : index
    %0 = vector.load %arg2[%c0, %c0_0] : memref<2048x4xbf16, #tpu.memory_space<vmem>>, vector<2048x4xbf16>
    %c0_1 = arith.constant 0 : index
    %c0_2 = arith.constant 0 : index
    %1 = vector.load %arg3[%c0_1, %c0_2] : memref<4x128xbf16, #tpu.memory_space<vmem>>, vector<4x128xbf16>
    %cst = arith.constant dense<0.000000e+00> : vector<2048x128xf32>
    %2 = tpu.matmul %0, %1, %cst {dimension_numbers = #tpu.dot_dimension_numbers<[1], [0], [0], [1], [0, 0, 1, 1], [], []>} : vector<2048x4xbf16>, vector<4x128xbf16>, vector<2048x128xf32> -> vector<2048x128xf32>
    %c0_3 = arith.constant 0 : index
    %c0_4 = arith.constant 0 : index
    %3 = vector.load %arg4[%c0_3, %c0_4] : memref<1x128xf32, #tpu.memory_space<vmem>>, vector<1x128xf32>
    %4 = vector.broadcast %3 : vector<1x128xf32> to vector<2048x128xf32>
    %5 = arith.addf %2, %4 : vector<2048x128xf32>
    %cst_5 = arith.constant 0.000000e+00 : f32
    %6 = vector.broadcast %cst_5 : f32 to vector<2048x128xf32>
    %7 = arith.maximumf %5, %6 : vector<2048x128xf32>
    %c0_6 = arith.constant 0 : index
    %c0_7 = arith.constant 0 : index
    %8 = memref.load %arg1[%c0_6, %c0_7] : memref<1x1xf32, #tpu.memory_space<smem>>
    %9 = vector.broadcast %8 : f32 to vector<2048x128xf32>
    %10 = arith.maximumf %7, %9 : vector<2048x128xf32>
    %11 = arith.mulf %10, %10 : vector<2048x128xf32>
    %12 = arith.mulf %10, %11 : vector<2048x128xf32>
    %13 = vector.shape_cast %12 : vector<2048x128xf32> to vector<8x256x128xf32>
    %cst_8 = arith.constant dense<0.000000e+00> : vector<8x128xf32>
    %14 = vector.multi_reduction <add>, %13, %cst_8 [1] : vector<8x256x128xf32> to vector<8x128xf32>
    %cst_9 = arith.constant 3.906250e-03 : f32
    %15 = vector.broadcast %cst_9 : f32 to vector<8x128xf32>
    %16 = arith.mulf %14, %15 : vector<8x128xf32>
    %cst_10 = arith.constant 0.333333343 : f32
    %17 = vector.broadcast %cst_10 : f32 to vector<8x128xf32>
    %18 = math.powf %16, %17 : vector<8x128xf32>
    %19 = arith.truncf %18 : vector<8x128xf32> to vector<8x128xbf16>
    %c0_11 = arith.constant 0 : index
    %c0_12 = arith.constant 0 : index
    %20 = vector.load %arg5[%c0_11, %c0_12] : memref<128x128xbf16, #tpu.memory_space<vmem>>, vector<128x128xbf16>
    %cst_13 = arith.constant dense<0.000000e+00> : vector<8x128xf32>
    %21 = tpu.matmul %19, %20, %cst_13 {dimension_numbers = #tpu.dot_dimension_numbers<[1], [0], [0], [1], [0, 0, 1, 1], [], []>} : vector<8x128xbf16>, vector<128x128xbf16>, vector<8x128xf32> -> vector<8x128xf32>
    %c0_14 = arith.constant 0 : index
    %c0_15 = arith.constant 0 : index
    %22 = vector.load %arg6[%c0_14, %c0_15] : memref<1x128xf32, #tpu.memory_space<vmem>>, vector<1x128xf32>
    %23 = vector.broadcast %22 : vector<1x128xf32> to vector<8x128xf32>
    %24 = arith.addf %21, %23 : vector<8x128xf32>
    %c0_16 = arith.constant 0 : index
    %c0_17 = arith.constant 0 : index
    %25 = vector.load %arg7[%c0_16, %c0_17] : memref<8x128xf32, #tpu.memory_space<vmem>>, vector<8x128xf32>
    tpu.vector_store %arg7[%c0_16, %c0_17], %24 {strides = array<i32>} : memref<8x128xf32, #tpu.memory_space<vmem>>, vector<8x128xf32>,
    return
  }
  func.func @transform_0(%arg0: i32) -> (i32, i32) {
    %c0_i32 = arith.constant 0 : i32
    %c0_i32_0 = arith.constant 0 : i32
    %c0_i32_1 = arith.constant 0 : i32
    return %c0_i32, %c0_i32_0 : i32, i32
  }
  func.func @transform_1(%arg0: i32) -> (i32, i32) {
    %c0_i32 = arith.constant 0 : i32
    %c0_i32_0 = arith.constant 0 : i32
    return %arg0, %c0_i32 : i32, i32
  }
  func.func @transform_2(%arg0: i32) -> (i32, i32) {
    %c0_i32 = arith.constant 0 : i32
    %c0_i32_0 = arith.constant 0 : i32
    %c0_i32_1 = arith.constant 0 : i32
    return %c0_i32, %c0_i32_0 : i32, i32
  }
  func.func @transform_3(%arg0: i32) -> (i32, i32) {
    %c0_i32 = arith.constant 0 : i32
    %c0_i32_0 = arith.constant 0 : i32
    %c0_i32_1 = arith.constant 0 : i32
    return %c0_i32, %c0_i32_0 : i32, i32
  }
  func.func @transform_4(%arg0: i32) -> (i32, i32) {
    %c0_i32 = arith.constant 0 : i32
    %c0_i32_0 = arith.constant 0 : i32
    %c0_i32_1 = arith.constant 0 : i32
    return %c0_i32, %c0_i32_0 : i32, i32
  }
  func.func @transform_5(%arg0: i32) -> (i32, i32) {
    %c0_i32 = arith.constant 0 : i32
    %c0_i32_0 = arith.constant 0 : i32
    %c0_i32_1 = arith.constant 0 : i32
    return %c0_i32, %c0_i32_0 : i32, i32
  }
  func.func @transform_6(%arg0: i32) -> (i32, i32) {
    %c0_i32 = arith.constant 0 : i32
    %c0_i32_0 = arith.constant 0 : i32
    return %arg0, %c0_i32 : i32, i32
  }
}

</mosaic_0001>

<bundles_post_ra>
// kernel: landmark_forward.1
= control target key start
LH: loop header
LB: loop body
LE: loop exit
PB: predicated region body
PF: predicated region fallthrough
CT: control target
= control target key end

     0   :  { %vm1311_vm0 = vcmask 1041408   ;;  %vm926_vm1 = vcmask 31744   ;;  %vm3346_vm12 = vcmask 1041409   ;;  %s5990_s2 = inlined_call_operand.vmem [shape: bf16[4,128], index: 2, kind: input, shape index: {}]   ;;  %s5991_s1 = inlined_call_operand.vmem [shape: bf16[2048,4], index: 1, kind: input, shape index: {}]   ;;  %s5992_s3 = inlined_call_operand.vmem [shape: f32[1,128], index: 3, kind: input, shape index: {}]   ;;  %s5993_s0 = inlined_call_operand.<no memory space> [shape: f32[1,1], index: 0, kind: input, shape index: {}]   ;;  %s5994_s4 = inlined_call_operand.vmem [shape: bf16[128,128], index: 4, kind: input, shape index: {}]   ;;  %s5995_s5 = inlined_call_operand.vmem [shape: f32[1,128], index: 5, kind: input, shape index: {}]   ;;  %s5996_s6 = inlined_call_operand.vmem [shape: f32[8,128], index: 6, kind: output, shape index: {}]  }
   0x1   :  { %v281_v0 = vld [vmem:[%s5990_s2] sm:$0x3]  ;;  %v4133_v3 = vld [vmem:[%s5991_s1 + $0x108] sm:$0xff]  ;;  %v4162_v4 = vld [vmem:[%s5991_s1 + $0x1f0] sm:$0xff]  ;;  %v4661_v43 = vstv %s5993_s0 }
   0x2   :  { %v1313_v1 = vsel %vm1311_vm0, %v281_v0, 0  ;;  %v4100_v2 = vld [vmem:[%s5991_s1] sm:$0xff]  ;;  %v4195_v5 = vld [vmem:[%s5991_s1 + $0x2f8] sm:$0xff]  ;;  %v4101_v6 = vld [vmem:[%s5991_s1 + $0x8] sm:$0xff] }
   0x3   :  { %1322 = vmatpush.bf16.msra.mxu0 %v1313_v1  ;;  %4236 = vmatpush.bf16.msra.mxu1 %v1313_v1  ;;  %v4134_v7 = vld [vmem:[%s5991_s1 + $0x110] sm:$0xff]  ;;  %v4163_v8 = vld [vmem:[%s5991_s1 + $0x1f8] sm:$0xff]  ;;  %v4196_v9 = vld [vmem:[%s5991_s1 + $0x300] sm:$0xff] }
   0x4   :  { %4237 = vmatpush.bf16.msra.mxu2 %v1313_v1  ;;  %4238 = vmatpush.bf16.msra.mxu3 %v1313_v1  ;;  %v4102_v10 = vld [vmem:[%s5991_s1 + $0x10] sm:$0xff]  ;;  %v4135_v11 = vld [vmem:[%s5991_s1 + $0x118] sm:$0xff]  ;;  %v4164_v12 = vld [vmem:[%s5991_s1 + $0x200] sm:$0xff] }
   0x5   :  { %v4197_v13 = vld [vmem:[%s5991_s1 + $0x308] sm:$0xff]  ;;  %v4103_v14 = vld [vmem:[%s5991_s1 + $0x18] sm:$0xff]  ;;  %v4136_v15 = vld [vmem:[%s5991_s1 + $0x120] sm:$0xff] }
   0x6   :  { %3940 = vmatmul.msk.bf16.vlgmr.msra.gmra.mxu0 %vm926_vm1, %v4100_v2  ;;  %3973 = vmatmul.msk.bf16.vlgmr.msra.gmra.mxu1 %vm926_vm1, %v4133_v3  ;;  %v4165_v16 = vld [vmem:[%s5991_s1 + $0x208] sm:$0xff]  ;;  %v4198_v17 = vld [vmem:[%s5991_s1 + $0x310] sm:$0xff]  ;;  %v4104_v18 = vld [vmem:[%s5991_s1 + $0x20] sm:$0xff] }
   0x7   :  { %4002 = vmatmul.msk.bf16.vlgmr.msra.gmra.mxu2 %vm926_vm1, %v4162_v4  ;;  %4035 = vmatmul.msk.bf16.vlgmr.msra.gmra.mxu3 %vm926_vm1, %v4195_v5  ;;  %v4137_v19 = vld [vmem:[%s5991_s1 + $0x128] sm:$0xff]  ;;  %v4166_v20 = vld [vmem:[%s5991_s1 + $0x210] sm:$0xff]  ;;  %v4199_v21 = vld [vmem:[%s5991_s1 + $0x318] sm:$0xff] }
   0x8   :  { %v4105_v22 = vld [vmem:[%s5991_s1 + $0x28] sm:$0xff]  ;;  %v4138_v23 = vld [vmem:[%s5991_s1 + $0x130] sm:$0xff]  ;;  %v4167_v24 = vld [vmem:[%s5991_s1 + $0x218] sm:$0xff] }
   0x9   :  { %v4200_v25 = vld [vmem:[%s5991_s1 + $0x320] sm:$0xff]  ;;  %v4106_v26 = vld [vmem:[%s5991_s1 + $0x30] sm:$0xff]  ;;  %v4139_v27 = vld [vmem:[%s5991_s1 + $0x138] sm:$0xff] }
   0xa   :  { %v4168_v28 = vld [vmem:[%s5991_s1 + $0x220] sm:$0xff]  ;;  %v4201_v29 = vld [vmem:[%s5991_s1 + $0x328] sm:$0xff]  ;;  %v4107_v30 = vld [vmem:[%s5991_s1 + $0x38] sm:$0xff] }
   0xb   :  { %v4140_v31 = vld [vmem:[%s5991_s1 + $0x140] sm:$0xff]  ;;  %v4169_v32 = vld [vmem:[%s5991_s1 + $0x228] sm:$0xff]  ;;  %v4202_v33 = vld [vmem:[%s5991_s1 + $0x330] sm:$0xff] }
   0xc   :  { %v4637_v34 = vld [vmem:[%s5992_s3] ss:$0 sm:$0xff]  ;;  %v4141_v36 = vld [vmem:[%s5991_s1 + $0x148] sm:$0xff]  ;;  %v4170_v39 = vld [vmem:[%s5991_s1 + $0x230] sm:$0xff] }
   0xd   :  { %v4108_v35 = vld [vmem:[%s5991_s1 + $0x40] sm:$0xff]  ;;  %v4203_v40 = vld [vmem:[%s5991_s1 + $0x338] sm:$0xff]  ;;  %v4109_v56 = vld [vmem:[%s5991_s1 + $0x48] sm:$0xff] }
   0xe   :  { %v4142_v57 = vld [vmem:[%s5991_s1 + $0x150] sm:$0xff]  ;;  %v4171_v60 = vld [vmem:[%s5991_s1 + $0x238] sm:$0xff]  ;;  %v4204_v61 = vld [vmem:[%s5991_s1 + $0x340] sm:$0xff] }
  0x16   :  { %3941 = vmatmul.msk.bf16.gmra.mxu0 %vm926_vm1, %v4101_v6  ;;  %3974 = vmatmul.msk.bf16.gmra.mxu1 %vm926_vm1, %v4134_v7 }
  0x17   :  { %4003 = vmatmul.msk.bf16.gmra.mxu2 %vm926_vm1, %v4163_v8  ;;  %4036 = vmatmul.msk.bf16.gmra.mxu3 %vm926_vm1, %v4196_v9 }
  0x26   :  { %3942 = vmatmul.msk.bf16.gmra.mxu0 %vm926_vm1, %v4102_v10  ;;  %3975 = vmatmul.msk.bf16.gmra.mxu1 %vm926_vm1, %v4135_v11 }
  0x27   :  { %4004 = vmatmul.msk.bf16.gmra.mxu2 %vm926_vm1, %v4164_v12  ;;  %4037 = vmatmul.msk.bf16.gmra.mxu3 %vm926_vm1, %v4197_v13 }
  0x36   :  { %3943 = vmatmul.msk.bf16.gmra.mxu0 %vm926_vm1, %v4103_v14  ;;  %3976 = vmatmul.msk.bf16.gmra.mxu1 %vm926_vm1, %v4136_v15 }
  0x37   :  { %4005 = vmatmul.msk.bf16.gmra.mxu2 %vm926_vm1, %v4165_v16  ;;  %4038 = vmatmul.msk.bf16.gmra.mxu3 %vm926_vm1, %v4198_v17 }
  0x46   :  { %3944 = vmatmul.msk.bf16.gmra.mxu0 %vm926_vm1, %v4104_v18  ;;  %3977 = vmatmul.msk.bf16.gmra.mxu1 %vm926_vm1, %v4137_v19 }
  0x47   :  { %4006 = vmatmul.msk.bf16.gmra.mxu2 %vm926_vm1, %v4166_v20  ;;  %4039 = vmatmul.msk.bf16.gmra.mxu3 %vm926_vm1, %v4199_v21  ;;  %v4110_v20 = vld [vmem:[%s5991_s1 + $0x50] sm:$0xff]  ;;  %v4143_v21 = vld [vmem:[%s5991_s1 + $0x158] sm:$0xff] }
  0x56   :  { %3945 = vmatmul.msk.bf16.gmra.mxu0 %vm926_vm1, %v4105_v22  ;;  %3978 = vmatmul.msk.bf16.gmra.mxu1 %vm926_vm1, %v4138_v23 }
  0x57   :  { %4007 = vmatmul.msk.bf16.gmra.mxu2 %vm926_vm1, %v4167_v24  ;;  %4040 = vmatmul.msk.bf16.gmra.mxu3 %vm926_vm1, %v4200_v25  ;;  %v4172_v25 = vld [vmem:[%s5991_s1 + $0x240] sm:$0xff] }
  0x66   :  { %3946 = vmatmul.msk.bf16.gmra.mxu0 %vm926_vm1, %v4106_v26  ;;  %3979 = vmatmul.msk.bf16.gmra.mxu1 %vm926_vm1, %v4139_v27  ;;  %v4205_v26 = vld [vmem:[%s5991_s1 + $0x348] sm:$0xff] }
  0x67   :  { %4008 = vmatmul.msk.bf16.gmra.mxu2 %vm926_vm1, %v4168_v28  ;;  %4041 = vmatmul.msk.bf16.gmra.mxu3 %vm926_vm1, %v4201_v29 }
  0x76   :  { %3947 = vmatmul.msk.bf16.gmra.mxu0 %vm926_vm1, %v4107_v30  ;;  %3980 = vmatmul.msk.bf16.gmra.mxu1 %vm926_vm1, %v4140_v31 }
  0x77   :  { %4009 = vmatmul.msk.bf16.gmra.mxu2 %vm926_vm1, %v4169_v32  ;;  %4042 = vmatmul.msk.bf16.gmra.mxu3 %vm926_vm1, %v4202_v33 }
  0x83   :  { %v1324_v37 = vpop.f32.mrf.mxu0  ;;  %v4645_v38 = vpop.f32.mrf.mxu1 }
  0x84   :  { %v1325_v41 = vadd.f32 %v4637_v34, %v1324_v37 }
  0x86   :  { %3948 = vmatmul.msk.bf16.gmra.mxu0 %vm926_vm1, %v4108_v35  ;;  %3981 = vmatmul.msk.bf16.gmra.mxu1 %vm926_vm1, %v4141_v36  ;;  %v1964_v42 = vmax.f32 %v1325_v41, 0.0 }
  0x87   :  { %4010 = vmatmul.msk.bf16.gmra.mxu2 %vm926_vm1, %v4170_v39  ;;  %4043 = vmatmul.msk.bf16.gmra.mxu3 %vm926_vm1, %v4203_v40 }
  0x88   :  { %v2222_v48 = vmax.f32 %v1964_v42, %v4661_v43 }
  0x8a   :  { %v4663_v44 = vpop.f32.mrf.mxu2  ;;  %v4665_v45 = vpop.f32.mrf.mxu3  ;;  %v2478_v51 = vmul.f32 %v2222_v48, %v2222_v48 }
  0x8b   :  { %v1326_v46 = vpop.f32.mrf.mxu0  ;;  %v4667_v47 = vpop.f32.mrf.mxu1 }
  0x8c   :  { %v1327_v49 = vadd.f32 %v4637_v34, %v1326_v46  ;;  %v2734_v62 = vmul.f32 %v2478_v51, %v2222_v48 }
  0x8e   :  { %v1965_v50 = vmax.f32 %v1327_v49, 0.0 }
  0x90   :  { %v2223_v52 = vmax.f32 %v1965_v50, %v4661_v43 }
  0x92   :  { %v2479_v53 = vmul.f32 %v2223_v52, %v2223_v52  ;;  %v4672_v54 = vpop.f32.mrf.mxu2  ;;  %v4674_v55 = vpop.f32.mrf.mxu3 }
  0x93   :  { %v1329_v58 = vpop.f32.mrf.mxu0  ;;  %v4682_v59 = vpop.f32.mrf.mxu1 }
  0x94   :  { %v2735_v63 = vmul.f32 %v2479_v53, %v2223_v52  ;;  %v1330_v0 = vadd.f32 %v4637_v34, %v1329_v58 }
  0x96   :  { %v2990_v1 = vadd.f32 %v2735_v63, %v2734_v62  ;;  %v1966_v2 = vmax.f32 %v1330_v0, 0.0  ;;  %3949 = vmatmul.msk.bf16.gmra.mxu0 %vm926_vm1, %v4109_v56  ;;  %3982 = vmatmul.msk.bf16.gmra.mxu1 %vm926_vm1, %v4142_v57 }
  0x97   :  { %4011 = vmatmul.msk.bf16.gmra.mxu2 %vm926_vm1, %v4171_v60  ;;  %4044 = vmatmul.msk.bf16.gmra.mxu3 %vm926_vm1, %v4204_v61 }
  0x98   :  { %v2224_v3 = vmax.f32 %v1966_v2, %v4661_v43 }
  0x9a   :  { %v2480_v4 = vmul.f32 %v2224_v3, %v2224_v3  ;;  %v4696_v5 = vpop.f32.mrf.mxu2  ;;  %v1804_v6 = vpop.f32.mrf.mxu3 }
  0x9b   :  { %v1805_v7 = vadd.f32 %v4637_v34, %v1804_v6  ;;  %v1331_v8 = vpop.f32.mrf.mxu0  ;;  %v4699_v9 = vpop.f32.mrf.mxu1  ;;  %v4144_v6 = vld [vmem:[%s5991_s1 + $0x160] sm:$0xff] }
  0x9c   :  { %v2736_v10 = vmul.f32 %v2480_v4, %v2224_v3  ;;  %v1332_v11 = vadd.f32 %v4637_v34, %v1331_v8  ;;  %v4111_v4 = vld [vmem:[%s5991_s1 + $0x58] sm:$0xff] }
  0x9d   :  { %v2156_v12 = vmax.f32 %v1805_v7, 0.0 }
  0x9e   :  { %v2991_v13 = vadd.f32 %v2990_v1, %v2736_v10  ;;  %v1967_v14 = vmax.f32 %v1332_v11, 0.0 }
  0x9f   :  { %v2414_v16 = vmax.f32 %v2156_v12, %v4661_v43 }
  0xa0   :  { %v2225_v15 = vmax.f32 %v1967_v14, %v4661_v43  ;;  %v4206_v14 = vld [vmem:[%s5991_s1 + $0x350] sm:$0xff] }
  0xa1   :  { %v2670_v29 = vmul.f32 %v2414_v16, %v2414_v16 }
  0xa2   :  { %v2481_v17 = vmul.f32 %v2225_v15, %v2225_v15  ;;  %v4704_v18 = vpop.f32.mrf.mxu2  ;;  %v1806_v19 = vpop.f32.mrf.mxu3 }
  0xa3   :  { %v1807_v22 = vadd.f32 %v4637_v34, %v1806_v19  ;;  %v1334_v23 = vpop.f32.mrf.mxu0  ;;  %v4713_v24 = vpop.f32.mrf.mxu1  ;;  %v2926_v36 = vmul.f32 %v2670_v29, %v2414_v16 }
  0xa4   :  { %v2737_v27 = vmul.f32 %v2481_v17, %v2225_v15  ;;  %v1335_v28 = vadd.f32 %v4637_v34, %v1334_v23 }
  0xa5   :  { %v2157_v30 = vmax.f32 %v1807_v22, 0.0 }
  0xa6   :  { %v2992_v31 = vadd.f32 %v2991_v13, %v2737_v27  ;;  %v1968_v32 = vmax.f32 %v1335_v28, 0.0  ;;  %3950 = vmatmul.msk.bf16.gmra.mxu0 %vm926_vm1, %v4110_v20  ;;  %3983 = vmatmul.msk.bf16.gmra.mxu1 %vm926_vm1, %v4143_v21  ;;  %v4173_v13 = vld [vmem:[%s5991_s1 + $0x248] sm:$0xff] }
  0xa7   :  { %v2415_v33 = vmax.f32 %v2157_v30, %v4661_v43  ;;  %4012 = vmatmul.msk.bf16.gmra.mxu2 %vm926_vm1, %v4172_v25  ;;  %4045 = vmatmul.msk.bf16.gmra.mxu3 %vm926_vm1, %v4205_v26 }
  0xa8   :  { %v2226_v35 = vmax.f32 %v1968_v32, %v4661_v43 }
  0xa9   :  { %v2671_v37 = vmul.f32 %v2415_v33, %v2415_v33 }
  0xaa   :  { %v2482_v39 = vmul.f32 %v2226_v35, %v2226_v35  ;;  %v1644_v40 = vpop.f32.mrf.mxu2  ;;  %v1809_v41 = vpop.f32.mrf.mxu3 }
  0xab   :  { %v2927_v42 = vmul.f32 %v2671_v37, %v2415_v33  ;;  %v1645_v46 = vadd.f32 %v4637_v34, %v1644_v40  ;;  %v1810_v48 = vadd.f32 %v4637_v34, %v1809_v41  ;;  %v1336_v49 = vpop.f32.mrf.mxu0  ;;  %v4730_v50 = vpop.f32.mrf.mxu1 }
  0xac   :  { %v2738_v51 = vmul.f32 %v2482_v39, %v2226_v35  ;;  %v1337_v52 = vadd.f32 %v4637_v34, %v1336_v49 }
  0xad   :  { %v3212_v53 = vadd.f32 %v2927_v42, %v2926_v36  ;;  %v2092_v56 = vmax.f32 %v1645_v46, 0.0  ;;  %v2158_v57 = vmax.f32 %v1810_v48, 0.0 }
  0xae   :  { %v2993_v58 = vadd.f32 %v2992_v31, %v2738_v51  ;;  %v1969_v60 = vmax.f32 %v1337_v52, 0.0 }
  0xaf   :  { %v2416_v61 = vmax.f32 %v2158_v57, %v4661_v43  ;;  %v2350_v63 = vmax.f32 %v2092_v56, %v4661_v43 }
  0xb0   :  { %v2227_v62 = vmax.f32 %v1969_v60, %v4661_v43 }
  0xb1   :  { %v2672_v0 = vmul.f32 %v2416_v61, %v2416_v61  ;;  %v2606_v17 = vmul.f32 %v2350_v63, %v2350_v63 }
  0xb2   :  { %v2483_v1 = vmul.f32 %v2227_v62, %v2227_v62  ;;  %v1646_v2 = vpop.f32.mrf.mxu2  ;;  %v1811_v3 = vpop.f32.mrf.mxu3 }
  0xb3   :  { %v2928_v7 = vmul.f32 %v2672_v0, %v2416_v61  ;;  %v1647_v8 = vadd.f32 %v4637_v34, %v1646_v2  ;;  %v1812_v10 = vadd.f32 %v4637_v34, %v1811_v3  ;;  %v1339_v11 = vpop.f32.mrf.mxu0  ;;  %v4744_v12 = vpop.f32.mrf.mxu1  ;;  %v2862_v28 = vmul.f32 %v2606_v17, %v2350_v63  ;;  %v4112_v2 = vld [vmem:[%s5991_s1 + $0x60] sm:$0xff]  ;;  %v4145_v3 = vld [vmem:[%s5991_s1 + $0x168] sm:$0xff] }
  0xb4   :  { %v2739_v15 = vmul.f32 %v2483_v1, %v2227_v62  ;;  %v1340_v16 = vadd.f32 %v4637_v34, %v1339_v11 }
  0xb5   :  { %v3213_v19 = vadd.f32 %v3212_v53, %v2928_v7  ;;  %v2093_v20 = vmax.f32 %v1647_v8, 0.0  ;;  %v2159_v21 = vmax.f32 %v1812_v10, 0.0 }
  0xb6   :  { %v2994_v22 = vadd.f32 %v2993_v58, %v2739_v15  ;;  %v1970_v23 = vmax.f32 %v1340_v16, 0.0  ;;  %3951 = vmatmul.msk.bf16.gmra.mxu0 %vm926_vm1, %v4111_v4  ;;  %3984 = vmatmul.msk.bf16.gmra.mxu1 %vm926_vm1, %v4144_v6 }
  0xb7   :  { %v2351_v25 = vmax.f32 %v2093_v20, %v4661_v43  ;;  %v2417_v26 = vmax.f32 %v2159_v21, %v4661_v43  ;;  %4013 = vmatmul.msk.bf16.gmra.mxu2 %vm926_vm1, %v4173_v13  ;;  %4046 = vmatmul.msk.bf16.gmra.mxu3 %vm926_vm1, %v4206_v14  ;;  %v4174_v13 = vld [vmem:[%s5991_s1 + $0x250] sm:$0xff]  ;;  %v4207_v14 = vld [vmem:[%s5991_s1 + $0x358] sm:$0xff] }
  0xb8   :  { %v2228_v27 = vmax.f32 %v1970_v23, %v4661_v43 }
  0xb9   :  { %v2607_v29 = vmul.f32 %v2351_v25, %v2351_v25  ;;  %v2673_v30 = vmul.f32 %v2417_v26, %v2417_v26 }
  0xba   :  { %v2484_v31 = vmul.f32 %v2228_v27, %v2228_v27  ;;  %v1649_v32 = vpop.f32.mrf.mxu2  ;;  %v1814_v33 = vpop.f32.mrf.mxu3 }
  0xbb   :  { %v2863_v35 = vmul.f32 %v2607_v29, %v2351_v25  ;;  %v2929_v36 = vmul.f32 %v2673_v30, %v2417_v26  ;;  %v1650_v37 = vadd.f32 %v4637_v34, %v1649_v32  ;;  %v1815_v39 = vadd.f32 %v4637_v34, %v1814_v33  ;;  %v1341_v40 = vpop.f32.mrf.mxu0  ;;  %v4762_v41 = vpop.f32.mrf.mxu1 }
  0xbc   :  { %v2740_v42 = vmul.f32 %v2484_v31, %v2228_v27  ;;  %v1342_v46 = vadd.f32 %v4637_v34, %v1341_v40 }
  0xbd   :  { %v3138_v48 = vadd.f32 %v2863_v35, %v2862_v28  ;;  %v3214_v49 = vadd.f32 %v3213_v19, %v2929_v36  ;;  %v2094_v51 = vmax.f32 %v1650_v37, 0.0  ;;  %v2160_v52 = vmax.f32 %v1815_v39, 0.0 }
  0xbe   :  { %v2995_v53 = vadd.f32 %v2994_v22, %v2740_v42  ;;  %v1971_v56 = vmax.f32 %v1342_v46, 0.0 }
  0xbf   :  { %v2352_v57 = vmax.f32 %v2094_v51, %v4661_v43  ;;  %v2418_v58 = vmax.f32 %v2160_v52, %v4661_v43 }
  0xc0   :  { %v2229_v60 = vmax.f32 %v1971_v56, %v4661_v43 }
  0xc1   :  { %v2608_v61 = vmul.f32 %v2352_v57, %v2352_v57  ;;  %v2674_v62 = vmul.f32 %v2418_v58, %v2418_v58 }
  0xc2   :  { %v2485_v63 = vmul.f32 %v2229_v60, %v2229_v60  ;;  %v1651_v0 = vpop.f32.mrf.mxu2  ;;  %v1816_v1 = vpop.f32.mrf.mxu3 }
  0xc3   :  { %v2864_v4 = vmul.f32 %v2608_v61, %v2352_v57  ;;  %v2930_v6 = vmul.f32 %v2674_v62, %v2418_v58  ;;  %v1652_v7 = vadd.f32 %v4637_v34, %v1651_v0  ;;  %v1817_v8 = vadd.f32 %v4637_v34, %v1816_v1  ;;  %v1344_v10 = vpop.f32.mrf.mxu0  ;;  %v4776_v11 = vpop.f32.mrf.mxu1 }
  0xc4   :  { %v2741_v15 = vmul.f32 %v2485_v63, %v2229_v60  ;;  %v1345_v16 = vadd.f32 %v4637_v34, %v1344_v10 }
  0xc5   :  { %v3139_v17 = vadd.f32 %v3138_v48, %v2864_v4  ;;  %v3215_v19 = vadd.f32 %v3214_v49, %v2930_v6  ;;  %v2095_v20 = vmax.f32 %v1652_v7, 0.0  ;;  %v2161_v21 = vmax.f32 %v1817_v8, 0.0 }
  0xc6   :  { %v2996_v22 = vadd.f32 %v2995_v53, %v2741_v15  ;;  %v1972_v23 = vmax.f32 %v1345_v16, 0.0  ;;  %3952 = vmatmul.msk.bf16.gmra.mxu0 %vm926_vm1, %v4112_v2  ;;  %3985 = vmatmul.msk.bf16.gmra.mxu1 %vm926_vm1, %v4145_v3  ;;  %v4113_v2 = vld [vmem:[%s5991_s1 + $0x68] sm:$0xff]  ;;  %v4146_v3 = vld [vmem:[%s5991_s1 + $0x170] sm:$0xff]  ;;  %v4208_v15 = vld [vmem:[%s5991_s1 + $0x360] sm:$0xff] }
  0xc7   :  { %v2353_v25 = vmax.f32 %v2095_v20, %v4661_v43  ;;  %v2419_v26 = vmax.f32 %v2161_v21, %v4661_v43  ;;  %4014 = vmatmul.msk.bf16.gmra.mxu2 %vm926_vm1, %v4174_v13  ;;  %4047 = vmatmul.msk.bf16.gmra.mxu3 %vm926_vm1, %v4207_v14  ;;  %v4175_v14 = vld [vmem:[%s5991_s1 + $0x258] sm:$0xff] }
  0xc8   :  { %v2230_v27 = vmax.f32 %v1972_v23, %v4661_v43 }
  0xc9   :  { %v2609_v28 = vmul.f32 %v2353_v25, %v2353_v25  ;;  %v2675_v29 = vmul.f32 %v2419_v26, %v2419_v26 }
  0xca   :  { %v2486_v30 = vmul.f32 %v2230_v27, %v2230_v27  ;;  %v1654_v31 = vpop.f32.mrf.mxu2  ;;  %v1819_v32 = vpop.f32.mrf.mxu3 }
  0xcb   :  { %v2865_v33 = vmul.f32 %v2609_v28, %v2353_v25  ;;  %v2931_v35 = vmul.f32 %v2675_v29, %v2419_v26  ;;  %v1655_v36 = vadd.f32 %v4637_v34, %v1654_v31  ;;  %v1820_v37 = vadd.f32 %v4637_v34, %v1819_v32  ;;  %v1346_v39 = vpop.f32.mrf.mxu0  ;;  %v4794_v40 = vpop.f32.mrf.mxu1 }
  0xcc   :  { %v2742_v42 = vmul.f32 %v2486_v30, %v2230_v27  ;;  %v1347_v46 = vadd.f32 %v4637_v34, %v1346_v39 }
  0xcd   :  { %v3140_v48 = vadd.f32 %v3139_v17, %v2865_v33  ;;  %v3216_v49 = vadd.f32 %v3215_v19, %v2931_v35  ;;  %v2096_v51 = vmax.f32 %v1655_v36, 0.0  ;;  %v2162_v52 = vmax.f32 %v1820_v37, 0.0 }
  0xce   :  { %v2997_v53 = vadd.f32 %v2996_v22, %v2742_v42  ;;  %v1973_v56 = vmax.f32 %v1347_v46, 0.0 }
  0xcf   :  { %v2354_v57 = vmax.f32 %v2096_v51, %v4661_v43  ;;  %v2420_v58 = vmax.f32 %v2162_v52, %v4661_v43 }
  0xd0   :  { %v2231_v60 = vmax.f32 %v1973_v56, %v4661_v43 }
  0xd1   :  { %v2610_v61 = vmul.f32 %v2354_v57, %v2354_v57  ;;  %v2676_v62 = vmul.f32 %v2420_v58, %v2420_v58 }
  0xd2   :  { %v2487_v63 = vmul.f32 %v2231_v60, %v2231_v60  ;;  %v1656_v0 = vpop.f32.mrf.mxu2  ;;  %v1821_v1 = vpop.f32.mrf.mxu3 }
  0xd3   :  { %v2866_v4 = vmul.f32 %v2610_v61, %v2354_v57  ;;  %v2932_v6 = vmul.f32 %v2676_v62, %v2420_v58  ;;  %v1657_v7 = vadd.f32 %v4637_v34, %v1656_v0  ;;  %v1822_v8 = vadd.f32 %v4637_v34, %v1821_v1  ;;  %v1349_v10 = vpop.f32.mrf.mxu0  ;;  %v4808_v13 = vpop.f32.mrf.mxu1 }
  0xd4   :  { %v2743_v16 = vmul.f32 %v2487_v63, %v2231_v60  ;;  %v1350_v17 = vadd.f32 %v4637_v34, %v1349_v10 }
  0xd5   :  { %v3141_v19 = vadd.f32 %v3140_v48, %v2866_v4  ;;  %v3217_v20 = vadd.f32 %v3216_v49, %v2932_v6  ;;  %v2097_v21 = vmax.f32 %v1657_v7, 0.0  ;;  %v2163_v22 = vmax.f32 %v1822_v8, 0.0  ;;  %v4114_v4 = vld [vmem:[%s5991_s1 + $0x70] sm:$0xff]  ;;  %v4147_v6 = vld [vmem:[%s5991_s1 + $0x178] sm:$0xff] }
  0xd6   :  { %v2998_v23 = vadd.f32 %v2997_v53, %v2743_v16  ;;  %v1974_v25 = vmax.f32 %v1350_v17, 0.0  ;;  %3953 = vmatmul.msk.bf16.gmra.mxu0 %vm926_vm1, %v4113_v2  ;;  %3986 = vmatmul.msk.bf16.gmra.mxu1 %vm926_vm1, %v4146_v3  ;;  %v4176_v17 = vld [vmem:[%s5991_s1 + $0x260] sm:$0xff] }
  0xd7   :  { %v2355_v26 = vmax.f32 %v2097_v21, %v4661_v43  ;;  %v2421_v27 = vmax.f32 %v2163_v22, %v4661_v43  ;;  %4015 = vmatmul.msk.bf16.gmra.mxu2 %vm926_vm1, %v4175_v14  ;;  %4048 = vmatmul.msk.bf16.gmra.mxu3 %vm926_vm1, %v4208_v15 }
  0xd8   :  { %v2232_v28 = vmax.f32 %v1974_v25, %v4661_v43 }
  0xd9   :  { %v2611_v29 = vmul.f32 %v2355_v26, %v2355_v26  ;;  %v2677_v30 = vmul.f32 %v2421_v27, %v2421_v27 }
  0xda   :  { %v2488_v31 = vmul.f32 %v2232_v28, %v2232_v28  ;;  %v1659_v32 = vpop.f32.mrf.mxu2  ;;  %v1824_v33 = vpop.f32.mrf.mxu3 }
  0xdb   :  { %v2867_v35 = vmul.f32 %v2611_v29, %v2355_v26  ;;  %v2933_v36 = vmul.f32 %v2677_v30, %v2421_v27  ;;  %v1660_v37 = vadd.f32 %v4637_v34, %v1659_v32  ;;  %v1825_v39 = vadd.f32 %v4637_v34, %v1824_v33  ;;  %v1351_v42 = vpop.f32.mrf.mxu0  ;;  %v4826_v46 = vpop.f32.mrf.mxu1 }
  0xdc   :  { %v2744_v48 = vmul.f32 %v2488_v31, %v2232_v28  ;;  %v1352_v49 = vadd.f32 %v4637_v34, %v1351_v42 }
  0xdd   :  { %v3142_v51 = vadd.f32 %v3141_v19, %v2867_v35  ;;  %v3218_v52 = vadd.f32 %v3217_v20, %v2933_v36  ;;  %v2098_v53 = vmax.f32 %v1660_v37, 0.0  ;;  %v2164_v56 = vmax.f32 %v1825_v39, 0.0  ;;  %v4209_v19 = vld [vmem:[%s5991_s1 + $0x368] sm:$0xff] }
  0xde   :  { %v2999_v57 = vadd.f32 %v2998_v23, %v2744_v48  ;;  %v1975_v58 = vmax.f32 %v1352_v49, 0.0 }
  0xdf   :  { %v2356_v60 = vmax.f32 %v2098_v53, %v4661_v43  ;;  %v2422_v61 = vmax.f32 %v2164_v56, %v4661_v43 }
  0xe0   :  { %v2233_v62 = vmax.f32 %v1975_v58, %v4661_v43 }
  0xe1   :  { %v2612_v63 = vmul.f32 %v2356_v60, %v2356_v60  ;;  %v2678_v0 = vmul.f32 %v2422_v61, %v2422_v61 }
  0xe2   :  { %v2489_v1 = vmul.f32 %v2233_v62, %v2233_v62  ;;  %v1661_v2 = vpop.f32.mrf.mxu2  ;;  %v1826_v3 = vpop.f32.mrf.mxu3 }
  0xe3   :  { %v2868_v7 = vmul.f32 %v2612_v63, %v2356_v60  ;;  %v2934_v8 = vmul.f32 %v2678_v0, %v2422_v61  ;;  %v1662_v10 = vadd.f32 %v4637_v34, %v1661_v2  ;;  %v1827_v14 = vadd.f32 %v4637_v34, %v1826_v3  ;;  %v1354_v15 = vpop.f32.mrf.mxu0  ;;  %v4840_v16 = vpop.f32.mrf.mxu1 }
  0xe4   :  { %v2745_v20 = vmul.f32 %v2489_v1, %v2233_v62  ;;  %v1355_v21 = vadd.f32 %v4637_v34, %v1354_v15 }
  0xe5   :  { %v3143_v22 = vadd.f32 %v3142_v51, %v2868_v7  ;;  %v3219_v23 = vadd.f32 %v3218_v52, %v2934_v8  ;;  %v2099_v25 = vmax.f32 %v1662_v10, 0.0  ;;  %v2165_v26 = vmax.f32 %v1827_v14, 0.0  ;;  %v4115_v10 = vld [vmem:[%s5991_s1 + $0x78] sm:$0xff]  ;;  %v4148_v14 = vld [vmem:[%s5991_s1 + $0x180] sm:$0xff] }
  0xe6   :  { %v3000_v27 = vadd.f32 %v2999_v57, %v2745_v20  ;;  %v1976_v28 = vmax.f32 %v1355_v21, 0.0  ;;  %3954 = vmatmul.msk.bf16.gmra.mxu0 %vm926_vm1, %v4114_v4  ;;  %3987 = vmatmul.msk.bf16.gmra.mxu1 %vm926_vm1, %v4147_v6 }
  0xe7   :  { %v2357_v29 = vmax.f32 %v2099_v25, %v4661_v43  ;;  %v2423_v30 = vmax.f32 %v2165_v26, %v4661_v43  ;;  %4016 = vmatmul.msk.bf16.gmra.mxu2 %vm926_vm1, %v4176_v17  ;;  %4049 = vmatmul.msk.bf16.gmra.mxu3 %vm926_vm1, %v4209_v19  ;;  %v4210_v25 = vld [vmem:[%s5991_s1 + $0x370] sm:$0xff] }
  0xe8   :  { %v2234_v31 = vmax.f32 %v1976_v28, %v4661_v43 }
  0xe9   :  { %v2613_v32 = vmul.f32 %v2357_v29, %v2357_v29  ;;  %v2679_v33 = vmul.f32 %v2423_v30, %v2423_v30 }
  0xea   :  { %v2490_v35 = vmul.f32 %v2234_v31, %v2234_v31  ;;  %v1664_v36 = vpop.f32.mrf.mxu2  ;;  %v1829_v37 = vpop.f32.mrf.mxu3 }
  0xeb   :  { %v2869_v39 = vmul.f32 %v2613_v32, %v2357_v29  ;;  %v2935_v42 = vmul.f32 %v2679_v33, %v2423_v30  ;;  %v1665_v48 = vadd.f32 %v4637_v34, %v1664_v36  ;;  %v1830_v49 = vadd.f32 %v4637_v34, %v1829_v37  ;;  %v1356_v51 = vpop.f32.mrf.mxu0  ;;  %v4858_v52 = vpop.f32.mrf.mxu1 }
  0xec   :  { %v2746_v53 = vmul.f32 %v2490_v35, %v2234_v31  ;;  %v1357_v56 = vadd.f32 %v4637_v34, %v1356_v51 }
  0xed   :  { %v3144_v57 = vadd.f32 %v3143_v22, %v2869_v39  ;;  %v3220_v58 = vadd.f32 %v3219_v23, %v2935_v42  ;;  %v2100_v60 = vmax.f32 %v1665_v48, 0.0  ;;  %v2166_v61 = vmax.f32 %v1830_v49, 0.0  ;;  %v4177_v23 = vld [vmem:[%s5991_s1 + $0x268] sm:$0xff] }
  0xee   :  { %v3001_v62 = vadd.f32 %v3000_v27, %v2746_v53  ;;  %v1977_v63 = vmax.f32 %v1357_v56, 0.0 }
  0xef   :  { %v2358_v0 = vmax.f32 %v2100_v60, %v4661_v43  ;;  %v2424_v1 = vmax.f32 %v2166_v61, %v4661_v43 }
  0xf0   :  { %v2235_v2 = vmax.f32 %v1977_v63, %v4661_v43 }
  0xf1   :  { %v2614_v3 = vmul.f32 %v2358_v0, %v2358_v0  ;;  %v2680_v4 = vmul.f32 %v2424_v1, %v2424_v1 }
  0xf2   :  { %v2491_v6 = vmul.f32 %v2235_v2, %v2235_v2  ;;  %v1666_v7 = vpop.f32.mrf.mxu2  ;;  %v1831_v8 = vpop.f32.mrf.mxu3 }
  0xf3   :  { %v2870_v15 = vmul.f32 %v2614_v3, %v2358_v0  ;;  %v2936_v17 = vmul.f32 %v2680_v4, %v2424_v1  ;;  %v1667_v19 = vadd.f32 %v4637_v34, %v1666_v7  ;;  %v1832_v20 = vadd.f32 %v4637_v34, %v1831_v8  ;;  %v1359_v21 = vpop.f32.mrf.mxu0  ;;  %v4872_v22 = vpop.f32.mrf.mxu1 }
  0xf4   :  { %v2747_v26 = vmul.f32 %v2491_v6, %v2235_v2  ;;  %v1360_v27 = vadd.f32 %v4637_v34, %v1359_v21  ;;  %v4116_v21 = vld [vmem:[%s5991_s1 + $0x80] sm:$0xff] }
  0xf5   :  { %v3145_v28 = vadd.f32 %v3144_v57, %v2870_v15  ;;  %v3221_v29 = vadd.f32 %v3220_v58, %v2936_v17  ;;  %v2101_v30 = vmax.f32 %v1667_v19, 0.0  ;;  %v2167_v31 = vmax.f32 %v1832_v20, 0.0 }
  0xf6   :  { %v3002_v32 = vadd.f32 %v3001_v62, %v2747_v26  ;;  %v1978_v33 = vmax.f32 %v1360_v27, 0.0  ;;  %3955 = vmatmul.msk.bf16.gmra.mxu0 %vm926_vm1, %v4115_v10  ;;  %3988 = vmatmul.msk.bf16.gmra.mxu1 %vm926_vm1, %v4148_v14 }
  0xf7   :  { %v2359_v35 = vmax.f32 %v2101_v30, %v4661_v43  ;;  %v2425_v36 = vmax.f32 %v2167_v31, %v4661_v43  ;;  %4017 = vmatmul.msk.bf16.gmra.mxu2 %vm926_vm1, %v4177_v23  ;;  %4050 = vmatmul.msk.bf16.gmra.mxu3 %vm926_vm1, %v4210_v25  ;;  %v4149_v23 = vld [vmem:[%s5991_s1 + $0x188] sm:$0xff]  ;;  %v4178_v31 = vld [vmem:[%s5991_s1 + $0x270] sm:$0xff] }
  0xf8   :  { %v2236_v37 = vmax.f32 %v1978_v33, %v4661_v43 }
  0xf9   :  { %v2615_v39 = vmul.f32 %v2359_v35, %v2359_v35  ;;  %v2681_v42 = vmul.f32 %v2425_v36, %v2425_v36 }
  0xfa   :  { %v2492_v48 = vmul.f32 %v2236_v37, %v2236_v37  ;;  %v1669_v49 = vpop.f32.mrf.mxu2  ;;  %v1834_v51 = vpop.f32.mrf.mxu3 }
  0xfb   :  { %v2871_v53 = vmul.f32 %v2615_v39, %v2359_v35  ;;  %v2937_v56 = vmul.f32 %v2681_v42, %v2425_v36  ;;  %v1670_v57 = vadd.f32 %v4637_v34, %v1669_v49  ;;  %v1835_v58 = vadd.f32 %v4637_v34, %v1834_v51  ;;  %v1361_v60 = vpop.f32.mrf.mxu0  ;;  %v4890_v61 = vpop.f32.mrf.mxu1 }
  0xfc   :  { %v2748_v62 = vmul.f32 %v2492_v48, %v2236_v37  ;;  %v1362_v63 = vadd.f32 %v4637_v34, %v1361_v60 }
  0xfd   :  { %v3146_v0 = vadd.f32 %v3145_v28, %v2871_v53  ;;  %v3222_v1 = vadd.f32 %v3221_v29, %v2937_v56  ;;  %v2102_v2 = vmax.f32 %v1670_v57, 0.0  ;;  %v2168_v3 = vmax.f32 %v1835_v58, 0.0 }
  0xfe   :  { %v3003_v4 = vadd.f32 %v3002_v32, %v2748_v62  ;;  %v1979_v6 = vmax.f32 %v1362_v63, 0.0  ;;  %v4211_v32 = vld [vmem:[%s5991_s1 + $0x378] sm:$0xff] }
  0xff   :  { %v2360_v7 = vmax.f32 %v2102_v2, %v4661_v43  ;;  %v2426_v8 = vmax.f32 %v2168_v3, %v4661_v43 }
 0x100   :  { %v2237_v10 = vmax.f32 %v1979_v6, %v4661_v43 }
 0x101   :  { %v2616_v14 = vmul.f32 %v2360_v7, %v2360_v7  ;;  %v2682_v15 = vmul.f32 %v2426_v8, %v2426_v8 }
 0x102   :  { %v2493_v17 = vmul.f32 %v2237_v10, %v2237_v10  ;;  %v1671_v19 = vpop.f32.mrf.mxu2  ;;  %v1836_v20 = vpop.f32.mrf.mxu3 }
 0x103   :  { %v2872_v25 = vmul.f32 %v2616_v14, %v2360_v7  ;;  %v2938_v26 = vmul.f32 %v2682_v15, %v2426_v8  ;;  %v1672_v27 = vadd.f32 %v4637_v34, %v1671_v19  ;;  %v1837_v28 = vadd.f32 %v4637_v34, %v1836_v20  ;;  %v1364_v29 = vpop.f32.mrf.mxu0  ;;  %v4904_v30 = vpop.f32.mrf.mxu1 }
 0x104   :  { %v2749_v33 = vmul.f32 %v2493_v17, %v2237_v10  ;;  %v1365_v35 = vadd.f32 %v4637_v34, %v1364_v29 }
 0x105   :  { %v3147_v36 = vadd.f32 %v3146_v0, %v2872_v25  ;;  %v3223_v37 = vadd.f32 %v3222_v1, %v2938_v26  ;;  %v2103_v39 = vmax.f32 %v1672_v27, 0.0  ;;  %v2169_v42 = vmax.f32 %v1837_v28, 0.0 }
 0x106   :  { %v3004_v48 = vadd.f32 %v3003_v4, %v2749_v33  ;;  %v1980_v49 = vmax.f32 %v1365_v35, 0.0  ;;  %3956 = vmatmul.msk.bf16.gmra.mxu0 %vm926_vm1, %v4116_v21  ;;  %3989 = vmatmul.msk.bf16.gmra.mxu1 %vm926_vm1, %v4149_v23  ;;  %v4150_v33 = vld [vmem:[%s5991_s1 + $0x190] sm:$0xff] }
 0x107   :  { %v2361_v51 = vmax.f32 %v2103_v39, %v4661_v43  ;;  %v2427_v53 = vmax.f32 %v2169_v42, %v4661_v43  ;;  %4018 = vmatmul.msk.bf16.gmra.mxu2 %vm926_vm1, %v4178_v31  ;;  %4051 = vmatmul.msk.bf16.gmra.mxu3 %vm926_vm1, %v4211_v32  ;;  %v4117_v32 = vld [vmem:[%s5991_s1 + $0x88] sm:$0xff] }
 0x108   :  { %v2238_v56 = vmax.f32 %v1980_v49, %v4661_v43  ;;  %v4179_v49 = vld [vmem:[%s5991_s1 + $0x278] sm:$0xff] }
 0x109   :  { %v2617_v57 = vmul.f32 %v2361_v51, %v2361_v51  ;;  %v2683_v58 = vmul.f32 %v2427_v53, %v2427_v53 }
 0x10a   :  { %v2494_v60 = vmul.f32 %v2238_v56, %v2238_v56  ;;  %v1674_v62 = vpop.f32.mrf.mxu2  ;;  %v1839_v63 = vpop.f32.mrf.mxu3 }
 0x10b   :  { %v2873_v0 = vmul.f32 %v2617_v57, %v2361_v51  ;;  %v2939_v1 = vmul.f32 %v2683_v58, %v2427_v53  ;;  %v1675_v2 = vadd.f32 %v4637_v34, %v1674_v62  ;;  %v1840_v3 = vadd.f32 %v4637_v34, %v1839_v63  ;;  %v1366_v4 = vpop.f32.mrf.mxu0  ;;  %v4922_v6 = vpop.f32.mrf.mxu1  ;;  %v4212_v51 = vld [vmem:[%s5991_s1 + $0x380] sm:$0xff] }
 0x10c   :  { %v2750_v7 = vmul.f32 %v2494_v60, %v2238_v56  ;;  %v1367_v8 = vadd.f32 %v4637_v34, %v1366_v4 }
 0x10d   :  { %v3148_v10 = vadd.f32 %v3147_v36, %v2873_v0  ;;  %v3224_v14 = vadd.f32 %v3223_v37, %v2939_v1  ;;  %v2104_v15 = vmax.f32 %v1675_v2, 0.0  ;;  %v2170_v17 = vmax.f32 %v1840_v3, 0.0 }
 0x10e   :  { %v3005_v19 = vadd.f32 %v3004_v48, %v2750_v7  ;;  %v1981_v20 = vmax.f32 %v1367_v8, 0.0 }
 0x10f   :  { %v2362_v21 = vmax.f32 %v2104_v15, %v4661_v43  ;;  %v2428_v23 = vmax.f32 %v2170_v17, %v4661_v43 }
 0x110   :  { %v2239_v25 = vmax.f32 %v1981_v20, %v4661_v43 }
 0x111   :  { %v2618_v26 = vmul.f32 %v2362_v21, %v2362_v21  ;;  %v2684_v27 = vmul.f32 %v2428_v23, %v2428_v23 }
 0x112   :  { %v2495_v28 = vmul.f32 %v2239_v25, %v2239_v25  ;;  %v1676_v29 = vpop.f32.mrf.mxu2  ;;  %v1841_v31 = vpop.f32.mrf.mxu3 }
 0x113   :  { %v2874_v35 = vmul.f32 %v2618_v26, %v2362_v21  ;;  %v2940_v36 = vmul.f32 %v2684_v27, %v2428_v23  ;;  %v1677_v37 = vadd.f32 %v4637_v34, %v1676_v29  ;;  %v1842_v39 = vadd.f32 %v4637_v34, %v1841_v31  ;;  %v1369_v42 = vpop.f32.mrf.mxu0  ;;  %v4936_v48 = vpop.f32.mrf.mxu1 }
 0x114   :  { %6002 = vst [vmem:[#allocation3_spill] sm:$0xff] %v4936_v48  ;;  %v2751_v53 = vmul.f32 %v2495_v28, %v2239_v25  ;;  %v1370_v56 = vadd.f32 %v4637_v34, %v1369_v42 }
 0x115   :  { %v3149_v57 = vadd.f32 %v3148_v10, %v2874_v35  ;;  %v3225_v58 = vadd.f32 %v3224_v14, %v2940_v36  ;;  %v2105_v60 = vmax.f32 %v1677_v37, 0.0  ;;  %v2171_v62 = vmax.f32 %v1842_v39, 0.0 }
 0x116   :  { %v3006_v63 = vadd.f32 %v3005_v19, %v2751_v53  ;;  %v1982_v0 = vmax.f32 %v1370_v56, 0.0  ;;  %3957 = vmatmul.msk.bf16.gmra.mxu0 %vm926_vm1, %v4117_v32  ;;  %3990 = vmatmul.msk.bf16.gmra.mxu1 %vm926_vm1, %v4150_v33  ;;  %v4118_v56 = vld [vmem:[%s5991_s1 + $0x90] sm:$0xff] }
 0x117   :  { %v2363_v1 = vmax.f32 %v2105_v60, %v4661_v43  ;;  %v2429_v2 = vmax.f32 %v2171_v62, %v4661_v43  ;;  %4019 = vmatmul.msk.bf16.gmra.mxu2 %vm926_vm1, %v4179_v49  ;;  %4052 = vmatmul.msk.bf16.gmra.mxu3 %vm926_vm1, %v4212_v51 }
 0x118   :  { %v2240_v3 = vmax.f32 %v1982_v0, %v4661_v43 }
 0x119   :  { %v2619_v4 = vmul.f32 %v2363_v1, %v2363_v1  ;;  %v2685_v7 = vmul.f32 %v2429_v2, %v2429_v2 }
 0x11a   :  { %v2496_v8 = vmul.f32 %v2240_v3, %v2240_v3  ;;  %v1679_v10 = vpop.f32.mrf.mxu2  ;;  %v1844_v14 = vpop.f32.mrf.mxu3 }
 0x11b   :  { %v2875_v15 = vmul.f32 %v2619_v4, %v2363_v1  ;;  %v2941_v17 = vmul.f32 %v2685_v7, %v2429_v2  ;;  %v1680_v19 = vadd.f32 %v4637_v34, %v1679_v10  ;;  %v1845_v20 = vadd.f32 %v4637_v34, %v1844_v14  ;;  %v1371_v21 = vpop.f32.mrf.mxu0  ;;  %v4954_v23 = vpop.f32.mrf.mxu1  ;;  %v4180_v2 = vld [vmem:[%s5991_s1 + $0x280] sm:$0xff] }
 0x11c   :  { %6003 = vst [vmem:[#allocation4_spill] sm:$0xff] %v4954_v23  ;;  %v2752_v25 = vmul.f32 %v2496_v8, %v2240_v3  ;;  %v1372_v26 = vadd.f32 %v4637_v34, %v1371_v21  ;;  %v4213_v3 = vld [vmem:[%s5991_s1 + $0x388] sm:$0xff] }
 0x11d   :  { %v3150_v27 = vadd.f32 %v3149_v57, %v2875_v15  ;;  %v3226_v28 = vadd.f32 %v3225_v58, %v2941_v17  ;;  %v2106_v29 = vmax.f32 %v1680_v19, 0.0  ;;  %v2172_v31 = vmax.f32 %v1845_v20, 0.0  ;;  %v4151_v57 = vld [vmem:[%s5991_s1 + $0x198] sm:$0xff] }
 0x11e   :  { %v3007_v32 = vadd.f32 %v3006_v63, %v2752_v25  ;;  %v1983_v33 = vmax.f32 %v1372_v26, 0.0 }
 0x11f   :  { %v2364_v35 = vmax.f32 %v2106_v29, %v4661_v43  ;;  %v2430_v36 = vmax.f32 %v2172_v31, %v4661_v43 }
 0x120   :  { %v2241_v37 = vmax.f32 %v1983_v33, %v4661_v43 }
 0x121   :  { %v2620_v39 = vmul.f32 %v2364_v35, %v2364_v35  ;;  %v2686_v42 = vmul.f32 %v2430_v36, %v2430_v36 }
 0x122   :  { %v2497_v49 = vmul.f32 %v2241_v37, %v2241_v37  ;;  %v1681_v51 = vpop.f32.mrf.mxu2  ;;  %v1846_v53 = vpop.f32.mrf.mxu3 }
 0x123   :  { %v2876_v58 = vmul.f32 %v2620_v39, %v2364_v35  ;;  %v2942_v60 = vmul.f32 %v2686_v42, %v2430_v36  ;;  %v1682_v62 = vadd.f32 %v4637_v34, %v1681_v51  ;;  %v1847_v63 = vadd.f32 %v4637_v34, %v1846_v53  ;;  %v1374_v0 = vpop.f32.mrf.mxu0  ;;  %v4968_v1 = vpop.f32.mrf.mxu1 }
 0x124   :  { %6004 = vst [vmem:[#allocation5_spill] sm:$0xff] %v4968_v1  ;;  %v2753_v4 = vmul.f32 %v2497_v49, %v2241_v37  ;;  %v1375_v7 = vadd.f32 %v4637_v34, %v1374_v0 }
 0x125   :  { %v3151_v8 = vadd.f32 %v3150_v27, %v2876_v58  ;;  %v3227_v10 = vadd.f32 %v3226_v28, %v2942_v60  ;;  %v2107_v14 = vmax.f32 %v1682_v62, 0.0  ;;  %v2173_v15 = vmax.f32 %v1847_v63, 0.0  ;;  %v4235_v62 = vld [vmem:[%s5994_s4 + $0x38] sm:$0xff] }
 0x126   :  { %v3008_v17 = vadd.f32 %v3007_v32, %v2753_v4  ;;  %v1984_v19 = vmax.f32 %v1375_v7, 0.0  ;;  %3958 = vmatmul.msk.bf16.gmra.mxu0 %vm926_vm1, %v4118_v56  ;;  %3991 = vmatmul.msk.bf16.gmra.mxu1 %vm926_vm1, %v4151_v57 }
 0x127   :  { %v2365_v20 = vmax.f32 %v2107_v14, %v4661_v43  ;;  %v2431_v21 = vmax.f32 %v2173_v15, %v4661_v43  ;;  %4020 = vmatmul.msk.bf16.gmra.mxu2 %vm926_vm1, %v4180_v2  ;;  %4053 = vmatmul.msk.bf16.gmra.mxu3 %vm926_vm1, %v4213_v3  ;;  %v4152_v14 = vld [vmem:[%s5991_s1 + $0x1a0] sm:$0xff] }
 0x128   :  { %v2242_v25 = vmax.f32 %v1984_v19, %v4661_v43  ;;  %3410 = vmatpush.bf16.msrb.mxu1 %v4235_v62  ;;  %v5004_v19 = vld [vmem:[%s5992_s3] ss:$0 sm:$0xff] }
 0x129   :  { %v2621_v26 = vmul.f32 %v2365_v20, %v2365_v20  ;;  %v2687_v27 = vmul.f32 %v2431_v21, %v2431_v21 }
 0x12a   :  { %v2498_v28 = vmul.f32 %v2242_v25, %v2242_v25  ;;  %v1684_v29 = vpop.f32.mrf.mxu2  ;;  %v1849_v31 = vpop.f32.mrf.mxu3 }
 0x12b   :  { %v2877_v32 = vmul.f32 %v2621_v26, %v2365_v20  ;;  %v2943_v33 = vmul.f32 %v2687_v27, %v2431_v21  ;;  %v1685_v35 = vadd.f32 %v4637_v34, %v1684_v29  ;;  %v1850_v36 = vadd.f32 %v4637_v34, %v1849_v31  ;;  %v1376_v37 = vpop.f32.mrf.mxu0  ;;  %v4986_v39 = vpop.f32.mrf.mxu1  ;;  %v4181_v27 = vld [vmem:[%s5991_s1 + $0x288] sm:$0xff] }
 0x12c   :  { %6005 = vst [vmem:[#allocation6_spill] sm:$0xff] %v4986_v39  ;;  %v2754_v42 = vmul.f32 %v2498_v28, %v2242_v25  ;;  %v1377_v49 = vadd.f32 %v4637_v34, %v1376_v37  ;;  %v4214_v28 = vld [vmem:[%s5991_s1 + $0x390] sm:$0xff] }
 0x12d   :  { %v3152_v51 = vadd.f32 %v3151_v8, %v2877_v32  ;;  %v3228_v53 = vadd.f32 %v3227_v10, %v2943_v33  ;;  %v2108_v56 = vmax.f32 %v1685_v35, 0.0  ;;  %v2174_v57 = vmax.f32 %v1850_v36, 0.0  ;;  %v4119_v10 = vld [vmem:[%s5991_s1 + $0x98] sm:$0xff] }
 0x12e   :  { %v3009_v58 = vadd.f32 %v3008_v17, %v2754_v42  ;;  %v1985_v60 = vmax.f32 %v1377_v49, 0.0 }
 0x12f   :  { %v2366_v63 = vmax.f32 %v2108_v56, %v4661_v43  ;;  %v2432_v0 = vmax.f32 %v2174_v57, %v4661_v43 }
 0x130   :  { %v2243_v2 = vmax.f32 %v1985_v60, %v4661_v43 }
 0x131   :  { %v2622_v3 = vmul.f32 %v2366_v63, %v2366_v63  ;;  %v2688_v4 = vmul.f32 %v2432_v0, %v2432_v0 }
 0x132   :  { %v2499_v34 = vmul.f32 %v2243_v2, %v2243_v2  ;;  %v1686_v7 = vpop.f32.mrf.mxu2  ;;  %v1851_v8 = vpop.f32.mrf.mxu3 }
 0x133   :  { %v2878_v15 = vmul.f32 %v2622_v3, %v2366_v63  ;;  %v2944_v17 = vmul.f32 %v2688_v4, %v2432_v0  ;;  %v1687_v20 = vadd.f32 %v5004_v19, %v1686_v7  ;;  %v1852_v21 = vadd.f32 %v5004_v19, %v1851_v8  ;;  %v1379_v25 = vpop.f32.mrf.mxu0  ;;  %v5008_v26 = vpop.f32.mrf.mxu1 }
 0x134   :  { %6006 = vst [vmem:[#allocation7_spill] sm:$0xff] %v5008_v26  ;;  %v2755_v29 = vmul.f32 %v2499_v34, %v2243_v2  ;;  %v1380_v31 = vadd.f32 %v5004_v19, %v1379_v25 }
 0x135   :  { %v3153_v32 = vadd.f32 %v3152_v51, %v2878_v15  ;;  %v3229_v33 = vadd.f32 %v3228_v53, %v2944_v17  ;;  %v2109_v35 = vmax.f32 %v1687_v20, 0.0  ;;  %v2175_v36 = vmax.f32 %v1852_v21, 0.0 }
 0x136   :  { %v3010_v37 = vadd.f32 %v3009_v58, %v2755_v29  ;;  %v1986_v42 = vmax.f32 %v1380_v31, 0.0  ;;  %3959 = vmatmul.msk.bf16.gmra.mxu0 %vm926_vm1, %v4119_v10  ;;  %3992 = vmatmul.msk.bf16.gmra.mxu1 %vm926_vm1, %v4152_v14 }
 0x137   :  { %v2367_v49 = vmax.f32 %v2109_v35, %v4661_v43  ;;  %v2433_v56 = vmax.f32 %v2175_v36, %v4661_v43  ;;  %4021 = vmatmul.msk.bf16.gmra.mxu2 %vm926_vm1, %v4181_v27  ;;  %4054 = vmatmul.msk.bf16.gmra.mxu3 %vm926_vm1, %v4214_v28 }
 0x138   :  { %v2244_v57 = vmax.f32 %v1986_v42, %v4661_v43 }
 0x139   :  { %v2623_v51 = vmul.f32 %v2367_v49, %v2367_v49  ;;  %v2689_v53 = vmul.f32 %v2433_v56, %v2433_v56 }
 0x13a   :  { %v2500_v60 = vmul.f32 %v2244_v57, %v2244_v57  ;;  %v1689_v62 = vpop.f32.mrf.mxu2  ;;  %v1854_v58 = vpop.f32.mrf.mxu3 }
 0x13b   :  { %v2879_v63 = vmul.f32 %v2623_v51, %v2367_v49  ;;  %v2945_v0 = vmul.f32 %v2689_v53, %v2433_v56  ;;  %v1690_v2 = vadd.f32 %v5004_v19, %v1689_v62  ;;  %v1855_v3 = vadd.f32 %v5004_v19, %v1854_v58  ;;  %v1381_v4 = vpop.f32.mrf.mxu0  ;;  %v5026_v34 = vpop.f32.mrf.mxu1  ;;  %v4215_v62 = vld [vmem:[%s5991_s1 + $0x398] sm:$0xff] }
 0x13c   :  { %6007 = vst [vmem:[#allocation8_spill] sm:$0xff] %v5026_v34  ;;  %v2756_v7 = vmul.f32 %v2500_v60, %v2244_v57  ;;  %v1382_v8 = vadd.f32 %v5004_v19, %v1381_v4  ;;  %v4182_v60 = vld [vmem:[%s5991_s1 + $0x290] sm:$0xff] }
 0x13d   :  { %v3154_v10 = vadd.f32 %v3153_v32, %v2879_v63  ;;  %v3230_v14 = vadd.f32 %v3229_v33, %v2945_v0  ;;  %v2110_v15 = vmax.f32 %v1690_v2, 0.0  ;;  %v2176_v17 = vmax.f32 %v1855_v3, 0.0  ;;  %v4120_v32 = vld [vmem:[%s5991_s1 + $0xa0] sm:$0xff]  ;;  %v4153_v33 = vld [vmem:[%s5991_s1 + $0x1a8] sm:$0xff] }
 0x13e   :  { %v3011_v20 = vadd.f32 %v3010_v37, %v2756_v7  ;;  %v1987_v21 = vmax.f32 %v1382_v8, 0.0 }
 0x13f   :  { %v2368_v25 = vmax.f32 %v2110_v15, %v4661_v43  ;;  %v2434_v27 = vmax.f32 %v2176_v17, %v4661_v43 }
 0x140   :  { %v2245_v28 = vmax.f32 %v1987_v21, %v4661_v43 }
 0x141   :  { %v2624_v29 = vmul.f32 %v2368_v25, %v2368_v25  ;;  %v2690_v31 = vmul.f32 %v2434_v27, %v2434_v27 }
 0x142   :  { %v2501_v35 = vmul.f32 %v2245_v28, %v2245_v28  ;;  %v1691_v36 = vpop.f32.mrf.mxu2  ;;  %v1856_v42 = vpop.f32.mrf.mxu3 }
 0x143   :  { %v2880_v37 = vmul.f32 %v2624_v29, %v2368_v25  ;;  %v2946_v49 = vmul.f32 %v2690_v31, %v2434_v27  ;;  %v1692_v56 = vadd.f32 %v5004_v19, %v1691_v36  ;;  %v1857_v57 = vadd.f32 %v5004_v19, %v1856_v42  ;;  %v1384_v51 = vpop.f32.mrf.mxu0  ;;  %v5040_v53 = vpop.f32.mrf.mxu1 }
 0x144   :  { %6008 = vst [vmem:[#allocation9_spill] sm:$0xff] %v5040_v53  ;;  %v2757_v58 = vmul.f32 %v2501_v35, %v2245_v28  ;;  %v1385_v63 = vadd.f32 %v5004_v19, %v1384_v51 }
 0x145   :  { %v3155_v0 = vadd.f32 %v3154_v10, %v2880_v37  ;;  %v3231_v2 = vadd.f32 %v3230_v14, %v2946_v49  ;;  %v2111_v3 = vmax.f32 %v1692_v56, 0.0  ;;  %v2177_v4 = vmax.f32 %v1857_v57, 0.0 }
 0x146   :  { %v3012_v7 = vadd.f32 %v3011_v20, %v2757_v58  ;;  %v1988_v8 = vmax.f32 %v1385_v63, 0.0  ;;  %3960 = vmatmul.msk.bf16.gmra.mxu0 %vm926_vm1, %v4120_v32  ;;  %3993 = vmatmul.msk.bf16.gmra.mxu1 %vm926_vm1, %v4153_v33 }
 0x147   :  { %v2369_v15 = vmax.f32 %v2111_v3, %v4661_v43  ;;  %v2435_v17 = vmax.f32 %v2177_v4, %v4661_v43  ;;  %4022 = vmatmul.msk.bf16.gmra.mxu2 %vm926_vm1, %v4182_v60  ;;  %4055 = vmatmul.msk.bf16.gmra.mxu3 %vm926_vm1, %v4215_v62 }
 0x148   :  { %v2246_v21 = vmax.f32 %v1988_v8, %v4661_v43 }
 0x149   :  { %v2625_v10 = vmul.f32 %v2369_v15, %v2369_v15  ;;  %v2691_v14 = vmul.f32 %v2435_v17, %v2435_v17 }
 0x14a   :  { %v2502_v25 = vmul.f32 %v2246_v21, %v2246_v21  ;;  %v1694_v27 = vpop.f32.mrf.mxu2  ;;  %v1859_v20 = vpop.f32.mrf.mxu3 }
 0x14b   :  { %v2881_v28 = vmul.f32 %v2625_v10, %v2369_v15  ;;  %v2947_v29 = vmul.f32 %v2691_v14, %v2435_v17  ;;  %v1695_v31 = vadd.f32 %v5004_v19, %v1694_v27  ;;  %v1860_v35 = vadd.f32 %v5004_v19, %v1859_v20  ;;  %v1386_v36 = vpop.f32.mrf.mxu0  ;;  %v5058_v42 = vpop.f32.mrf.mxu1  ;;  %v4183_v20 = vld [vmem:[%s5991_s1 + $0x298] sm:$0xff] }
 0x14c   :  { %6009 = vst [vmem:[#allocation10_spill] sm:$0xff] %v5058_v42  ;;  %v2758_v32 = vmul.f32 %v2502_v25, %v2246_v21  ;;  %v1387_v33 = vadd.f32 %v5004_v19, %v1386_v36  ;;  %v4234_v42 = vld [vmem:[%s5994_s4 + $0x30] sm:$0xff] }
 0x14d   :  { %v3156_v37 = vadd.f32 %v3155_v0, %v2881_v28  ;;  %v3232_v49 = vadd.f32 %v3231_v2, %v2947_v29  ;;  %v2112_v56 = vmax.f32 %v1695_v31, 0.0  ;;  %v2178_v57 = vmax.f32 %v1860_v35, 0.0  ;;  %v4121_v0 = vld [vmem:[%s5991_s1 + $0xa8] sm:$0xff]  ;;  %v4154_v2 = vld [vmem:[%s5991_s1 + $0x1b0] sm:$0xff]  ;;  %v4216_v28 = vld [vmem:[%s5991_s1 + $0x3a0] sm:$0xff]  ;;  %3411 = vmatpush.bf16.msrb.mxu1 %v4234_v42 }
 0x14e   :  { %v3013_v51 = vadd.f32 %v3012_v7, %v2758_v32  ;;  %v1989_v60 = vmax.f32 %v1387_v33, 0.0 }
 0x14f   :  { %v2370_v62 = vmax.f32 %v2112_v56, %v4661_v43  ;;  %v2436_v58 = vmax.f32 %v2178_v57, %v4661_v43 }
 0x150   :  { %v2247_v63 = vmax.f32 %v1989_v60, %v4661_v43 }
 0x151   :  { %v2626_v3 = vmul.f32 %v2370_v62, %v2370_v62  ;;  %v2692_v4 = vmul.f32 %v2436_v58, %v2436_v58 }
 0x152   :  { %v2503_v8 = vmul.f32 %v2247_v63, %v2247_v63  ;;  %v1696_v15 = vpop.f32.mrf.mxu2  ;;  %v1861_v17 = vpop.f32.mrf.mxu3 }
 0x153   :  { %v2882_v7 = vmul.f32 %v2626_v3, %v2370_v62  ;;  %v2948_v21 = vmul.f32 %v2692_v4, %v2436_v58  ;;  %v1697_v10 = vadd.f32 %v5004_v19, %v1696_v15  ;;  %v1862_v14 = vadd.f32 %v5004_v19, %v1861_v17  ;;  %v1389_v25 = vpop.f32.mrf.mxu0  ;;  %v5072_v27 = vpop.f32.mrf.mxu1 }
 0x154   :  { %6010 = vst [vmem:[#allocation11_spill] sm:$0xff] %v5072_v27  ;;  %v2759_v29 = vmul.f32 %v2503_v8, %v2247_v63  ;;  %v1390_v31 = vadd.f32 %v5004_v19, %v1389_v25  ;;  %v4220_v27 = vld [vmem:[%s5991_s1 + $0x3c0] sm:$0xff] }
 0x155   :  { %v3157_v35 = vadd.f32 %v3156_v37, %v2882_v7  ;;  %v3233_v36 = vadd.f32 %v3232_v49, %v2948_v21  ;;  %v2113_v32 = vmax.f32 %v1697_v10, 0.0  ;;  %v2179_v33 = vmax.f32 %v1862_v14, 0.0 }
 0x156   :  { %v3014_v56 = vadd.f32 %v3013_v51, %v2759_v29  ;;  %v1990_v57 = vmax.f32 %v1390_v31, 0.0  ;;  %3961 = vmatmul.msk.bf16.gmra.mxu0 %vm926_vm1, %v4121_v0  ;;  %3994 = vmatmul.msk.bf16.gmra.mxu1 %vm926_vm1, %v4154_v2 }
 0x157   :  { %v2371_v60 = vmax.f32 %v2113_v32, %v4661_v43  ;;  %v2437_v62 = vmax.f32 %v2179_v33, %v4661_v43  ;;  %4023 = vmatmul.msk.bf16.gmra.mxu2 %vm926_vm1, %v4183_v20  ;;  %4056 = vmatmul.msk.bf16.gmra.mxu3 %vm926_vm1, %v4216_v28 }
 0x158   :  { %v2248_v58 = vmax.f32 %v1990_v57, %v4661_v43 }
 0x159   :  { %v2627_v37 = vmul.f32 %v2371_v60, %v2371_v60  ;;  %v2693_v49 = vmul.f32 %v2437_v62, %v2437_v62 }
 0x15a   :  { %v2504_v63 = vmul.f32 %v2248_v58, %v2248_v58  ;;  %v1699_v3 = vpop.f32.mrf.mxu2  ;;  %v1864_v51 = vpop.f32.mrf.mxu3 }
 0x15b   :  { %v2883_v4 = vmul.f32 %v2627_v37, %v2371_v60  ;;  %v2949_v8 = vmul.f32 %v2693_v49, %v2437_v62  ;;  %v1700_v15 = vadd.f32 %v5004_v19, %v1699_v3  ;;  %v1865_v17 = vadd.f32 %v5004_v19, %v1864_v51  ;;  %v1391_v0 = vpop.f32.mrf.mxu0  ;;  %v5090_v2 = vpop.f32.mrf.mxu1 }
 0x15c   :  { %6011 = vst [vmem:[#allocation12_spill] sm:$0xff] %v5090_v2  ;;  %v2760_v7 = vmul.f32 %v2504_v63, %v2248_v58  ;;  %v1392_v21 = vadd.f32 %v5004_v19, %v1391_v0 }
 0x15d   :  { %v3158_v10 = vadd.f32 %v3157_v35, %v2883_v4  ;;  %v3234_v14 = vadd.f32 %v3233_v36, %v2949_v8  ;;  %v2114_v25 = vmax.f32 %v1700_v15, 0.0  ;;  %v2180_v20 = vmax.f32 %v1865_v17, 0.0  ;;  %v4122_v35 = vld [vmem:[%s5991_s1 + $0xb0] sm:$0xff]  ;;  %v4155_v36 = vld [vmem:[%s5991_s1 + $0x1b8] sm:$0xff]  ;;  %v4184_v8 = vld [vmem:[%s5991_s1 + $0x2a0] sm:$0xff] }
 0x15e   :  { %v3015_v28 = vadd.f32 %v3014_v56, %v2760_v7  ;;  %v1991_v29 = vmax.f32 %v1392_v21, 0.0  ;;  %v4217_v15 = vld [vmem:[%s5991_s1 + $0x3a8] sm:$0xff] }
 0x15f   :  { %v2372_v31 = vmax.f32 %v2114_v25, %v4661_v43  ;;  %v2438_v32 = vmax.f32 %v2180_v20, %v4661_v43 }
 0x160   :  { %v2249_v33 = vmax.f32 %v1991_v29, %v4661_v43 }
 0x161   :  { %v2628_v57 = vmul.f32 %v2372_v31, %v2372_v31  ;;  %v2694_v60 = vmul.f32 %v2438_v32, %v2438_v32 }
 0x162   :  { %v2505_v62 = vmul.f32 %v2249_v33, %v2249_v33  ;;  %v1701_v37 = vpop.f32.mrf.mxu2  ;;  %v1866_v49 = vpop.f32.mrf.mxu3 }
 0x163   :  { %v2884_v56 = vmul.f32 %v2628_v57, %v2372_v31  ;;  %v2950_v58 = vmul.f32 %v2694_v60, %v2438_v32  ;;  %v1702_v63 = vadd.f32 %v5004_v19, %v1701_v37  ;;  %v1867_v3 = vadd.f32 %v5004_v19, %v1866_v49  ;;  %v1394_v51 = vpop.f32.mrf.mxu0  ;;  %v5104_v4 = vpop.f32.mrf.mxu1 }
 0x164   :  { %6012 = vst [vmem:[#allocation13_spill] sm:$0xff] %v5104_v4  ;;  %v2761_v17 = vmul.f32 %v2505_v62, %v2249_v33  ;;  %v1395_v0 = vadd.f32 %v5004_v19, %v1394_v51 }
 0x165   :  { %v3159_v7 = vadd.f32 %v3158_v10, %v2884_v56  ;;  %v3235_v21 = vadd.f32 %v3234_v14, %v2950_v58  ;;  %v2115_v25 = vmax.f32 %v1702_v63, 0.0  ;;  %v2181_v20 = vmax.f32 %v1867_v3, 0.0 }
 0x166   :  { %v3016_v29 = vadd.f32 %v3015_v28, %v2761_v17  ;;  %v1992_v31 = vmax.f32 %v1395_v0, 0.0  ;;  %3962 = vmatmul.msk.bf16.gmra.mxu0 %vm926_vm1, %v4122_v35  ;;  %3995 = vmatmul.msk.bf16.gmra.mxu1 %vm926_vm1, %v4155_v36 }
 0x167   :  { %v2373_v32 = vmax.f32 %v2115_v25, %v4661_v43  ;;  %v2439_v57 = vmax.f32 %v2181_v20, %v4661_v43  ;;  %4024 = vmatmul.msk.bf16.gmra.mxu2 %vm926_vm1, %v4184_v8  ;;  %4057 = vmatmul.msk.bf16.gmra.mxu3 %vm926_vm1, %v4217_v15 }
 0x168   :  { %v2250_v33 = vmax.f32 %v1992_v31, %v4661_v43 }
 0x169   :  { %v2629_v10 = vmul.f32 %v2373_v32, %v2373_v32  ;;  %v2695_v14 = vmul.f32 %v2439_v57, %v2439_v57 }
 0x16a   :  { %v2506_v60 = vmul.f32 %v2250_v33, %v2250_v33  ;;  %v1704_v62 = vpop.f32.mrf.mxu2  ;;  %v1869_v28 = vpop.f32.mrf.mxu3 }
 0x16b   :  { %v2885_v37 = vmul.f32 %v2629_v10, %v2373_v32  ;;  %v2951_v49 = vmul.f32 %v2695_v14, %v2439_v57  ;;  %v1705_v35 = vadd.f32 %v5004_v19, %v1704_v62  ;;  %v1870_v36 = vadd.f32 %v5004_v19, %v1869_v28  ;;  %v1396_v56 = vpop.f32.mrf.mxu0  ;;  %v5122_v58 = vpop.f32.mrf.mxu1 }
 0x16c   :  { %6013 = vst [vmem:[#allocation14_spill] sm:$0xff] %v5122_v58  ;;  %v2762_v63 = vmul.f32 %v2506_v60, %v2250_v33  ;;  %v1397_v3 = vadd.f32 %v5004_v19, %v1396_v56  ;;  %v4218_v56 = vld [vmem:[%s5991_s1 + $0x3b0] sm:$0xff] }
 0x16d   :  { %v3160_v51 = vadd.f32 %v3159_v7, %v2885_v37  ;;  %v3236_v8 = vadd.f32 %v3235_v21, %v2951_v49  ;;  %v2116_v15 = vmax.f32 %v1705_v35, 0.0  ;;  %v2182_v17 = vmax.f32 %v1870_v36, 0.0  ;;  %v4123_v7 = vld [vmem:[%s5991_s1 + $0xb8] sm:$0xff]  ;;  %v4156_v21 = vld [vmem:[%s5991_s1 + $0x1c0] sm:$0xff]  ;;  %v4185_v36 = vld [vmem:[%s5991_s1 + $0x2a8] sm:$0xff] }
 0x16e   :  { %v3017_v0 = vadd.f32 %v3016_v29, %v2762_v63  ;;  %v1993_v25 = vmax.f32 %v1397_v3, 0.0 }
 0x16f   :  { %v2374_v20 = vmax.f32 %v2116_v15, %v4661_v43  ;;  %v2440_v31 = vmax.f32 %v2182_v17, %v4661_v43 }
 0x170   :  { %v2251_v32 = vmax.f32 %v1993_v25, %v4661_v43 }
 0x171   :  { %v2630_v57 = vmul.f32 %v2374_v20, %v2374_v20  ;;  %v2696_v10 = vmul.f32 %v2440_v31, %v2440_v31 }
 0x172   :  { %v2507_v14 = vmul.f32 %v2251_v32, %v2251_v32  ;;  %v1706_v62 = vpop.f32.mrf.mxu2  ;;  %v1871_v28 = vpop.f32.mrf.mxu3 }
 0x173   :  { %v2886_v29 = vmul.f32 %v2630_v57, %v2374_v20  ;;  %v2952_v33 = vmul.f32 %v2696_v10, %v2440_v31  ;;  %v1707_v60 = vadd.f32 %v5004_v19, %v1706_v62  ;;  %v1872_v37 = vadd.f32 %v5004_v19, %v1871_v28  ;;  %v1399_v49 = vpop.f32.mrf.mxu0  ;;  %v5136_v35 = vpop.f32.mrf.mxu1 }
 0x174   :  { %v2763_v63 = vmul.f32 %v2507_v14, %v2251_v32  ;;  %v1400_v3 = vadd.f32 %v5004_v19, %v1399_v49 }
 0x175   :  { %v3161_v15 = vadd.f32 %v3160_v51, %v2886_v29  ;;  %v3237_v17 = vadd.f32 %v3236_v8, %v2952_v33  ;;  %v2117_v25 = vmax.f32 %v1707_v60, 0.0  ;;  %v2183_v20 = vmax.f32 %v1872_v37, 0.0 }
 0x176   :  { %v3018_v31 = vadd.f32 %v3017_v0, %v2763_v63  ;;  %v1994_v57 = vmax.f32 %v1400_v3, 0.0  ;;  %3963 = vmatmul.msk.bf16.gmra.mxu0 %vm926_vm1, %v4123_v7  ;;  %3996 = vmatmul.msk.bf16.gmra.mxu1 %vm926_vm1, %v4156_v21 }
 0x177   :  { %v2375_v10 = vmax.f32 %v2117_v25, %v4661_v43  ;;  %v2441_v62 = vmax.f32 %v2183_v20, %v4661_v43  ;;  %4025 = vmatmul.msk.bf16.gmra.mxu2 %vm926_vm1, %v4185_v36  ;;  %4058 = vmatmul.msk.bf16.gmra.mxu3 %vm926_vm1, %v4218_v56 }
 0x178   :  { %v2252_v32 = vmax.f32 %v1994_v57, %v4661_v43 }
 0x179   :  { %v2631_v51 = vmul.f32 %v2375_v10, %v2375_v10  ;;  %v2697_v8 = vmul.f32 %v2441_v62, %v2441_v62 }
 0x17a   :  { %v2508_v14 = vmul.f32 %v2252_v32, %v2252_v32  ;;  %v1709_v28 = vpop.f32.mrf.mxu2  ;;  %v1874_v0 = vpop.f32.mrf.mxu3 }
 0x17b   :  { %v2887_v29 = vmul.f32 %v2631_v51, %v2375_v10  ;;  %v2953_v33 = vmul.f32 %v2697_v8, %v2441_v62  ;;  %v1710_v7 = vadd.f32 %v5004_v19, %v1709_v28  ;;  %v1875_v21 = vadd.f32 %v5004_v19, %v1874_v0  ;;  %v1401_v60 = vpop.f32.mrf.mxu0  ;;  %v5154_v37 = vpop.f32.mrf.mxu1 }
 0x17c   :  { %v2764_v49 = vmul.f32 %v2508_v14, %v2252_v32  ;;  %v1402_v36 = vadd.f32 %v5004_v19, %v1401_v60  ;;  %v4219_v60 = vld [vmem:[%s5991_s1 + $0x3b8] sm:$0xff] }
 0x17d   :  { %v3162_v56 = vadd.f32 %v3161_v15, %v2887_v29  ;;  %v3238_v63 = vadd.f32 %v3237_v17, %v2953_v33  ;;  %v2118_v3 = vmax.f32 %v1710_v7, 0.0  ;;  %v2184_v25 = vmax.f32 %v1875_v21, 0.0  ;;  %v4124_v15 = vld [vmem:[%s5991_s1 + $0xc0] sm:$0xff]  ;;  %v4157_v17 = vld [vmem:[%s5991_s1 + $0x1c8] sm:$0xff]  ;;  %v4186_v21 = vld [vmem:[%s5991_s1 + $0x2b0] sm:$0xff] }
 0x17e   :  { %v3019_v20 = vadd.f32 %v3018_v31, %v2764_v49  ;;  %v1995_v57 = vmax.f32 %v1402_v36, 0.0 }
 0x17f   :  { %v2376_v58 = vmax.f32 %v2118_v3, %v4661_v43  ;;  %v2442_v10 = vmax.f32 %v2184_v25, %v4661_v43 }
 0x180   :  { %v2253_v62 = vmax.f32 %v1995_v57, %v4661_v43 }
 0x181   :  { %v2632_v51 = vmul.f32 %v2376_v58, %v2376_v58  ;;  %v2698_v8 = vmul.f32 %v2442_v10, %v2442_v10 }
 0x182   :  { %v2509_v28 = vmul.f32 %v2253_v62, %v2253_v62  ;;  %v1711_v0 = vpop.f32.mrf.mxu2  ;;  %v1876_v4 = vpop.f32.mrf.mxu3 }
 0x183   :  { %v2888_v31 = vmul.f32 %v2632_v51, %v2376_v58  ;;  %v2954_v32 = vmul.f32 %v2698_v8, %v2442_v10  ;;  %v1712_v14 = vadd.f32 %v5004_v19, %v1711_v0  ;;  %v1877_v29 = vadd.f32 %v5004_v19, %v1876_v4  ;;  %v1404_v33 = vpop.f32.mrf.mxu0  ;;  %v5168_v7 = vpop.f32.mrf.mxu1 }
 0x184   :  { %v2765_v49 = vmul.f32 %v2509_v28, %v2253_v62  ;;  %v1405_v36 = vadd.f32 %v5004_v19, %v1404_v33 }
 0x185   :  { %v3163_v58 = vadd.f32 %v3162_v56, %v2888_v31  ;;  %v3239_v3 = vadd.f32 %v3238_v63, %v2954_v32  ;;  %v2119_v25 = vmax.f32 %v1712_v14, 0.0  ;;  %v2185_v57 = vmax.f32 %v1877_v29, 0.0 }
 0x186   :  { %v5177_v10 = vadd.f32 %v3019_v20, %v2765_v49  ;;  %3964 = vmatmul.msk.bf16.gmra.mxu0 %vm926_vm1, %v4124_v15  ;;  %3997 = vmatmul.msk.bf16.gmra.mxu1 %vm926_vm1, %v4157_v17  ;;  %v1996_v62 = vmax.f32 %v1405_v36, 0.0  ;;  %v1565_v63 = vadd.f32 %v5004_v19, %v5136_v35 }
 0x187   :  { %v2377_v4 = vmax.f32 %v2119_v25, %v4661_v43  ;;  %v2443_v51 = vmax.f32 %v2185_v57, %v4661_v43  ;;  %4026 = vmatmul.msk.bf16.gmra.mxu2 %vm926_vm1, %v4186_v21  ;;  %4059 = vmatmul.msk.bf16.gmra.mxu3 %vm926_vm1, %v4219_v60 }
 0x188   :  { %v2254_v29 = vmax.f32 %v1996_v62, %v4661_v43  ;;  %v2060_v25 = vmax.f32 %v1565_v63, 0.0 }
 0x189   :  { %v2633_v8 = vmul.f32 %v2377_v4, %v2377_v4  ;;  %v2699_v56 = vmul.f32 %v2443_v51, %v2443_v51 }
 0x18a   :  { %v1714_v20 = vpop.f32.mrf.mxu2  ;;  %v1879_v28 = vpop.f32.mrf.mxu3 }
 0x18b   :  { %v2889_v0 = vmul.f32 %v2633_v8, %v2377_v4  ;;  %v2955_v15 = vmul.f32 %v2699_v56, %v2443_v51  ;;  %v1715_v17 = vadd.f32 %v5004_v19, %v1714_v20  ;;  %v1880_v31 = vadd.f32 %v5004_v19, %v1879_v28  ;;  %v1406_v32 = vpop.f32.mrf.mxu0  ;;  %v1571_v14 = vpop.f32.mrf.mxu1 }
 0x18c   :  { %v1407_v33 = vadd.f32 %v5004_v19, %v1406_v32  ;;  %v2510_v51 = vmul.f32 %v2254_v29, %v2254_v29  ;;  %v2318_v28 = vmax.f32 %v2060_v25, %v4661_v43 }
 0x18d   :  { %v3164_v21 = vadd.f32 %v3163_v58, %v2889_v0  ;;  %v3240_v60 = vadd.f32 %v3239_v3, %v2955_v15  ;;  %v2120_v49 = vmax.f32 %v1715_v17, 0.0  ;;  %v2186_v36 = vmax.f32 %v1880_v31, 0.0  ;;  %v4125_v58 = vld [vmem:[%s5991_s1 + $0xc8] sm:$0xff]  ;;  %v4158_v3 = vld [vmem:[%s5991_s1 + $0x1d0] sm:$0xff] }
 0x18e   :  { %v1997_v35 = vmax.f32 %v1407_v33, 0.0 }
 0x18f   :  { %v2378_v57 = vmax.f32 %v2120_v49, %v4661_v43  ;;  %v2444_v4 = vmax.f32 %v2186_v36, %v4661_v43  ;;  %v4187_v49 = vld [vmem:[%s5991_s1 + $0x2b8] sm:$0xff]  ;;  %v2766_v36 = vmul.f32 %v2510_v51, %v2254_v29  ;;  %v1570_v29 = vadd.f32 %v5004_v19, %v5168_v7 }
 0x190   :  { %v2255_v8 = vmax.f32 %v1997_v35, %v4661_v43 }
 0x191   :  { %v2634_v56 = vmul.f32 %v2378_v57, %v2378_v57  ;;  %v2700_v20 = vmul.f32 %v2444_v4, %v2444_v4 }
 0x192   :  { %v2511_v62 = vmul.f32 %v2255_v8, %v2255_v8  ;;  %v1716_v2 = vpop.f32.mrf.mxu2  ;;  %v1881_v32 = vpop.f32.mrf.mxu3 }
 0x193   :  { %v2890_v63 = vmul.f32 %v2634_v56, %v2378_v57  ;;  %v2956_v0 = vmul.f32 %v2700_v20, %v2444_v4  ;;  %v1717_v15 = vadd.f32 %v5004_v19, %v1716_v2  ;;  %v1882_v17 = vadd.f32 %v5004_v19, %v1881_v32  ;;  %v1409_v31 = vpop.f32.mrf.mxu0  ;;  %v1574_v33 = vpop.f32.mrf.mxu1 }
 0x194   :  { %v2767_v25 = vmul.f32 %v2511_v62, %v2255_v8  ;;  %v1410_v35 = vadd.f32 %v5004_v19, %v1409_v31  ;;  %v2574_v20 = vmul.f32 %v2318_v28, %v2318_v28  ;;  %v1567_v32 = vadd.f32 %v5004_v19, %v5154_v37 }
 0x195   :  { %v3165_v57 = vadd.f32 %v3164_v21, %v2890_v63  ;;  %v3241_v4 = vadd.f32 %v3240_v60, %v2956_v0  ;;  %v2121_v56 = vmax.f32 %v1717_v15, 0.0  ;;  %v2187_v2 = vmax.f32 %v1882_v17, 0.0 }
 0x196   :  { %3965 = vmatmul.msk.bf16.gmra.mxu0 %vm926_vm1, %v4125_v58  ;;  %3998 = vmatmul.msk.bf16.gmra.mxu1 %vm926_vm1, %v4158_v3  ;;  %v3027_v51 = vadd.f32 %v2767_v25, %v2766_v36  ;;  %v1572_v21 = vadd.f32 %v5004_v19, %v1571_v14  ;;  %v2061_v37 = vmax.f32 %v1567_v32, 0.0  ;;  %v2062_v62 = vmax.f32 %v1570_v29, 0.0 }
 0x197   :  { %v2379_v60 = vmax.f32 %v2121_v56, %v4661_v43  ;;  %v2445_v8 = vmax.f32 %v2187_v2, %v4661_v43  ;;  %4027 = vmatmul.msk.bf16.gmra.mxu2 %vm926_vm1, %v4187_v49  ;;  %v1998_v63 = vmax.f32 %v1410_v35, 0.0  ;;  %4060 = vmatmul.msk.bf16.gmra.mxu3 %vm926_vm1, %v4220_v27  ;;  %v1575_v3 = vadd.f32 %v5004_v19, %v1574_v33 }
 0x198   :  { %v2063_v7 = vmax.f32 %v1572_v21, 0.0  ;;  %v2830_v15 = vmul.f32 %v2574_v20, %v2318_v28  ;;  %v2319_v14 = vmax.f32 %v2061_v37, %v4661_v43  ;;  %v2320_v17 = vmax.f32 %v2062_v62, %v4661_v43 }
 0x199   :  { %v2635_v0 = vmul.f32 %v2379_v60, %v2379_v60  ;;  %v2701_v58 = vmul.f32 %v2445_v8, %v2445_v8  ;;  %v2256_v31 = vmax.f32 %v1998_v63, %v4661_v43  ;;  %v2064_v56 = vmax.f32 %v1575_v3, 0.0 }
 0x19a   :  { %v1719_v36 = vpop.f32.mrf.mxu2  ;;  %v1884_v49 = vpop.f32.mrf.mxu3  ;;  %v2321_v42 = vmax.f32 %v2063_v7, %v4661_v43  ;;  %v2575_v32 = vmul.f32 %v2319_v14, %v2319_v14  ;;  %v2576_v29 = vmul.f32 %v2320_v17, %v2320_v17 }
 0x19b   :  { %v2891_v25 = vmul.f32 %v2635_v0, %v2379_v60  ;;  %v2957_v35 = vmul.f32 %v2701_v58, %v2445_v8  ;;  %v1411_v27 = vpop.f32.mrf.mxu0  ;;  %v1576_v2 = vpop.f32.mrf.mxu1  ;;  %v2512_v21 = vmul.f32 %v2256_v31, %v2256_v31  ;;  %v1720_v28 = vadd.f32 %v5004_v19, %v1719_v36 }
 0x19c   :  { %v2577_v33 = vmul.f32 %v2321_v42, %v2321_v42  ;;  %v2322_v62 = vmax.f32 %v2064_v56, %v4661_v43  ;;  %v2831_v63 = vmul.f32 %v2575_v32, %v2319_v14  ;;  %v2832_v53 = vmul.f32 %v2576_v29, %v2320_v17  ;;  %v4221_v32 = vld [vmem:[%s5991_s1 + $0x3c8] sm:$0xff] }
 0x19d   :  { %v3166_v20 = vadd.f32 %v3165_v57, %v2891_v25  ;;  %v5230_v37 = vadd.f32 %v3241_v4, %v2957_v35  ;;  %v2768_v34 = vmul.f32 %v2512_v21, %v2256_v31  ;;  %v2122_v7 = vmax.f32 %v1720_v28, 0.0  ;;  %v4126_v31 = vld [vmem:[%s5991_s1 + $0xd0] sm:$0xff] }
 0x19e   :  { %v2833_v60 = vmul.f32 %v2577_v33, %v2321_v42  ;;  %v2578_v8 = vmul.f32 %v2322_v62, %v2322_v62  ;;  %v3101_v0 = vadd.f32 %v2831_v63, %v2830_v15  ;;  %v1885_v26 = vadd.f32 %v5004_v19, %v1884_v49  ;;  %v4159_v49 = vld [vmem:[%s5991_s1 + $0x1d8] sm:$0xff] }
 0x19f   :  { %6014 = vst [vmem:[#allocation15_spill] sm:$0xff] %v5230_v37  ;;  %v3028_v58 = vadd.f32 %v3027_v51, %v2768_v34  ;;  %v2380_v3 = vmax.f32 %v2122_v7, %v4661_v43  ;;  %v1412_v36 = vadd.f32 %v5004_v19, %v1411_v27  ;;  %v1577_v35 = vadd.f32 %v5004_v19, %v1576_v2  ;;  %v4233_v7 = vld [vmem:[%s5994_s4 + $0x28] sm:$0xff] }
 0x1a0   :  { %v2834_v39 = vmul.f32 %v2578_v8, %v2322_v62  ;;  %v3102_v57 = vadd.f32 %v3101_v0, %v2832_v53  ;;  %v2188_v25 = vmax.f32 %v1885_v26, 0.0  ;;  %v4188_v26 = vld [vmem:[%s5991_s1 + $0x2c0] sm:$0xff]  ;;  %3412 = vmatpush.bf16.msrb.mxu1 %v4233_v7 }
 0x1a1   :  { %v2636_v4 = vmul.f32 %v2380_v3, %v2380_v3  ;;  %v1999_v15 = vmax.f32 %v1412_v36, 0.0  ;;  %v2065_v2 = vmax.f32 %v1577_v35, 0.0 }
 0x1a2   :  { %v1721_v14 = vpop.f32.mrf.mxu2  ;;  %v1886_v17 = vpop.f32.mrf.mxu3  ;;  %v3103_v53 = vadd.f32 %v3102_v57, %v2833_v60  ;;  %v2446_v27 = vmax.f32 %v2188_v25, %v4661_v43 }
 0x1a3   :  { %v1722_v34 = vadd.f32 %v5004_v19, %v1721_v14  ;;  %v1414_v51 = vpop.f32.mrf.mxu0  ;;  %v1579_v42 = vpop.f32.mrf.mxu1  ;;  %v2892_v56 = vmul.f32 %v2636_v4, %v2380_v3  ;;  %v2257_v29 = vmax.f32 %v1999_v15, %v4661_v43  ;;  %v2323_v63 = vmax.f32 %v2065_v2, %v4661_v43 }
 0x1a4   :  { %v1415_v28 = vadd.f32 %v5004_v19, %v1414_v51  ;;  %v3104_v33 = vadd.f32 %v3103_v53, %v2834_v39  ;;  %v1887_v0 = vadd.f32 %v5004_v19, %v1886_v17  ;;  %v2702_v3 = vmul.f32 %v2446_v27, %v2446_v27 }
 0x1a5   :  { %v2123_v21 = vmax.f32 %v1722_v34, 0.0  ;;  %v3167_v62 = vadd.f32 %v3166_v20, %v2892_v56  ;;  %v2513_v60 = vmul.f32 %v2257_v29, %v2257_v29  ;;  %v2579_v39 = vmul.f32 %v2323_v63, %v2323_v63 }
 0x1a6   :  { %3966 = vmatmul.msk.bf16.gmra.mxu0 %vm926_vm1, %v4126_v31  ;;  %3999 = vmatmul.msk.bf16.gmra.mxu1 %vm926_vm1, %v4159_v49  ;;  %v2000_v20 = vmax.f32 %v1415_v28, 0.0  ;;  %v2189_v4 = vmax.f32 %v1887_v0, 0.0  ;;  %v1580_v35 = vadd.f32 %v5004_v19, %v1579_v42 }
 0x1a7   :  { %v2381_v8 = vmax.f32 %v2123_v21, %v4661_v43  ;;  %4028 = vmatmul.msk.bf16.gmra.mxu2 %vm926_vm1, %v4188_v26  ;;  %4061 = vmatmul.msk.bf16.gmra.mxu3 %vm926_vm1, %v4221_v32  ;;  %v2769_v36 = vmul.f32 %v2513_v60, %v2257_v29  ;;  %v2958_v26 = vmul.f32 %v2702_v3, %v2446_v27 }
 0x1a8   :  { %v2258_v25 = vmax.f32 %v2000_v20, %v4661_v43  ;;  %v2447_v34 = vmax.f32 %v2189_v4, %v4661_v43  ;;  %v2835_v53 = vmul.f32 %v2579_v39, %v2323_v63  ;;  %v2066_v2 = vmax.f32 %v1580_v35, 0.0 }
 0x1a9   :  { %v2637_v57 = vmul.f32 %v2381_v8, %v2381_v8  ;;  %v3029_v17 = vadd.f32 %v3028_v58, %v2769_v36 }
 0x1aa   :  { %v1724_v14 = vpop.f32.mrf.mxu2  ;;  %v1889_v31 = vpop.f32.mrf.mxu3  ;;  %v2514_v56 = vmul.f32 %v2258_v25, %v2258_v25  ;;  %v2703_v29 = vmul.f32 %v2447_v34, %v2447_v34  ;;  %v2324_v7 = vmax.f32 %v2066_v2, %v4661_v43  ;;  %v3105_v20 = vadd.f32 %v3104_v33, %v2835_v53  ;;  %v4222_v2 = vld [vmem:[%s5991_s1 + $0x3d0] sm:$0xff] }
 0x1ab   :  { %v2893_v15 = vmul.f32 %v2637_v57, %v2381_v8  ;;  %v1416_v51 = vpop.f32.mrf.mxu0  ;;  %v1581_v49 = vpop.f32.mrf.mxu1  ;;  %v1725_v21 = vadd.f32 %v5004_v19, %v1724_v14  ;;  %v1890_v28 = vadd.f32 %v5004_v19, %v1889_v31  ;;  %v4127_v31 = vld [vmem:[%s5991_s1 + $0xd8] sm:$0xff] }
 0x1ac   :  { %v2770_v42 = vmul.f32 %v2514_v56, %v2258_v25  ;;  %v1417_v58 = vadd.f32 %v5004_v19, %v1416_v51  ;;  %v2959_v60 = vmul.f32 %v2703_v29, %v2447_v34  ;;  %v2580_v63 = vmul.f32 %v2324_v7, %v2324_v7  ;;  %v4160_v51 = vld [vmem:[%s5991_s1 + $0x1e0] sm:$0xff] }
 0x1ad   :  { %v5266_v32 = vadd.f32 %v3167_v62, %v2893_v15  ;;  %v2124_v8 = vmax.f32 %v1725_v21, 0.0  ;;  %v2190_v0 = vmax.f32 %v1890_v28, 0.0  ;;  %v1582_v25 = vadd.f32 %v5004_v19, %v1581_v49 }
 0x1ae   :  { %v3030_v27 = vadd.f32 %v3029_v17, %v2770_v42  ;;  %v2001_v3 = vmax.f32 %v1417_v58, 0.0  ;;  %v3249_v39 = vadd.f32 %v2959_v60, %v2958_v26  ;;  %v2836_v57 = vmul.f32 %v2580_v63, %v2324_v7  ;;  %v4189_v26 = vld [vmem:[%s5991_s1 + $0x2c8] sm:$0xff] }
 0x1af   :  { %v2382_v62 = vmax.f32 %v2124_v8, %v4661_v43  ;;  %v2448_v36 = vmax.f32 %v2190_v0, %v4661_v43  ;;  %v2067_v56 = vmax.f32 %v1582_v25, 0.0 }
 0x1b0   :  { %v2259_v4 = vmax.f32 %v2001_v3, %v4661_v43  ;;  %v3106_v49 = vadd.f32 %v3105_v20, %v2836_v57 }
 0x1b1   :  { %v2704_v33 = vmul.f32 %v2448_v36, %v2448_v36  ;;  %v2638_v29 = vmul.f32 %v2382_v62, %v2382_v62  ;;  %v2325_v7 = vmax.f32 %v2067_v56, %v4661_v43 }
 0x1b2   :  { %v1726_v35 = vpop.f32.mrf.mxu2  ;;  %v1891_v14 = vpop.f32.mrf.mxu3  ;;  %v2515_v53 = vmul.f32 %v2259_v4, %v2259_v4 }
 0x1b3   :  { %v1727_v17 = vadd.f32 %v5004_v19, %v1726_v35  ;;  %v1419_v15 = vpop.f32.mrf.mxu0  ;;  %v1584_v34 = vpop.f32.mrf.mxu1  ;;  %v2960_v21 = vmul.f32 %v2704_v33, %v2448_v36  ;;  %v1892_v58 = vadd.f32 %v5004_v19, %v1891_v14  ;;  %v2581_v63 = vmul.f32 %v2325_v7, %v2325_v7 }
 0x1b4   :  { %v2771_v42 = vmul.f32 %v2515_v53, %v2259_v4  ;;  %v1420_v0 = vadd.f32 %v5004_v19, %v1419_v15  ;;  %v1585_v36 = vadd.f32 %v5004_v19, %v1584_v34  ;;  %v2894_v57 = vmul.f32 %v2638_v29, %v2382_v62 }
 0x1b5   :  { %v2125_v28 = vmax.f32 %v1727_v17, 0.0  ;;  %v3250_v60 = vadd.f32 %v3249_v39, %v2960_v21  ;;  %v2191_v3 = vmax.f32 %v1892_v58, 0.0  ;;  %v2837_v35 = vmul.f32 %v2581_v63, %v2325_v7 }
 0x1b6   :  { %3967 = vmatmul.msk.bf16.gmra.mxu0 %vm926_vm1, %v4127_v31  ;;  %4000 = vmatmul.msk.bf16.gmra.mxu1 %vm926_vm1, %v4160_v51  ;;  %v3031_v20 = vadd.f32 %v3030_v27, %v2771_v42  ;;  %v2002_v25 = vmax.f32 %v1420_v0, 0.0  ;;  %v2068_v14 = vmax.f32 %v1585_v36, 0.0 }
 0x1b7   :  { %v2383_v8 = vmax.f32 %v2125_v28, %v4661_v43  ;;  %4029 = vmatmul.msk.bf16.gmra.mxu2 %vm926_vm1, %v4189_v26  ;;  %4062 = vmatmul.msk.bf16.gmra.mxu3 %vm926_vm1, %v4222_v2  ;;  %v2449_v39 = vmax.f32 %v2191_v3, %v4661_v43  ;;  %v3107_v53 = vadd.f32 %v3106_v49, %v2837_v35 }
 0x1b8   :  { %v2260_v15 = vmax.f32 %v2002_v25, %v4661_v43  ;;  %v2326_v56 = vmax.f32 %v2068_v14, %v4661_v43 }
 0x1b9   :  { %v2639_v4 = vmul.f32 %v2383_v8, %v2383_v8  ;;  %v2705_v34 = vmul.f32 %v2449_v39, %v2449_v39 }
 0x1ba   :  { %v1729_v31 = vpop.f32.mrf.mxu2  ;;  %v1894_v33 = vpop.f32.mrf.mxu3  ;;  %v2516_v29 = vmul.f32 %v2260_v15, %v2260_v15  ;;  %v2582_v42 = vmul.f32 %v2326_v56, %v2326_v56 }
 0x1bb   :  { %v2895_v17 = vmul.f32 %v2639_v4, %v2383_v8  ;;  %v1730_v27 = vadd.f32 %v5004_v19, %v1729_v31  ;;  %v1421_v51 = vpop.f32.mrf.mxu0  ;;  %v1586_v26 = vpop.f32.mrf.mxu1  ;;  %v1895_v62 = vadd.f32 %v5004_v19, %v1894_v33  ;;  %v2961_v28 = vmul.f32 %v2705_v34, %v2449_v39  ;;  %v4161_v34 = vld [vmem:[%s5991_s1 + $0x1e8] sm:$0xff] }
 0x1bc   :  { %v1422_v58 = vadd.f32 %v5004_v19, %v1421_v51  ;;  %v2772_v8 = vmul.f32 %v2516_v29, %v2260_v15  ;;  %v1587_v63 = vadd.f32 %v5004_v19, %v1586_v26  ;;  %v2838_v49 = vmul.f32 %v2582_v42, %v2326_v56  ;;  %v4128_v15 = vld [vmem:[%s5991_s1 + $0xe0] sm:$0xff]  ;;  %v4190_v56 = vld [vmem:[%s5991_s1 + $0x2d0] sm:$0xff]  ;;  %v4223_v42 = vld [vmem:[%s5991_s1 + $0x3d8] sm:$0xff] }
 0x1bd   :  { %v3175_v2 = vadd.f32 %v2895_v17, %v2894_v57  ;;  %v2126_v21 = vmax.f32 %v1730_v27, 0.0  ;;  %v2192_v7 = vmax.f32 %v1895_v62, 0.0  ;;  %v3251_v3 = vadd.f32 %v3250_v60, %v2961_v28  ;;  %v5315_v60 = vld [vmem:[%s5992_s3] ss:$0 sm:$0xff] }
 0x1be   :  { %v2003_v4 = vmax.f32 %v1422_v58, 0.0  ;;  %v3032_v25 = vadd.f32 %v3031_v20, %v2772_v8  ;;  %v2069_v57 = vmax.f32 %v1587_v63, 0.0  ;;  %v3108_v14 = vadd.f32 %v3107_v53, %v2838_v49 }
 0x1bf   :  { %v2384_v0 = vmax.f32 %v2126_v21, %v4661_v43  ;;  %v2450_v36 = vmax.f32 %v2192_v7, %v4661_v43 }
 0x1c0   :  { %v2261_v39 = vmax.f32 %v2003_v4, %v4661_v43  ;;  %v2327_v19 = vmax.f32 %v2069_v57, %v4661_v43 }
 0x1c1   :  { %v2640_v35 = vmul.f32 %v2384_v0, %v2384_v0  ;;  %v2706_v31 = vmul.f32 %v2450_v36, %v2450_v36 }
 0x1c2   :  { %v1731_v33 = vpop.f32.mrf.mxu2  ;;  %v1896_v17 = vpop.f32.mrf.mxu3  ;;  %v2517_v29 = vmul.f32 %v2261_v39, %v2261_v39  ;;  %v2583_v58 = vmul.f32 %v2327_v19, %v2327_v19 }
 0x1c3   :  { %v2896_v27 = vmul.f32 %v2640_v35, %v2384_v0  ;;  %v1732_v20 = vadd.f32 %v5315_v60, %v1731_v33  ;;  %v1897_v51 = vadd.f32 %v5315_v60, %v1896_v17  ;;  %v1424_v26 = vpop.f32.mrf.mxu0  ;;  %v1589_v53 = vpop.f32.mrf.mxu1  ;;  %v2962_v62 = vmul.f32 %v2706_v31, %v2450_v36 }
 0x1c4   :  { %v1425_v21 = vadd.f32 %v5315_v60, %v1424_v26  ;;  %v1590_v28 = vadd.f32 %v5315_v60, %v1589_v53  ;;  %v2773_v49 = vmul.f32 %v2517_v29, %v2261_v39  ;;  %v2839_v35 = vmul.f32 %v2583_v58, %v2327_v19 }
 0x1c5   :  { %v3176_v7 = vadd.f32 %v3175_v2, %v2896_v27  ;;  %v2127_v8 = vmax.f32 %v1732_v20, 0.0  ;;  %v2193_v0 = vmax.f32 %v1897_v51, 0.0  ;;  %v3252_v63 = vadd.f32 %v3251_v3, %v2962_v62 }
 0x1c6   :  { %v2004_v4 = vmax.f32 %v1425_v21, 0.0  ;;  %3968 = vmatmul.msk.bf16.gmra.mxu0 %vm926_vm1, %v4128_v15  ;;  %v2070_v31 = vmax.f32 %v1590_v28, 0.0  ;;  %4001 = vmatmul.msk.bf16.gmra.mxu1 %vm926_vm1, %v4161_v34  ;;  %v3033_v33 = vadd.f32 %v3032_v25, %v2773_v49  ;;  %v3109_v3 = vadd.f32 %v3108_v14, %v2839_v35 }
 0x1c7   :  { %v2385_v36 = vmax.f32 %v2127_v8, %v4661_v43  ;;  %v2451_v57 = vmax.f32 %v2193_v0, %v4661_v43  ;;  %4030 = vmatmul.msk.bf16.gmra.mxu2 %vm926_vm1, %v4190_v56  ;;  %4063 = vmatmul.msk.bf16.gmra.mxu3 %vm926_vm1, %v4223_v42 }
 0x1c8   :  { %v2262_v2 = vmax.f32 %v2004_v4, %v4661_v43  ;;  %v2328_v15 = vmax.f32 %v2070_v31, %v4661_v43 }
 0x1c9   :  { %v2641_v39 = vmul.f32 %v2385_v36, %v2385_v36  ;;  %v2707_v17 = vmul.f32 %v2451_v57, %v2451_v57 }
 0x1ca   :  { %v2518_v27 = vmul.f32 %v2262_v2, %v2262_v2  ;;  %v1734_v19 = vpop.f32.mrf.mxu2  ;;  %v1899_v20 = vpop.f32.mrf.mxu3  ;;  %v2584_v53 = vmul.f32 %v2328_v15, %v2328_v15 }
 0x1cb   :  { %v2897_v51 = vmul.f32 %v2641_v39, %v2385_v36  ;;  %v2963_v26 = vmul.f32 %v2707_v17, %v2451_v57  ;;  %v1735_v34 = vadd.f32 %v5315_v60, %v1734_v19  ;;  %v1426_v62 = vpop.f32.mrf.mxu0  ;;  %v1591_v56 = vpop.f32.mrf.mxu1  ;;  %v1900_v29 = vadd.f32 %v5315_v60, %v1899_v20 }
 0x1cc   :  { %v2774_v25 = vmul.f32 %v2518_v27, %v2262_v2  ;;  %v1427_v21 = vadd.f32 %v5315_v60, %v1426_v62  ;;  %v1592_v14 = vadd.f32 %v5315_v60, %v1591_v56  ;;  %v2840_v58 = vmul.f32 %v2584_v53, %v2328_v15 }
 0x1cd   :  { %v3177_v28 = vadd.f32 %v3176_v7, %v2897_v51  ;;  %v3253_v42 = vadd.f32 %v3252_v63, %v2963_v26  ;;  %v2128_v8 = vmax.f32 %v1735_v34, 0.0  ;;  %v2194_v49 = vmax.f32 %v1900_v29, 0.0  ;;  %v4191_v34 = vld [vmem:[%s5991_s1 + $0x2d8] sm:$0xff] }
 0x1ce   :  { %v3034_v0 = vadd.f32 %v3033_v33, %v2774_v25  ;;  %v2005_v4 = vmax.f32 %v1427_v21, 0.0  ;;  %v2071_v35 = vmax.f32 %v1592_v14, 0.0  ;;  %v3110_v36 = vadd.f32 %v3109_v3, %v2840_v58  ;;  %v4129_v33 = vld [vmem:[%s5991_s1 + $0xe8] sm:$0xff]  ;;  %v4224_v21 = vld [vmem:[%s5991_s1 + $0x3e0] sm:$0xff] }
 0x1cf   :  { %v2386_v57 = vmax.f32 %v2128_v8, %v4661_v43  ;;  %v2452_v31 = vmax.f32 %v2194_v49, %v4661_v43 }
 0x1d0   :  { %v2263_v2 = vmax.f32 %v2005_v4, %v4661_v43  ;;  %v2329_v39 = vmax.f32 %v2071_v35, %v4661_v43 }
 0x1d1   :  { %v2642_v17 = vmul.f32 %v2386_v57, %v2386_v57  ;;  %v2708_v27 = vmul.f32 %v2452_v31, %v2452_v31 }
 0x1d2   :  { %v2519_v19 = vmul.f32 %v2263_v2, %v2263_v2  ;;  %v2585_v7 = vmul.f32 %v2329_v39, %v2329_v39  ;;  %v1736_v63 = vpop.f32.mrf.mxu2  ;;  %v1901_v15 = vpop.f32.mrf.mxu3 }
 0x1d3   :  { %v2898_v20 = vmul.f32 %v2642_v17, %v2386_v57  ;;  %v1737_v3 = vadd.f32 %v5315_v60, %v1736_v63  ;;  %v1902_v51 = vadd.f32 %v5315_v60, %v1901_v15  ;;  %v1429_v26 = vpop.f32.mrf.mxu0  ;;  %v1594_v53 = vpop.f32.mrf.mxu1  ;;  %v2964_v62 = vmul.f32 %v2708_v27, %v2452_v31 }
 0x1d4   :  { %v2775_v56 = vmul.f32 %v2519_v19, %v2263_v2  ;;  %v2841_v25 = vmul.f32 %v2585_v7, %v2329_v39  ;;  %v1430_v29 = vadd.f32 %v5315_v60, %v1429_v26  ;;  %v1595_v49 = vadd.f32 %v5315_v60, %v1594_v53 }
 0x1d5   :  { %v3178_v14 = vadd.f32 %v3177_v28, %v2898_v20  ;;  %v2129_v58 = vmax.f32 %v1737_v3, 0.0  ;;  %v2195_v8 = vmax.f32 %v1902_v51, 0.0  ;;  %v3254_v4 = vadd.f32 %v3253_v42, %v2964_v62 }
 0x1d6   :  { %v3035_v35 = vadd.f32 %v3034_v0, %v2775_v56  ;;  %v3111_v57 = vadd.f32 %v3110_v36, %v2841_v25  ;;  %v2006_v17 = vmax.f32 %v1430_v29, 0.0  ;;  %3969 = vmatmul.msk.bf16.gmra.mxu0 %vm926_vm1, %v4129_v33  ;;  %v2072_v39 = vmax.f32 %v1595_v49, 0.0 }
 0x1d7   :  { %v2387_v31 = vmax.f32 %v2129_v58, %v4661_v43  ;;  %v2453_v2 = vmax.f32 %v2195_v8, %v4661_v43  ;;  %4031 = vmatmul.msk.bf16.gmra.mxu2 %vm926_vm1, %v4191_v34  ;;  %4064 = vmatmul.msk.bf16.gmra.mxu3 %vm926_vm1, %v4224_v21 }
 0x1d8   :  { %v2264_v27 = vmax.f32 %v2006_v17, %v4661_v43  ;;  %v2330_v42 = vmax.f32 %v2072_v39, %v4661_v43  ;;  %v4232_v39 = vld [vmem:[%s5994_s4 + $0x20] sm:$0xff] }
 0x1d9   :  { %v2643_v28 = vmul.f32 %v2387_v31, %v2387_v31  ;;  %v2709_v19 = vmul.f32 %v2453_v2, %v2453_v2  ;;  %3413 = vmatpush.bf16.msrb.mxu1 %v4232_v39 }
 0x1da   :  { %v2520_v0 = vmul.f32 %v2264_v27, %v2264_v27  ;;  %v1739_v36 = vpop.f32.mrf.mxu2  ;;  %v1904_v7 = vpop.f32.mrf.mxu3  ;;  %v2586_v33 = vmul.f32 %v2330_v42, %v2330_v42 }
 0x1db   :  { %v2899_v63 = vmul.f32 %v2643_v28, %v2387_v31  ;;  %v2965_v15 = vmul.f32 %v2709_v19, %v2453_v2  ;;  %v1740_v20 = vadd.f32 %v5315_v60, %v1739_v36  ;;  %v1431_v3 = vpop.f32.mrf.mxu0  ;;  %v1596_v51 = vpop.f32.mrf.mxu1  ;;  %v1905_v53 = vadd.f32 %v5315_v60, %v1904_v7 }
 0x1dc   :  { %v2776_v26 = vmul.f32 %v2520_v0, %v2264_v27  ;;  %v1432_v34 = vadd.f32 %v5315_v60, %v1431_v3  ;;  %v1597_v62 = vadd.f32 %v5315_v60, %v1596_v51  ;;  %v2842_v29 = vmul.f32 %v2586_v33, %v2330_v42  ;;  %v4192_v3 = vld [vmem:[%s5991_s1 + $0x2e0] sm:$0xff] }
 0x1dd   :  { %v3179_v56 = vadd.f32 %v3178_v14, %v2899_v63  ;;  %v3255_v25 = vadd.f32 %v3254_v4, %v2965_v15  ;;  %v2130_v21 = vmax.f32 %v1740_v20, 0.0  ;;  %v2196_v8 = vmax.f32 %v1905_v53, 0.0 }
 0x1de   :  { %v3036_v58 = vadd.f32 %v3035_v35, %v2776_v26  ;;  %v2007_v49 = vmax.f32 %v1432_v34, 0.0  ;;  %v2073_v17 = vmax.f32 %v1597_v62, 0.0  ;;  %v3112_v31 = vadd.f32 %v3111_v57, %v2842_v29  ;;  %v4130_v57 = vld [vmem:[%s5991_s1 + $0xf0] sm:$0xff]  ;;  %v4225_v62 = vld [vmem:[%s5991_s1 + $0x3e8] sm:$0xff] }
 0x1df   :  { %v2388_v2 = vmax.f32 %v2130_v21, %v4661_v43  ;;  %v2454_v27 = vmax.f32 %v2196_v8, %v4661_v43 }
 0x1e0   :  { %v2265_v28 = vmax.f32 %v2007_v49, %v4661_v43  ;;  %v2331_v14 = vmax.f32 %v2073_v17, %v4661_v43 }
 0x1e1   :  { %v2644_v4 = vmul.f32 %v2388_v2, %v2388_v2  ;;  %v2710_v19 = vmul.f32 %v2454_v27, %v2454_v27 }
 0x1e2   :  { %v2521_v35 = vmul.f32 %v2265_v28, %v2265_v28  ;;  %v2587_v42 = vmul.f32 %v2331_v14, %v2331_v14  ;;  %v1741_v0 = vpop.f32.mrf.mxu2  ;;  %v1906_v36 = vpop.f32.mrf.mxu3 }
 0x1e3   :  { %v2900_v7 = vmul.f32 %v2644_v4, %v2388_v2  ;;  %v1742_v63 = vadd.f32 %v5315_v60, %v1741_v0  ;;  %v1907_v15 = vadd.f32 %v5315_v60, %v1906_v36  ;;  %v1434_v33 = vpop.f32.mrf.mxu0  ;;  %v1599_v20 = vpop.f32.mrf.mxu1  ;;  %v2966_v51 = vmul.f32 %v2710_v19, %v2454_v27 }
 0x1e4   :  { %v2777_v26 = vmul.f32 %v2521_v35, %v2265_v28  ;;  %v2843_v53 = vmul.f32 %v2587_v42, %v2331_v14  ;;  %v1435_v34 = vadd.f32 %v5315_v60, %v1434_v33  ;;  %v1600_v49 = vadd.f32 %v5315_v60, %v1599_v20 }
 0x1e5   :  { %v3180_v29 = vadd.f32 %v3179_v56, %v2900_v7  ;;  %v2131_v21 = vmax.f32 %v1742_v63, 0.0  ;;  %v2197_v8 = vmax.f32 %v1907_v15, 0.0  ;;  %v3256_v17 = vadd.f32 %v3255_v25, %v2966_v51 }
 0x1e6   :  { %v3037_v2 = vadd.f32 %v3036_v58, %v2777_v26  ;;  %v3113_v39 = vadd.f32 %v3112_v31, %v2843_v53  ;;  %v2008_v4 = vmax.f32 %v1435_v34, 0.0  ;;  %3970 = vmatmul.msk.bf16.gmra.mxu0 %vm926_vm1, %v4130_v57  ;;  %v2074_v14 = vmax.f32 %v1600_v49, 0.0 }
 0x1e7   :  { %v2389_v27 = vmax.f32 %v2131_v21, %v4661_v43  ;;  %v2455_v28 = vmax.f32 %v2197_v8, %v4661_v43  ;;  %4032 = vmatmul.msk.bf16.gmra.mxu2 %vm926_vm1, %v4192_v3  ;;  %4065 = vmatmul.msk.bf16.gmra.mxu3 %vm926_vm1, %v4225_v62 }
 0x1e8   :  { %v2266_v19 = vmax.f32 %v2008_v4, %v4661_v43  ;;  %v2332_v25 = vmax.f32 %v2074_v14, %v4661_v43 }
 0x1e9   :  { %v2645_v56 = vmul.f32 %v2389_v27, %v2389_v27  ;;  %v2711_v35 = vmul.f32 %v2455_v28, %v2455_v28 }
 0x1ea   :  { %v2522_v58 = vmul.f32 %v2266_v19, %v2266_v19  ;;  %v1744_v31 = vpop.f32.mrf.mxu2  ;;  %v1909_v42 = vpop.f32.mrf.mxu3  ;;  %v2588_v57 = vmul.f32 %v2332_v25, %v2332_v25 }
 0x1eb   :  { %v2901_v0 = vmul.f32 %v2645_v56, %v2389_v27  ;;  %v2967_v36 = vmul.f32 %v2711_v35, %v2455_v28  ;;  %v1745_v7 = vadd.f32 %v5315_v60, %v1744_v31  ;;  %v1436_v63 = vpop.f32.mrf.mxu0  ;;  %v1601_v15 = vpop.f32.mrf.mxu1  ;;  %v1910_v20 = vadd.f32 %v5315_v60, %v1909_v42 }
 0x1ec   :  { %v2778_v33 = vmul.f32 %v2522_v58, %v2266_v19  ;;  %v1437_v3 = vadd.f32 %v5315_v60, %v1436_v63  ;;  %v1602_v51 = vadd.f32 %v5315_v60, %v1601_v15  ;;  %v2844_v34 = vmul.f32 %v2588_v57, %v2332_v25 }
 0x1ed   :  { %v3181_v26 = vadd.f32 %v3180_v29, %v2901_v0  ;;  %v3257_v53 = vadd.f32 %v3256_v17, %v2967_v36  ;;  %v2132_v62 = vmax.f32 %v1745_v7, 0.0  ;;  %v2198_v8 = vmax.f32 %v1910_v20, 0.0  ;;  %v4193_v7 = vld [vmem:[%s5991_s1 + $0x2e8] sm:$0xff] }
 0x1ee   :  { %v3038_v21 = vadd.f32 %v3037_v2, %v2778_v33  ;;  %v2009_v49 = vmax.f32 %v1437_v3, 0.0  ;;  %v2075_v4 = vmax.f32 %v1602_v51, 0.0  ;;  %v3114_v27 = vadd.f32 %v3113_v39, %v2844_v34  ;;  %v4131_v2 = vld [vmem:[%s5991_s1 + $0xf8] sm:$0xff]  ;;  %v4226_v3 = vld [vmem:[%s5991_s1 + $0x3f0] sm:$0xff] }
 0x1ef   :  { %v2390_v28 = vmax.f32 %v2132_v62, %v4661_v43  ;;  %v2456_v14 = vmax.f32 %v2198_v8, %v4661_v43 }
 0x1f0   :  { %v2267_v19 = vmax.f32 %v2009_v49, %v4661_v43  ;;  %v2333_v56 = vmax.f32 %v2075_v4, %v4661_v43 }
 0x1f1   :  { %v2646_v35 = vmul.f32 %v2390_v28, %v2390_v28  ;;  %v2712_v58 = vmul.f32 %v2456_v14, %v2456_v14 }
 0x1f2   :  { %v2523_v31 = vmul.f32 %v2267_v19, %v2267_v19  ;;  %v2589_v29 = vmul.f32 %v2333_v56, %v2333_v56  ;;  %v1746_v17 = vpop.f32.mrf.mxu2  ;;  %v1911_v25 = vpop.f32.mrf.mxu3 }
 0x1f3   :  { %v2902_v42 = vmul.f32 %v2646_v35, %v2390_v28  ;;  %v1747_v39 = vadd.f32 %v5315_v60, %v1746_v17  ;;  %v1912_v0 = vadd.f32 %v5315_v60, %v1911_v25  ;;  %v1439_v36 = vpop.f32.mrf.mxu0  ;;  %v1604_v57 = vpop.f32.mrf.mxu1  ;;  %v2968_v63 = vmul.f32 %v2712_v58, %v2456_v14 }
 0x1f4   :  { %v2779_v15 = vmul.f32 %v2523_v31, %v2267_v19  ;;  %v2845_v33 = vmul.f32 %v2589_v29, %v2333_v56  ;;  %v1440_v20 = vadd.f32 %v5315_v60, %v1439_v36  ;;  %v1605_v8 = vadd.f32 %v5315_v60, %v1604_v57 }
 0x1f5   :  { %v3182_v51 = vadd.f32 %v3181_v26, %v2902_v42  ;;  %v2133_v34 = vmax.f32 %v1747_v39, 0.0  ;;  %v2199_v62 = vmax.f32 %v1912_v0, 0.0  ;;  %v3258_v49 = vadd.f32 %v3257_v53, %v2968_v63 }
 0x1f6   :  { %v3039_v4 = vadd.f32 %v3038_v21, %v2779_v15  ;;  %v3115_v28 = vadd.f32 %v3114_v27, %v2845_v33  ;;  %v2010_v35 = vmax.f32 %v1440_v20, 0.0  ;;  %3971 = vmatmul.msk.bf16.gmra.mxu0 %vm926_vm1, %v4131_v2  ;;  %v2076_v56 = vmax.f32 %v1605_v8, 0.0 }
 0x1f7   :  { %v2391_v14 = vmax.f32 %v2133_v34, %v4661_v43  ;;  %v2457_v19 = vmax.f32 %v2199_v62, %v4661_v43  ;;  %4033 = vmatmul.msk.bf16.gmra.mxu2 %vm926_vm1, %v4193_v7  ;;  %4066 = vmatmul.msk.bf16.gmra.mxu3 %vm926_vm1, %v4226_v3 }
 0x1f8   :  { %v2268_v58 = vmax.f32 %v2010_v35, %v4661_v43  ;;  %v2334_v53 = vmax.f32 %v2076_v56, %v4661_v43 }
 0x1f9   :  { %v2647_v26 = vmul.f32 %v2391_v14, %v2391_v14  ;;  %v2713_v31 = vmul.f32 %v2457_v19, %v2457_v19 }
 0x1fa   :  { %v2524_v21 = vmul.f32 %v2268_v58, %v2268_v58  ;;  %v1749_v27 = vpop.f32.mrf.mxu2  ;;  %v1914_v29 = vpop.f32.mrf.mxu3  ;;  %v2590_v2 = vmul.f32 %v2334_v53, %v2334_v53 }
 0x1fb   :  { %v2903_v17 = vmul.f32 %v2647_v26, %v2391_v14  ;;  %v2969_v25 = vmul.f32 %v2713_v31, %v2457_v19  ;;  %v1750_v42 = vadd.f32 %v5315_v60, %v1749_v27  ;;  %v1441_v39 = vpop.f32.mrf.mxu0  ;;  %v5426_v0 = vpop.f32.mrf.mxu1  ;;  %v1915_v57 = vadd.f32 %v5315_v60, %v1914_v29  ;;  %v4194_v29 = vld [vmem:[%s5991_s1 + $0x2f0] sm:$0xff] }
 0x1fc   :  { %v2780_v36 = vmul.f32 %v2524_v21, %v2268_v58  ;;  %v1442_v7 = vadd.f32 %v5315_v60, %v1441_v39  ;;  %v2846_v33 = vmul.f32 %v2590_v2, %v2334_v53 }
 0x1fd   :  { %v3183_v63 = vadd.f32 %v3182_v51, %v2903_v17  ;;  %v3259_v15 = vadd.f32 %v3258_v49, %v2969_v25  ;;  %v2134_v20 = vmax.f32 %v1750_v42, 0.0  ;;  %v2200_v34 = vmax.f32 %v1915_v57, 0.0  ;;  %v4132_v51 = vld [vmem:[%s5991_s1 + $0x100] sm:$0xff]  ;;  %v4227_v42 = vld [vmem:[%s5991_s1 + $0x3f8] sm:$0xff] }
 0x1fe   :  { %v3040_v3 = vadd.f32 %v3039_v4, %v2780_v36  ;;  %v2011_v62 = vmax.f32 %v1442_v7, 0.0  ;;  %v5430_v8 = vadd.f32 %v3115_v28, %v2846_v33 }
 0x1ff   :  { %v2392_v35 = vmax.f32 %v2134_v20, %v4661_v43  ;;  %v2458_v14 = vmax.f32 %v2200_v34, %v4661_v43 }
 0x200   :  { %v2269_v19 = vmax.f32 %v2011_v62, %v4661_v43 }
 0x201   :  { %v2648_v56 = vmul.f32 %v2392_v35, %v2392_v35  ;;  %v2714_v58 = vmul.f32 %v2458_v14, %v2458_v14 }
 0x202   :  { %v2525_v26 = vmul.f32 %v2269_v19, %v2269_v19  ;;  %v1751_v31 = vpop.f32.mrf.mxu2  ;;  %v1916_v21 = vpop.f32.mrf.mxu3 }
 0x203   :  { %v2904_v49 = vmul.f32 %v2648_v56, %v2392_v35  ;;  %v1752_v4 = vadd.f32 %v5315_v60, %v1751_v31  ;;  %v1917_v28 = vadd.f32 %v5315_v60, %v1916_v21  ;;  %v1444_v53 = vpop.f32.mrf.mxu0  ;;  %v5440_v27 = vpop.f32.mrf.mxu1  ;;  %v2970_v17 = vmul.f32 %v2714_v58, %v2458_v14 }
 0x204   :  { %v2781_v25 = vmul.f32 %v2525_v26, %v2269_v19  ;;  %v1445_v2 = vadd.f32 %v5315_v60, %v1444_v53 }
 0x205   :  { %v3184_v39 = vadd.f32 %v3183_v63, %v2904_v49  ;;  %v2135_v36 = vmax.f32 %v1752_v4, 0.0  ;;  %v2201_v57 = vmax.f32 %v1917_v28, 0.0  ;;  %v3260_v7 = vadd.f32 %v3259_v15, %v2970_v17 }
 0x206   :  { %v3041_v33 = vadd.f32 %v3040_v3, %v2781_v25  ;;  %v2012_v20 = vmax.f32 %v1445_v2, 0.0  ;;  %3972 = vmatmul.msk.bf16.gmra.mxu0 %vm926_vm1, %v4132_v51 }
 0x207   :  { %v2393_v34 = vmax.f32 %v2135_v36, %v4661_v43  ;;  %v2459_v62 = vmax.f32 %v2201_v57, %v4661_v43  ;;  %4034 = vmatmul.msk.bf16.gmra.mxu2 %vm926_vm1, %v4194_v29  ;;  %4067 = vmatmul.msk.bf16.gmra.mxu3 %vm926_vm1, %v4227_v42 }
 0x208   :  { %v2270_v35 = vmax.f32 %v2012_v20, %v4661_v43 }
 0x209   :  { %v2649_v14 = vmul.f32 %v2393_v34, %v2393_v34  ;;  %v2715_v19 = vmul.f32 %v2459_v62, %v2459_v62 }
 0x20a   :  { %v2526_v63 = vmul.f32 %v2270_v35, %v2270_v35  ;;  %v1754_v56 = vpop.f32.mrf.mxu2  ;;  %v1919_v58 = vpop.f32.mrf.mxu3 }
 0x20b   :  { %v2905_v15 = vmul.f32 %v2649_v14, %v2393_v34  ;;  %v2971_v3 = vmul.f32 %v2715_v19, %v2459_v62  ;;  %v1755_v26 = vadd.f32 %v5315_v60, %v1754_v56  ;;  %v1446_v31 = vpop.f32.mrf.mxu0  ;;  %v5456_v21 = vpop.f32.mrf.mxu1  ;;  %v1920_v49 = vadd.f32 %v5315_v60, %v1919_v58 }
 0x20c   :  { %v2782_v51 = vmul.f32 %v2526_v63, %v2270_v35  ;;  %v1447_v4 = vadd.f32 %v5315_v60, %v1446_v31 }
 0x20d   :  { %v3185_v28 = vadd.f32 %v3184_v39, %v2905_v15  ;;  %v3261_v53 = vadd.f32 %v3260_v7, %v2971_v3  ;;  %v2136_v29 = vmax.f32 %v1755_v26, 0.0  ;;  %v2202_v25 = vmax.f32 %v1920_v49, 0.0 }
 0x20e   :  { %v3042_v17 = vadd.f32 %v3041_v33, %v2782_v51  ;;  %v2013_v2 = vmax.f32 %v1447_v4, 0.0 }
 0x20f   :  { %v2394_v42 = vmax.f32 %v2136_v29, %v4661_v43  ;;  %v2460_v36 = vmax.f32 %v2202_v25, %v4661_v43 }
 0x210   :  { %v2271_v57 = vmax.f32 %v2013_v2, %v4661_v43 }
 0x211   :  { %v2650_v20 = vmul.f32 %v2394_v42, %v2394_v42  ;;  %v2716_v34 = vmul.f32 %v2460_v36, %v2460_v36 }
 0x212   :  { %v2527_v62 = vmul.f32 %v2271_v57, %v2271_v57  ;;  %v1756_v35 = vpop.f32.mrf.mxu2  ;;  %v1921_v14 = vpop.f32.mrf.mxu3 }
 0x213   :  { %v2906_v19 = vmul.f32 %v2650_v20, %v2394_v42  ;;  %v1757_v63 = vadd.f32 %v5315_v60, %v1756_v35  ;;  %v1922_v39 = vadd.f32 %v5315_v60, %v1921_v14  ;;  %v1449_v7 = vpop.f32.mrf.mxu0  ;;  %v5465_v33 = vpop.f32.mrf.mxu1  ;;  %v2972_v56 = vmul.f32 %v2716_v34, %v2460_v36  ;;  %v4231_v42 = vld [vmem:[%s5994_s4 + $0x18] sm:$0xff] }
 0x214   :  { %v2783_v58 = vmul.f32 %v2527_v62, %v2271_v57  ;;  %v1450_v15 = vadd.f32 %v5315_v60, %v1449_v7  ;;  %3414 = vmatpush.bf16.msrb.mxu1 %v4231_v42 }
 0x215   :  { %v3186_v3 = vadd.f32 %v3185_v28, %v2906_v19  ;;  %v2137_v26 = vmax.f32 %v1757_v63, 0.0  ;;  %v2203_v31 = vmax.f32 %v1922_v39, 0.0  ;;  %v3262_v51 = vadd.f32 %v3261_v53, %v2972_v56 }
 0x216   :  { %v3043_v49 = vadd.f32 %v3042_v17, %v2783_v58  ;;  %v2014_v4 = vmax.f32 %v1450_v15, 0.0 }
 0x217   :  { %v2395_v29 = vmax.f32 %v2137_v26, %v4661_v43  ;;  %v2461_v25 = vmax.f32 %v2203_v31, %v4661_v43 }
 0x218   :  { %v2272_v2 = vmax.f32 %v2014_v4, %v4661_v43 }
 0x219   :  { %v2651_v36 = vmul.f32 %v2395_v29, %v2395_v29  ;;  %v2717_v57 = vmul.f32 %v2461_v25, %v2461_v25 }
 0x21a   :  { %v2528_v20 = vmul.f32 %v2272_v2, %v2272_v2  ;;  %v1759_v34 = vpop.f32.mrf.mxu2  ;;  %v1924_v17 = vpop.f32.mrf.mxu3 }
 0x21b   :  { %v2907_v28 = vmul.f32 %v2651_v36, %v2395_v29  ;;  %v2973_v62 = vmul.f32 %v2717_v57, %v2461_v25  ;;  %v1760_v53 = vadd.f32 %v5315_v60, %v1759_v34  ;;  %v1451_v35 = vpop.f32.mrf.mxu0  ;;  %v1925_v19 = vadd.f32 %v5315_v60, %v1924_v17  ;;  %v5477_v39 = vpop.f32.mrf.mxu1 }
 0x21c   :  { %v2784_v14 = vmul.f32 %v2528_v20, %v2272_v2  ;;  %v1452_v63 = vadd.f32 %v5315_v60, %v1451_v35  ;;  %v1607_v20 = vadd.f32 %v5315_v60, %v5426_v0 }
 0x21d   :  { %v3187_v7 = vadd.f32 %v3186_v3, %v2907_v28  ;;  %v3263_v56 = vadd.f32 %v3262_v51, %v2973_v62  ;;  %v2138_v58 = vmax.f32 %v1760_v53, 0.0  ;;  %v2204_v26 = vmax.f32 %v1925_v19, 0.0 }
 0x21e   :  { %v3044_v15 = vadd.f32 %v3043_v49, %v2784_v14  ;;  %v2015_v31 = vmax.f32 %v1452_v63, 0.0 }
 0x21f   :  { %v2396_v4 = vmax.f32 %v2138_v58, %v4661_v43  ;;  %v2462_v29 = vmax.f32 %v2204_v26, %v4661_v43 }
 0x220   :  { %v2273_v25 = vmax.f32 %v2015_v31, %v4661_v43  ;;  %v2077_v31 = vmax.f32 %v1607_v20, 0.0 }
 0x221   :  { %v2652_v42 = vmul.f32 %v2396_v4, %v2396_v4  ;;  %v2718_v2 = vmul.f32 %v2462_v29, %v2462_v29 }
 0x222   :  { %v2529_v36 = vmul.f32 %v2273_v25, %v2273_v25  ;;  %v1761_v57 = vpop.f32.mrf.mxu2  ;;  %v1926_v51 = vpop.f32.mrf.mxu3 }
 0x223   :  { %v2908_v34 = vmul.f32 %v2652_v42, %v2396_v4  ;;  %v1762_v3 = vadd.f32 %v5315_v60, %v1761_v57  ;;  %v1454_v49 = vpop.f32.mrf.mxu0  ;;  %v2974_v28 = vmul.f32 %v2718_v2, %v2462_v29  ;;  %v1927_v53 = vadd.f32 %v5315_v60, %v1926_v51  ;;  %v5486_v17 = vpop.f32.mrf.mxu1 }
 0x224   :  { %v2785_v62 = vmul.f32 %v2529_v36, %v2273_v25  ;;  %v1455_v19 = vadd.f32 %v5315_v60, %v1454_v49  ;;  %v1610_v42 = vadd.f32 %v5315_v60, %v5440_v27  ;;  %v2335_v57 = vmax.f32 %v2077_v31, %v4661_v43 }
 0x225   :  { %v3188_v35 = vadd.f32 %v3187_v7, %v2908_v34  ;;  %v2139_v14 = vmax.f32 %v1762_v3, 0.0  ;;  %v3264_v63 = vadd.f32 %v3263_v56, %v2974_v28  ;;  %v2205_v26 = vmax.f32 %v1927_v53, 0.0 }
 0x226   :  { %v3045_v58 = vadd.f32 %v3044_v15, %v2785_v62  ;;  %v2016_v4 = vmax.f32 %v1455_v19, 0.0  ;;  %v2078_v51 = vmax.f32 %v1610_v42, 0.0  ;;  %v1612_v53 = vadd.f32 %v5315_v60, %v5456_v21 }
 0x227   :  { %v2397_v0 = vmax.f32 %v2139_v14, %v4661_v43  ;;  %v2463_v29 = vmax.f32 %v2205_v26, %v4661_v43  ;;  %v1615_v21 = vadd.f32 %v5315_v60, %v5465_v33 }
 0x228   :  { %v2274_v2 = vmax.f32 %v2016_v4, %v4661_v43  ;;  %v2336_v42 = vmax.f32 %v2078_v51, %v4661_v43 }
 0x229   :  { %v2653_v25 = vmul.f32 %v2397_v0, %v2397_v0  ;;  %v2719_v36 = vmul.f32 %v2463_v29, %v2463_v29  ;;  %v2080_v23 = vmax.f32 %v1615_v21, 0.0 }
 0x22a   :  { %v1764_v7 = vpop.f32.mrf.mxu2  ;;  %v2530_v56 = vmul.f32 %v2274_v2, %v2274_v2  ;;  %v1929_v20 = vpop.f32.mrf.mxu3 }
 0x22b   :  { %v2909_v34 = vmul.f32 %v2653_v25, %v2397_v0  ;;  %v1765_v15 = vadd.f32 %v5315_v60, %v1764_v7  ;;  %v1456_v3 = vpop.f32.mrf.mxu0  ;;  %v2975_v49 = vmul.f32 %v2719_v36, %v2463_v29  ;;  %v1930_v28 = vadd.f32 %v5315_v60, %v1929_v20  ;;  %v1621_v62 = vpop.f32.mrf.mxu1 }
 0x22c   :  { %v1457_v27 = vadd.f32 %v5315_v60, %v1456_v3  ;;  %v2786_v19 = vmul.f32 %v2530_v56, %v2274_v2  ;;  %v2591_v25 = vmul.f32 %v2335_v57, %v2335_v57  ;;  %v2079_v20 = vmax.f32 %v1612_v53, 0.0 }
 0x22d   :  { %v3189_v14 = vadd.f32 %v3188_v35, %v2909_v34  ;;  %v2140_v26 = vmax.f32 %v1765_v15, 0.0  ;;  %v3265_v31 = vadd.f32 %v3264_v63, %v2975_v49  ;;  %v2206_v0 = vmax.f32 %v1930_v28, 0.0 }
 0x22e   :  { %v2017_v4 = vmax.f32 %v1457_v27, 0.0  ;;  %v3046_v7 = vadd.f32 %v3045_v58, %v2786_v19  ;;  %v2847_v34 = vmul.f32 %v2591_v25, %v2335_v57  ;;  %v2592_v28 = vmul.f32 %v2336_v42, %v2336_v42 }
 0x22f   :  { %v2398_v1 = vmax.f32 %v2140_v26, %v4661_v43  ;;  %v2464_v29 = vmax.f32 %v2206_v0, %v4661_v43  ;;  %v2337_v53 = vmax.f32 %v2079_v20, %v4661_v43  ;;  %v1617_v25 = vadd.f32 %v5315_v60, %v5477_v39 }
 0x230   :  { %v2275_v36 = vmax.f32 %v2017_v4, %v4661_v43  ;;  %v2848_v21 = vmul.f32 %v2592_v28, %v2336_v42 }
 0x231   :  { %v2654_v3 = vmul.f32 %v2398_v1, %v2398_v1  ;;  %v2720_v35 = vmul.f32 %v2464_v29, %v2464_v29  ;;  %v2081_v39 = vmax.f32 %v1617_v25, 0.0 }
 0x232   :  { %v2531_v2 = vmul.f32 %v2275_v36, %v2275_v36  ;;  %v1766_v63 = vpop.f32.mrf.mxu2  ;;  %v1931_v15 = vpop.f32.mrf.mxu3 }
 0x233   :  { %v2910_v56 = vmul.f32 %v2654_v3, %v2398_v1  ;;  %v1767_v58 = vadd.f32 %v5315_v60, %v1766_v63  ;;  %v1459_v49 = vpop.f32.mrf.mxu0  ;;  %v2976_v51 = vmul.f32 %v2720_v35, %v2464_v29  ;;  %v1932_v19 = vadd.f32 %v5315_v60, %v1931_v15  ;;  %v1624_v26 = vpop.f32.mrf.mxu1 }
 0x234   :  { %v2787_v27 = vmul.f32 %v2531_v2, %v2275_v36  ;;  %v1460_v33 = vadd.f32 %v5315_v60, %v1459_v49  ;;  %v3117_v35 = vadd.f32 %v5430_v8, %v2847_v34  ;;  %v1622_v8 = vadd.f32 %v5315_v60, %v1621_v62 }
 0x235   :  { %v3190_v0 = vadd.f32 %v3189_v14, %v2910_v56  ;;  %v2141_v4 = vmax.f32 %v1767_v58, 0.0  ;;  %v3266_v48 = vadd.f32 %v3265_v31, %v2976_v51  ;;  %v2207_v1 = vmax.f32 %v1932_v19, 0.0 }
 0x236   :  { %v3047_v57 = vadd.f32 %v3046_v7, %v2787_v27  ;;  %v2018_v29 = vmax.f32 %v1460_v33, 0.0  ;;  %v1620_v14 = vadd.f32 %v5315_v60, %v5486_v17  ;;  %v2593_v31 = vmul.f32 %v2337_v53, %v2337_v53 }
 0x237   :  { %v2399_v3 = vmax.f32 %v2141_v4, %v4661_v43  ;;  %v2465_v36 = vmax.f32 %v2207_v1, %v4661_v43  ;;  %v2338_v7 = vmax.f32 %v2080_v23, %v4661_v43  ;;  %v1625_v25 = vadd.f32 %v5315_v60, %v1624_v26 }
 0x238   :  { %v2276_v2 = vmax.f32 %v2018_v29, %v4661_v43  ;;  %v2082_v28 = vmax.f32 %v1620_v14, 0.0 }
 0x239   :  { %v2655_v20 = vmul.f32 %v2399_v3, %v2399_v3  ;;  %v2721_v63 = vmul.f32 %v2465_v36, %v2465_v36  ;;  %v2084_v26 = vmax.f32 %v1625_v25, 0.0 }
 0x23a   :  { %v1769_v56 = vpop.f32.mrf.mxu2  ;;  %v2532_v15 = vmul.f32 %v2276_v2, %v2276_v2  ;;  %v1934_v51 = vpop.f32.mrf.mxu3  ;;  %v2340_v14 = vmax.f32 %v2082_v28, %v4661_v43 }
 0x23b   :  { %v2911_v58 = vmul.f32 %v2655_v20, %v2399_v3  ;;  %v1770_v49 = vadd.f32 %v5315_v60, %v1769_v56  ;;  %v1461_v27 = vpop.f32.mrf.mxu0  ;;  %v2977_v34 = vmul.f32 %v2721_v63, %v2465_v36  ;;  %v1935_v17 = vadd.f32 %v5315_v60, %v1934_v51  ;;  %v1626_v42 = vpop.f32.mrf.mxu1 }
 0x23c   :  { %v1462_v19 = vadd.f32 %v5315_v60, %v1461_v27  ;;  %v2788_v23 = vmul.f32 %v2532_v15, %v2276_v2  ;;  %v2594_v20 = vmul.f32 %v2338_v7, %v2338_v7  ;;  %v2339_v56 = vmax.f32 %v2081_v39, %v4661_v43 }
 0x23d   :  { %v3191_v4 = vadd.f32 %v3190_v0, %v2911_v58  ;;  %v2142_v33 = vmax.f32 %v1770_v49, 0.0  ;;  %v3267_v1 = vadd.f32 %v3266_v48, %v2977_v34  ;;  %v2208_v3 = vmax.f32 %v1935_v17, 0.0 }
 0x23e   :  { %v2019_v29 = vmax.f32 %v1462_v19, 0.0  ;;  %v3048_v37 = vadd.f32 %v3047_v57, %v2788_v23  ;;  %v2083_v36 = vmax.f32 %v1622_v8, 0.0  ;;  %v1627_v0 = vadd.f32 %v5315_v60, %v1626_v42 }
 0x23f   :  { %v2400_v62 = vmax.f32 %v2142_v33, %v4661_v43  ;;  %v2466_v63 = vmax.f32 %v2208_v3, %v4661_v43  ;;  %v3118_v2 = vadd.f32 %v3117_v35, %v2848_v21  ;;  %v2849_v39 = vmul.f32 %v2593_v31, %v2337_v53 }
 0x240   :  { %v2277_v51 = vmax.f32 %v2019_v29, %v4661_v43  ;;  %v2850_v57 = vmul.f32 %v2594_v20, %v2338_v7  ;;  %v2595_v27 = vmul.f32 %v2339_v56, %v2339_v56  ;;  %v2341_v19 = vmax.f32 %v2083_v36, %v4661_v43 }
 0x241   :  { %v2656_v48 = vmul.f32 %v2400_v62, %v2400_v62  ;;  %v2722_v58 = vmul.f32 %v2466_v63, %v2466_v63  ;;  %v2085_v33 = vmax.f32 %v1627_v0, 0.0  ;;  %v2596_v3 = vmul.f32 %v2340_v14, %v2340_v14 }
 0x242   :  { %v2533_v15 = vmul.f32 %v2277_v51, %v2277_v51  ;;  %v5530_v49 = vpop.f32.mrf.mxu2  ;;  %v5532_v8 = vpop.f32.mrf.mxu3  ;;  %v1635_v53 = vadd.f32 %v5315_v60, %v4663_v44  ;;  %v2342_v31 = vmax.f32 %v2084_v26, %v4661_v43  ;;  %v3119_v20 = vadd.f32 %v3118_v2, %v2849_v39 }
 0x243   :  { %v2912_v34 = vmul.f32 %v2656_v48, %v2400_v62  ;;  %v1464_v17 = vpop.f32.mrf.mxu0  ;;  %v2978_v23 = vmul.f32 %v2722_v58, %v2466_v63  ;;  %v1629_v28 = vpop.f32.mrf.mxu1  ;;  %v2851_v62 = vmul.f32 %v2595_v27, %v2339_v56  ;;  %v1637_v0 = vadd.f32 %v5315_v60, %v4672_v54 }
 0x244   :  { %v2789_v42 = vmul.f32 %v2533_v15, %v2277_v51  ;;  %v1465_v21 = vadd.f32 %v5315_v60, %v1464_v17  ;;  %v1630_v25 = vadd.f32 %v5315_v60, %v1629_v28  ;;  %v2597_v51 = vmul.f32 %v2341_v19, %v2341_v19 }
 0x245   :  { %v5535_v35 = vadd.f32 %v3191_v4, %v2912_v34  ;;  %v5542_v7 = vadd.f32 %v3267_v1, %v2978_v23  ;;  %v2343_v4 = vmax.f32 %v2085_v33, %v4661_v43  ;;  %v3120_v48 = vadd.f32 %v3119_v20, %v2850_v57 }
 0x246   :  { %v3049_v29 = vadd.f32 %v3048_v37, %v2789_v42  ;;  %v2020_v36 = vmax.f32 %v1465_v21, 0.0  ;;  %v2086_v63 = vmax.f32 %v1630_v25, 0.0  ;;  %v2852_v58 = vmul.f32 %v2596_v3, %v2340_v14 }
 0x247   :  { %v2598_v44 = vmul.f32 %v2342_v31, %v2342_v31  ;;  %v2088_v37 = vmax.f32 %v1635_v53, 0.0  ;;  %v1640_v56 = vadd.f32 %v5315_v60, %v4696_v5  ;;  %v3121_v2 = vadd.f32 %v3120_v48, %v2851_v62 }
 0x248   :  { %v2278_v15 = vmax.f32 %v2020_v36, %v4661_v43  ;;  %v2344_v26 = vmax.f32 %v2086_v63, %v4661_v43  ;;  %v2853_v17 = vmul.f32 %v2597_v51, %v2341_v19  ;;  %v2599_v54 = vmul.f32 %v2343_v4, %v2343_v4  ;;  %v4230_v19 = vld [vmem:[%s5994_s4 + $0x10] sm:$0xff] }
 0x249   :  { %v2089_v23 = vmax.f32 %v1637_v0, 0.0  ;;  %v1642_v42 = vadd.f32 %v5315_v60, %v4704_v18  ;;  %v3122_v33 = vadd.f32 %v3121_v2, %v2852_v58  ;;  %v2854_v3 = vmul.f32 %v2598_v44, %v2342_v31  ;;  %v5567_v31 = vld [vmem:[%s5992_s3] ss:$0 sm:$0xff]  ;;  %3415 = vmatpush.bf16.msrb.mxu1 %v4230_v19 }
 0x24a   :  { %v5549_v1 = vpop.f32.mrf.mxu2  ;;  %v2534_v39 = vmul.f32 %v2278_v15, %v2278_v15  ;;  %v5553_v27 = vpop.f32.mrf.mxu3  ;;  %v2600_v21 = vmul.f32 %v2344_v26, %v2344_v26  ;;  %v2346_v53 = vmax.f32 %v2088_v37, %v4661_v43  ;;  %v2090_v20 = vmax.f32 %v1640_v56, 0.0 }
 0x24b   :  { %v1466_v34 = vpop.f32.mrf.mxu0  ;;  %v1631_v57 = vpop.f32.mrf.mxu1  ;;  %v3123_v36 = vadd.f32 %v3122_v33, %v2853_v17  ;;  %v2855_v63 = vmul.f32 %v2599_v54, %v2343_v4  ;;  %v2347_v0 = vmax.f32 %v2089_v23, %v4661_v43 }
 0x24c   :  { %v1467_v14 = vadd.f32 %v5315_v60, %v1466_v34  ;;  %v2790_v28 = vmul.f32 %v2534_v39, %v2278_v15  ;;  %v1632_v5 = vadd.f32 %v5315_v60, %v1631_v57  ;;  %v1490_v60 = vadd.f32 %v5567_v31, %v4645_v38 }
 0x24d   :  { %v3124_v48 = vadd.f32 %v3123_v36, %v2854_v3  ;;  %v2856_v58 = vmul.f32 %v2600_v21, %v2344_v26  ;;  %v2602_v37 = vmul.f32 %v2346_v53, %v2346_v53  ;;  %v2348_v39 = vmax.f32 %v2090_v20, %v4661_v43 }
 0x24e   :  { %v2021_v25 = vmax.f32 %v1467_v14, 0.0  ;;  %v3050_v62 = vadd.f32 %v3049_v29, %v2790_v28  ;;  %v2087_v18 = vmax.f32 %v1632_v5, 0.0  ;;  %v2091_v29 = vmax.f32 %v1642_v42, 0.0 }
 0x24f   :  { %v3125_v34 = vadd.f32 %v3124_v48, %v2855_v63  ;;  %v2030_v54 = vmax.f32 %v1490_v60, 0.0  ;;  %v1800_v14 = vadd.f32 %v5567_v31, %v4665_v45  ;;  %v2603_v57 = vmul.f32 %v2347_v0, %v2347_v0 }
 0x250   :  { %v2279_v51 = vmax.f32 %v2021_v25, %v4661_v43  ;;  %v2345_v4 = vmax.f32 %v2087_v18, %v4661_v43  ;;  %v2349_v23 = vmax.f32 %v2091_v29, %v4661_v43  ;;  %v1492_v3 = vadd.f32 %v5567_v31, %v4667_v47 }
 0x251   :  { %v3126_v42 = vadd.f32 %v3125_v34, %v2856_v58  ;;  %v1802_v21 = vadd.f32 %v5567_v31, %v4674_v55  ;;  %v2858_v5 = vmul.f32 %v2602_v37, %v2346_v53  ;;  %v2604_v20 = vmul.f32 %v2348_v39, %v2348_v39 }
 0x252   :  { %v2535_v15 = vmul.f32 %v2279_v51, %v2279_v51  ;;  %v5573_v44 = vpop.f32.mrf.mxu2  ;;  %v5575_v56 = vpop.f32.mrf.mxu3  ;;  %v2601_v38 = vmul.f32 %v2345_v4, %v2345_v4  ;;  %v2288_v45 = vmax.f32 %v2030_v54, %v4661_v43  ;;  %v2154_v36 = vmax.f32 %v1800_v14, 0.0 }
 0x253   :  { %v1469_v2 = vpop.f32.mrf.mxu0  ;;  %v2605_v18 = vmul.f32 %v2349_v23, %v2349_v23  ;;  %v2031_v47 = vmax.f32 %v1492_v3, 0.0  ;;  %v2155_v48 = vmax.f32 %v1802_v21, 0.0  ;;  %v1497_v55 = vadd.f32 %v5567_v31, %v4699_v9 }
 0x254   :  { %v2791_v17 = vmul.f32 %v2535_v15, %v2279_v51  ;;  %v1470_v26 = vadd.f32 %v5567_v31, %v1469_v2  ;;  %v2857_v28 = vmul.f32 %v2601_v38, %v2345_v4  ;;  %v2859_v51 = vmul.f32 %v2603_v57, %v2347_v0 }
 0x255   :  { %v2860_v4 = vmul.f32 %v2604_v20, %v2348_v39  ;;  %v2544_v2 = vmul.f32 %v2288_v45, %v2288_v45  ;;  %v2861_v38 = vmul.f32 %v2605_v18, %v2349_v23  ;;  %v2289_v57 = vmax.f32 %v2031_v47, %v4661_v43 }
 0x256   :  { %v3051_v33 = vadd.f32 %v3050_v62, %v2791_v17  ;;  %v2022_v25 = vmax.f32 %v1470_v26, 0.0  ;;  %v3127_v19 = vadd.f32 %v3126_v42, %v2857_v28  ;;  %v1495_v62 = vadd.f32 %v5567_v31, %v4682_v59 }
 0x257   :  { %v2412_v59 = vmax.f32 %v2154_v36, %v4661_v43  ;;  %v2413_v9 = vmax.f32 %v2155_v48, %v4661_v43  ;;  %v2033_v26 = vmax.f32 %v1497_v55, 0.0  ;;  %v1500_v39 = vadd.f32 %v5567_v31, %v4713_v24 }
 0x258   :  { %v2280_v63 = vmax.f32 %v2022_v25, %v4661_v43  ;;  %v3128_v60 = vadd.f32 %v3127_v19, %v2858_v5  ;;  %v2032_v17 = vmax.f32 %v1495_v62, 0.0  ;;  %v3021_v28 = vrot.slane %v5177_v10, 4 }
 0x259   :  { %v2668_v25 = vmul.f32 %v2412_v59, %v2412_v59  ;;  %v1502_v23 = vadd.f32 %v5567_v31, %v4730_v50  ;;  %v1505_v5 = vadd.f32 %v5567_v31, %v4744_v12  ;;  %v1510_v24 = vadd.f32 %v5567_v31, %v4776_v11 }
 0x25a   :  { %v5590_v29 = vpop.f32.mrf.mxu2  ;;  %v2536_v53 = vmul.f32 %v2280_v63, %v2280_v63  ;;  %v5594_v58 = vpop.f32.mrf.mxu3  ;;  %v3129_v37 = vadd.f32 %v3128_v60, %v2859_v51  ;;  %v2290_v20 = vmax.f32 %v2032_v17, %v4661_v43  ;;  %v2545_v51 = vmul.f32 %v2289_v57, %v2289_v57 }
 0x25b   :  { %v1471_v15 = vpop.f32.mrf.mxu0  ;;  %v2291_v62 = vmax.f32 %v2033_v26, %v4661_v43  ;;  %v2669_v12 = vmul.f32 %v2413_v9, %v2413_v9  ;;  %v2034_v60 = vmax.f32 %v1500_v39, 0.0  ;;  %v3022_v47 = vadd.f32 %v3021_v28, %v5177_v10 }
 0x25c   :  { %v1472_v0 = vadd.f32 %v5567_v31, %v1471_v15  ;;  %v2792_v34 = vmul.f32 %v2536_v53, %v2280_v63  ;;  %v3130_v54 = vadd.f32 %v3129_v37, %v2860_v4  ;;  %v5617_v63 = vmul.f32 %v2544_v2, %v2288_v45 }
 0x25d   :  { %v2035_v55 = vmax.f32 %v1502_v23, 0.0  ;;  %v2036_v11 = vmax.f32 %v1505_v5, 0.0  ;;  %v2546_v15 = vmul.f32 %v2290_v20, %v2290_v20  ;;  %v2038_v4 = vmax.f32 %v1510_v24, 0.0 }
 0x25e   :  { %v2023_v14 = vmax.f32 %v1472_v0, 0.0  ;;  %v3052_v42 = vadd.f32 %v3051_v33, %v2792_v34  ;;  %v5603_v3 = vadd.f32 %v3130_v54, %v2861_v38  ;;  %v1507_v33 = vadd.f32 %v5567_v31, %v4762_v41 }
 0x25f   :  { %v5623_v41 = vmul.f32 %v2668_v25, %v2412_v59  ;;  %v2547_v0 = vmul.f32 %v2291_v62, %v2291_v62  ;;  %v1512_v2 = vadd.f32 %v5567_v31, %v4794_v40  ;;  %v1515_v34 = vadd.f32 %v5567_v31, %v4808_v13 }
 0x260   :  { %v2281_v21 = vmax.f32 %v2023_v14, %v4661_v43  ;;  %v2037_v45 = vmax.f32 %v1507_v33, 0.0  ;;  %v5630_v10 = vmul.f32 %v2545_v51, %v2289_v57  ;;  %v5632_v59 = vmul.f32 %v2669_v12, %v2413_v9 }
 0x261   :  { %v2292_v38 = vmax.f32 %v2034_v60, %v4661_v43  ;;  %v3023_v54 = vrot.slane %v3022_v47, 2  ;;  %v2293_v14 = vmax.f32 %v2035_v55, %v4661_v43  ;;  %v2294_v26 = vmax.f32 %v2036_v11, %v4661_v43 }
 0x262   :  { %v2537_v19 = vmul.f32 %v2281_v21, %v2281_v21  ;;  %v5615_v36 = vpop.f32.mrf.mxu2  ;;  %v5620_v50 = vpop.f32.mrf.mxu3  ;;  %v5640_v39 = vmul.f32 %v2546_v15, %v2290_v20  ;;  %v2295_v13 = vmax.f32 %v2037_v45, %v4661_v43  ;;  %v2296_v57 = vmax.f32 %v2038_v4, %v4661_v43 }
 0x263   :  { %v1474_v18 = vpop.f32.mrf.mxu0  ;;  %v1520_v9 = vadd.f32 %v5567_v31, %v4840_v16  ;;  %v2039_v25 = vmax.f32 %v1512_v2, 0.0  ;;  %v2040_v23 = vmax.f32 %v1515_v34, 0.0  ;;  %v2548_v24 = vmul.f32 %v2292_v38, %v2292_v38 }
 0x264   :  { %v2793_v48 = vmul.f32 %v2537_v19, %v2281_v21  ;;  %v1475_v53 = vadd.f32 %v5567_v31, %v1474_v18  ;;  %v5648_v21 = vmul.f32 %v2547_v0, %v2291_v62  ;;  %v1522_v20 = vadd.f32 %v5567_v31, %v4858_v52 }
 0x265   :  { %v3024_v19 = vadd.f32 %v3023_v54, %v3022_v47  ;;  %v2549_v18 = vmul.f32 %v2293_v14, %v2293_v14  ;;  %v2550_v12 = vmul.f32 %v2294_v26, %v2294_v26  ;;  %v2552_v62 = vmul.f32 %v2296_v57, %v2296_v57 }
 0x266   :  { %v3053_v37 = vadd.f32 %v3052_v42, %v2793_v48  ;;  %v2024_v17 = vmax.f32 %v1475_v53, 0.0  ;;  %v1517_v42 = vadd.f32 %v5567_v31, %v4826_v46  ;;  %v2551_v48 = vmul.f32 %v2295_v13, %v2295_v13 }
 0x267   :  { %v2042_v55 = vmax.f32 %v1520_v9, 0.0  ;;  %v2297_v53 = vmax.f32 %v2039_v25, %v4661_v43  ;;  %v2298_v15 = vmax.f32 %v2040_v23, %v4661_v43  ;;  %v1772_v45 = vadd.f32 %v5567_v31, %v5530_v49 }
 0x268   :  { %v2282_v40 = vmax.f32 %v2024_v17, %v4661_v43  ;;  %v2041_v16 = vmax.f32 %v1517_v42, 0.0  ;;  %v5659_v52 = vmul.f32 %v2548_v24, %v2292_v38  ;;  %v2043_v47 = vmax.f32 %v1522_v20, 0.0 }
 0x269   :  { %v3025_v0 = vrot.slane %v3024_v19, 1  ;;  %v5662_v34 = vmul.f32 %v2549_v18, %v2293_v14  ;;  %v5664_v17 = vmul.f32 %v2550_v12, %v2294_v26  ;;  %v1937_v42 = vadd.f32 %v5567_v31, %v5532_v8 }
 0x26a   :  { %v5646_v28 = vpop.f32.mrf.mxu2  ;;  %v2538_v5 = vmul.f32 %v2282_v40, %v2282_v40  ;;  %v5650_v33 = vpop.f32.mrf.mxu3  ;;  %v2299_v54 = vmax.f32 %v2041_v16, %v4661_v43  ;;  %v5671_v9 = vmul.f32 %v2552_v62, %v2296_v57  ;;  %v2300_v49 = vmax.f32 %v2042_v55, %v4661_v43 }
 0x26b   :  { %v1476_v46 = vpop.f32.mrf.mxu0  ;;  %v2553_v25 = vmul.f32 %v2297_v53, %v2297_v53  ;;  %v2554_v23 = vmul.f32 %v2298_v15, %v2298_v15  ;;  %v1775_v14 = vadd.f32 %v5567_v31, %v5549_v1  ;;  %v2301_v24 = vmax.f32 %v2043_v47, %v4661_v43 }
 0x26c   :  { %v1477_v51 = vadd.f32 %v5567_v31, %v1476_v46  ;;  %v2794_v60 = vmul.f32 %v2538_v5, %v2282_v40  ;;  %v5669_v40 = vmul.f32 %v2551_v48, %v2295_v13  ;;  %v2143_v5 = vmax.f32 %v1772_v45, 0.0 }
 0x26d   :  { %v3026_v8 = vadd.f32 %v3025_v0, %v3024_v19  ;;  %v2555_v20 = vmul.f32 %v2299_v54, %v2299_v54  ;;  %v1940_v18 = vadd.f32 %v5567_v31, %v5553_v27  ;;  %v1777_v12 = vadd.f32 %v5567_v31, %v5573_v44 }
 0x26e   :  { %v2025_v11 = vmax.f32 %v1477_v51, 0.0  ;;  %v3054_v4 = vadd.f32 %v3053_v37, %v2794_v60  ;;  %v2209_v51 = vmax.f32 %v1937_v42, 0.0  ;;  %v2556_v16 = vmul.f32 %v2300_v49, %v2300_v49 }
 0x26f   :  { %v1525_v1 = vadd.f32 %v5567_v31, %v4872_v22  ;;  %v5686_v62 = vmul.f32 %v2553_v25, %v2297_v53  ;;  %v2401_v19 = vmax.f32 %v2143_v5, %v4661_v43  ;;  %v2144_v55 = vmax.f32 %v1775_v14, 0.0 }
 0x270   :  { %v2283_v2 = vmax.f32 %v2025_v11, %v4661_v43  ;;  %v1780_v11 = vadd.f32 %v5567_v31, %v5590_v29  ;;  %v5691_v45 = vmul.f32 %v2554_v23, %v2298_v15  ;;  %v2557_v27 = vmul.f32 %v2301_v24, %v2301_v24 }
 0x271   :  { %v5693_v47 = vmul.f32 0.00390625, %v3026_v8  ;;  %v5696_v0 = vmul.f32 %v2555_v20, %v2299_v54  ;;  %v2467_v22 = vmax.f32 %v2209_v51, %v4661_v43  ;;  %v2145_v53 = vmax.f32 %v1777_v12, 0.0 }
 0x272   :  { %v2539_v37 = vmul.f32 %v2283_v2, %v2283_v2  ;;  %v1786_v38 = vpop.f32.mrf.mxu2  ;;  %v5676_v26 = vpop.f32.mrf.mxu3  ;;  %v2044_v42 = vmax.f32 %v1525_v1, 0.0  ;;  %v2657_v25 = vmul.f32 %v2401_v19, %v2401_v19  ;;  %v2402_v23 = vmax.f32 %v2144_v55, %v4661_v43 }
 0x273   :  { %v1479_v46 = vpop.f32.mrf.mxu0  ;;  %6015 = vst [vmem:[#allocation16_spill] sm:$0xff] %v5693_v47  ;;  %v2146_v5 = vmax.f32 %v1780_v11, 0.0  ;;  %v1782_v54 = vadd.f32 %v5567_v31, %v5615_v36  ;;  %v5708_v8 = vmul.f32 %v2557_v27, %v2301_v24  ;;  %v2403_v51 = vmax.f32 %v2145_v53, %v4661_v43 }
 0x274   :  { %v2795_v13 = vmul.f32 %v2539_v37, %v2283_v2  ;;  %v1480_v57 = vadd.f32 %v5567_v31, %v1479_v46  ;;  %v5699_v2 = vmul.f32 %v2556_v16, %v2300_v49  ;;  %v1942_v37 = vadd.f32 %v5567_v31, %v5575_v56 }
 0x275   :  { %6016 = vst [vmem:[#allocation17_spill] sm:$0xff] %v5708_v8  ;;  %v5711_v49 = vand.u32 2147483647, %v5693_v47  ;;  %v5719_v36 = vmax.f32 %v2044_v42, %v4661_v43  ;;  %v2913_v1 = vmul.f32 %v2657_v25, %v2401_v19  ;;  %v2404_v55 = vmax.f32 %v2146_v5, %v4661_v43 }
 0x276   :  { %v3055_v60 = vadd.f32 %v3054_v4, %v2795_v13  ;;  %v2026_v48 = vmax.f32 %v1480_v57, 0.0  ;;  %v2210_v4 = vmax.f32 %v1940_v18, 0.0  ;;  %v2723_v57 = vmul.f32 %v2467_v22, %v2467_v22 }
 0x277   :  { %6017 = vst [vmem:[#allocation18_spill] sm:$0xff] %v5711_v49  ;;  %v1785_v18 = vadd.f32 %v5567_v31, %v5646_v28  ;;  %v2211_v12 = vmax.f32 %v1942_v37, 0.0  ;;  %v2147_v11 = vmax.f32 %v1782_v54, 0.0  ;;  %v5724_v27 = vadd.f32 %v5567_v31, %v4890_v61 }
 0x278   :  { %v2284_v44 = vmax.f32 %v2026_v48, %v4661_v43  ;;  %v2468_v20 = vmax.f32 %v2210_v4, %v4661_v43  ;;  %v2658_v48 = vmul.f32 %v2402_v23, %v2402_v23  ;;  %4433 = vlog2.f32 %v5711_v49 }
 0x279   :  { %v2979_v4 = vmul.f32 %v2723_v57, %v2467_v22  ;;  %v2659_v42 = vmul.f32 %v2403_v51, %v2403_v51  ;;  %v2469_v19 = vmax.f32 %v2211_v12, %v4661_v43  ;;  %v1945_v37 = vadd.f32 %v5567_v31, %v5594_v58 }
 0x27a   :  { %v2540_v29 = vmul.f32 %v2284_v44, %v2284_v44  ;;  %v1789_v15 = vpop.f32.mrf.mxu2  ;;  %v5706_v14 = vpop.f32.mrf.mxu3  ;;  %v2724_v53 = vmul.f32 %v2468_v20, %v2468_v20  ;;  %v3193_v5 = vadd.f32 %v5535_v35, %v2913_v1  ;;  %v2914_v54 = vmul.f32 %v2658_v48, %v2402_v23 }
 0x27b   :  { %v1481_v46 = vpop.f32.mrf.mxu0  ;;  %v2725_v1 = vmul.f32 %v2469_v19, %v2469_v19  ;;  %v2212_v48 = vmax.f32 %v1945_v37, 0.0  ;;  %v3269_v8 = vadd.f32 %v5542_v7, %v2979_v4 }
 0x27c   :  { %v2796_v13 = vmul.f32 %v2540_v29, %v2284_v44  ;;  %v1482_v56 = vadd.f32 %v5567_v31, %v1481_v46  ;;  %v1787_v44 = vadd.f32 %v5567_v31, %v1786_v38  ;;  %v1790_v29 = vadd.f32 %v5567_v31, %v1789_v15 }
 0x27d   :  { %v2660_v46 = vmul.f32 %v2404_v55, %v2404_v55  ;;  %v2405_v38 = vmax.f32 %v2147_v11, %v4661_v43  ;;  %v2980_v12 = vmul.f32 %v2724_v53, %v2468_v20  ;;  %v2915_v15 = vmul.f32 %v2659_v42, %v2403_v51 }
 0x27e   :  { %v3056_v24 = vadd.f32 %v3055_v60, %v2796_v13  ;;  %v2027_v16 = vmax.f32 %v1482_v56, 0.0  ;;  %v2148_v60 = vmax.f32 %v1785_v18, 0.0  ;;  %v1947_v56 = vadd.f32 %v5567_v31, %v5620_v50  ;;  %v5742_v23 = vpop.eup %4433 }
 0x27f   :  { %v2149_v57 = vmax.f32 %v1787_v44, 0.0  ;;  %v2150_v11 = vmax.f32 %v1790_v29, 0.0  ;;  %v3194_v49 = vadd.f32 %v3193_v5, %v2914_v54  ;;  %v2916_v50 = vmul.f32 %v2660_v46, %v2404_v55 }
 0x280   :  { %v2285_v28 = vmax.f32 %v2027_v16, %v4661_v43  ;;  %v2406_v16 = vmax.f32 %v2148_v60, %v4661_v43  ;;  %v2661_v44 = vmul.f32 %v2405_v38, %v2405_v38  ;;  %v5746_v53 = vadd.f32 %v3269_v8, %v2980_v12 }
 0x281   :  { %v3195_v42 = vadd.f32 %v3194_v49, %v2915_v15  ;;  %v2470_v37 = vmax.f32 %v2212_v48, %v4661_v43  ;;  %v1950_v5 = vadd.f32 %v5567_v31, %v5650_v33  ;;  %v1952_v33 = vadd.f32 %v5567_v31, %v5676_v26 }
 0x282   :  { %v2541_v25 = vmul.f32 %v2285_v28, %v2285_v28  ;;  %v1791_v61 = vpop.f32.mrf.mxu2  ;;  %v5735_v13 = vpop.f32.mrf.mxu3  ;;  %v2662_v60 = vmul.f32 %v2406_v16, %v2406_v16  ;;  %v2917_v29 = vmul.f32 %v2661_v44, %v2405_v38 }
 0x283   :  { %v1484_v22 = vpop.f32.mrf.mxu0  ;;  %v1792_v58 = vadd.f32 %v5567_v31, %v1791_v61  ;;  %v3196_v55 = vadd.f32 %v3195_v42, %v2916_v50  ;;  %v2726_v38 = vmul.f32 %v2470_v37, %v2470_v37  ;;  %v2214_v48 = vmax.f32 %v1950_v5, 0.0 }
 0x284   :  { %v2797_v18 = vmul.f32 %v2541_v25, %v2285_v28  ;;  %v1485_v35 = vadd.f32 %v5567_v31, %v1484_v22  ;;  %v2213_v28 = vmax.f32 %v1947_v56, 0.0  ;;  %v2407_v25 = vmax.f32 %v2149_v57, %v4661_v43 }
 0x285   :  { %v2151_v51 = vmax.f32 %v1792_v58, 0.0  ;;  %v5748_v22 = vmul.f32 %v2725_v1, %v2469_v19  ;;  %v3197_v1 = vadd.f32 %v3196_v55, %v2917_v29  ;;  %v2472_v29 = vmax.f32 %v2214_v48, %v4661_v43 }
 0x286   :  { %v3057_v47 = vadd.f32 %v3056_v24, %v2797_v18  ;;  %v2028_v61 = vmax.f32 %v1485_v35, 0.0  ;;  %v2408_v24 = vmax.f32 %v2150_v11, %v4661_v43  ;;  %v2471_v49 = vmax.f32 %v2213_v28, %v4661_v43 }
 0x287   :  { %v2663_v56 = vmul.f32 %v2407_v25, %v2407_v25  ;;  %v2409_v57 = vmax.f32 %v2151_v51, %v4661_v43  ;;  %v2918_v18 = vmul.f32 %v2662_v60, %v2406_v16  ;;  %v1955_v16 = vadd.f32 %v5567_v31, %v5706_v14 }
 0x288   :  { %v3058_v20 = vrot.slane %v3057_v47, 4  ;;  %v2286_v58 = vmax.f32 %v2028_v61, %v4661_v43  ;;  %v2664_v15 = vmul.f32 %v2408_v24, %v2408_v24  ;;  %v2727_v51 = vmul.f32 %v2471_v49, %v2471_v49 }
 0x289   :  { %v2919_v44 = vmul.f32 %v2663_v56, %v2407_v25  ;;  %v3198_v42 = vadd.f32 %v3197_v1, %v2918_v18  ;;  %v2216_v56 = vmax.f32 %v1955_v16, 0.0 }
 0x28a   :  { %v3059_v7 = vadd.f32 %v3058_v20, %v3057_v47  ;;  %v1794_v4 = vpop.f32.mrf.mxu2  ;;  %v1959_v8 = vpop.f32.mrf.mxu3  ;;  %v2665_v20 = vmul.f32 %v2409_v57, %v2409_v57  ;;  %v2542_v60 = vmul.f32 %v2286_v58, %v2286_v58  ;;  %v2920_v26 = vmul.f32 %v2664_v15, %v2408_v24 }
 0x28b   :  { %v1795_v54 = vadd.f32 %v5567_v31, %v1794_v4  ;;  %v1486_v46 = vpop.f32.mrf.mxu0  ;;  %v2215_v4 = vmax.f32 %v1952_v33, 0.0  ;;  %v1960_v24 = vadd.f32 %v5567_v31, %v1959_v8 }
 0x28c   :  { %v3060_v19 = vrot.slane %v3059_v7, 2  ;;  %v1487_v12 = vadd.f32 %v5567_v31, %v1486_v46  ;;  %v3199_v46 = vadd.f32 %v3198_v42, %v2919_v44  ;;  %v2921_v18 = vmul.f32 %v2665_v20, %v2409_v57 }
 0x28d   :  { %v2152_v47 = vmax.f32 %v1795_v54, 0.0  ;;  %v2982_v57 = vmul.f32 %v2726_v38, %v2470_v37  ;;  %v2728_v20 = vmul.f32 %v2472_v29, %v2472_v29  ;;  %v2218_v42 = vmax.f32 %v1960_v24, 0.0 }
 0x28e   :  { %v3061_v35 = vadd.f32 %v3060_v19, %v3059_v7  ;;  %v2029_v50 = vmax.f32 %v1487_v12, 0.0  ;;  %v1957_v7 = vadd.f32 %v5567_v31, %v5735_v13  ;;  %v2798_v12 = vmul.f32 %v2542_v60, %v2286_v58 }
 0x28f   :  { %v2410_v11 = vmax.f32 %v2152_v47, %v4661_v43  ;;  %v2473_v13 = vmax.f32 %v2215_v4, %v4661_v43  ;;  %v2474_v58 = vmax.f32 %v2216_v56, %v4661_v43  ;;  %v3271_v4 = vadd.f32 %v5746_v53, %v5748_v22 }
 0x290   :  { %v3062_v28 = vrot.slane %v3061_v35, 1  ;;  %v2287_v61 = vmax.f32 %v2029_v50, %v4661_v43  ;;  %v2217_v48 = vmax.f32 %v1957_v7, 0.0  ;;  %v2476_v56 = vmax.f32 %v2218_v42, %v4661_v43 }
 0x291   :  { %v2666_v25 = vmul.f32 %v2410_v11, %v2410_v11 }
 0x292   :  { %v3063_v54 = vadd.f32 %v3062_v28, %v3061_v35  ;;  %v1796_v55 = vpop.f32.mrf.mxu2  ;;  %v2543_v5 = vmul.f32 %v2287_v61, %v2287_v61  ;;  %v1961_v47 = vpop.f32.mrf.mxu3  ;;  %v3200_v35 = vadd.f32 %v3199_v46, %v2920_v26  ;;  %v2729_v26 = vmul.f32 %v2473_v13, %v2473_v13 }
 0x293   :  { %v1797_v14 = vadd.f32 %v5567_v31, %v1796_v55  ;;  %v2922_v50 = vmul.f32 %v2666_v25, %v2410_v11  ;;  %v1962_v16 = vadd.f32 %v5567_v31, %v1961_v47  ;;  %v2983_v11 = vmul.f32 %v2727_v51, %v2471_v49 }
 0x294   :  { %v5769_v19 = vmul.f32 0.00390625, %v3063_v54  ;;  %v2799_v33 = vmul.f32 %v2543_v5, %v2287_v61  ;;  %v3201_v8 = vadd.f32 %v3200_v35, %v2921_v18  ;;  %v2475_v54 = vmax.f32 %v2217_v48, %v4661_v43 }
 0x295   :  { %v2153_v15 = vmax.f32 %v1797_v14, 0.0  ;;  %v2219_v55 = vmax.f32 %v1962_v16, 0.0  ;;  %v2045_v25 = vmax.f32 %v5724_v27, 0.0  ;;  %v1530_v5 = vadd.f32 %v5567_v31, %v4904_v30 }
 0x296   :  { %v5774_v1 = vand.u32 2147483647, %v5769_v19  ;;  %v3064_v28 = vadd.f32 %v2799_v33, %v2798_v12  ;;  %v3202_v7 = vadd.f32 %v3201_v8, %v2922_v50  ;;  %v3272_v14 = vadd.f32 %v3271_v4, %v2982_v57 }
 0x297   :  { %v2411_v44 = vmax.f32 %v2153_v15, %v4661_v43  ;;  %v2730_v46 = vmul.f32 %v2474_v58, %v2474_v58  ;;  %v1532_v51 = vadd.f32 %v5567_v31, %v4922_v6  ;;  %v2985_v47 = vmul.f32 %v2729_v26, %v2473_v13 }
 0x298   :  { %4435 = vlog2.f32 %v5774_v1  ;;  %v3065_v60 = vadd.f32 %v3064_v28, %v5617_v63  ;;  %v2984_v63 = vmul.f32 %v2728_v20, %v2472_v29  ;;  %v3273_v18 = vadd.f32 %v3272_v14, %v2983_v11  ;;  %v6021_v11 = vld [vmem:[#allocation5_spill] sm:$0xff] }
 0x299   :  { %v2667_v61 = vmul.f32 %v2411_v44, %v2411_v44  ;;  %v2731_v27 = vmul.f32 %v2475_v54, %v2475_v54  ;;  %v2477_v29 = vmax.f32 %v2219_v55, %v4661_v43  ;;  %v2303_v24 = vmax.f32 %v2045_v25, %v4661_v43 }
 0x29a   :  { %v3066_v37 = vadd.f32 %v3065_v60, %v5630_v10  ;;  %v3169_v10 = vrot.slane %v5266_v32, 4  ;;  %v3274_v33 = vadd.f32 %v3273_v18, %v2984_v63  ;;  %v2986_v35 = vmul.f32 %v2730_v46, %v2474_v58  ;;  %v6020_v58 = vld [vmem:[#allocation4_spill] sm:$0xff] }
 0x29b   :  { %v2923_v38 = vmul.f32 %v2667_v61, %v2411_v44  ;;  %v2732_v48 = vmul.f32 %v2476_v56, %v2476_v56  ;;  %v2046_v13 = vmax.f32 %v1530_v5, 0.0  ;;  %v2047_v28 = vmax.f32 %v1532_v51, 0.0  ;;  %v6018_v44 = vld [vmem:[#allocation15_spill] sm:$0xff] }
 0x29c   :  { %v3067_v53 = vadd.f32 %v3066_v37, %v5640_v39  ;;  %v4245_v39 = vmul.f32 -0.33333334, %v5742_v23  ;;  %v3275_v16 = vadd.f32 %v3274_v33, %v2985_v47  ;;  %v2987_v57 = vmul.f32 %v2731_v27, %v2475_v54  ;;  %v6019_v23 = vld [vmem:[#allocation3_spill] sm:$0xff] }
 0x29d   :  { %v3203_v22 = vadd.f32 %v3202_v7, %v2923_v38  ;;  %v2733_v8 = vmul.f32 %v2477_v29, %v2477_v29  ;;  %v1535_v42 = vadd.f32 %v5567_v31, %v6019_v23  ;;  %v1537_v60 = vadd.f32 %v5567_v31, %v6020_v58 }
 0x29e   :  { %v4436_v49 = vpop.eup %4435  ;;  %v3068_v12 = vadd.f32 %v3067_v53, %v5648_v21  ;;  %v3243_v21 = vrot.slane %v6018_v44, 4  ;;  %v2988_v61 = vmul.f32 %v2732_v48, %v2476_v56  ;;  %v2559_v25 = vmul.f32 %v2303_v24, %v2303_v24 }
 0x29f   :  { %v3204_v30 = vadd.f32 %v3203_v22, %v5623_v41  ;;  %v4269_v15 = vmul.f32 -0.33333334, %v4436_v49  ;;  %v3170_v41 = vadd.f32 %v3169_v10, %v5266_v32  ;;  %v2558_v32 = vmul.f32 %v5719_v36, %v5719_v36  ;;  %v4229_v22 = vld [vmem:[%s5994_s4 + $0x8] sm:$0xff]  ;;  %v6022_v10 = vld [vmem:[#allocation6_spill] sm:$0xff] }
 0x2a0   :  { %v3069_v6 = vadd.f32 %v3068_v12, %v5659_v52  ;;  %v3132_v52 = vrot.slane %v5603_v3, 4  ;;  %v3244_v26 = vadd.f32 %v3243_v21, %v6018_v44  ;;  %v2989_v55 = vmul.f32 %v2733_v8, %v2477_v29  ;;  %3416 = vmatpush.bf16.msrb.mxu1 %v4229_v22  ;;  %v4228_v29 = vld [vmem:[%s5994_s4] sm:$0xff] }
 0x2a1   :  { %v3205_v50 = vadd.f32 %v3204_v30, %v5632_v59  ;;  %4437 = vpow2.f32 %v4269_v15  ;;  %v3276_v59 = vadd.f32 %v3275_v16, %v2986_v35  ;;  %v3171_v7 = vrot.slane %v3170_v41, 2  ;;  %v6023_v8 = vld [vmem:[#allocation7_spill] sm:$0xff] }
 0x2a2   :  { %v3070_v20 = vadd.f32 %v3069_v6, %v5662_v34  ;;  %4439 = vpow2.f32 %v4245_v39  ;;  %v1540_v34 = vadd.f32 %v5567_v31, %v6021_v11  ;;  %v2304_v5 = vmax.f32 %v2046_v13, %v4661_v43 }
 0x2a3   :  { %v3206_v54 = vrot.slane %v3205_v50, 4  ;;  %v3277_v37 = vadd.f32 %v3276_v59, %v2987_v57  ;;  %v2305_v14 = vmax.f32 %v2047_v28, %v4661_v43  ;;  %v2048_v63 = vmax.f32 %v1535_v42, 0.0 }
 0x2a4   :  { %v3071_v4 = vadd.f32 %v3070_v20, %v5664_v17  ;;  %v3133_v17 = vadd.f32 %v3132_v52, %v5603_v3  ;;  %v2049_v46 = vmax.f32 %v1537_v60, 0.0  ;;  %v2050_v51 = vmax.f32 %v1540_v34, 0.0  ;;  %3417 = vmatpush.bf16.msrb.mxu1 %v4228_v29 }
 0x2a5   :  { %v3278_v56 = vadd.f32 %v3277_v37, %v2988_v61  ;;  %v1542_v18 = vadd.f32 %v5567_v31, %v6022_v10  ;;  %v3207_v47 = vadd.f32 %v3206_v54, %v3205_v50  ;;  %v3245_v3 = vrot.slane %v3244_v26, 2 }
 0x2a6   :  { %v3072_v38 = vadd.f32 %v3071_v4, %v5669_v40  ;;  %v2814_v40 = vmul.f32 %v2558_v32, %v5719_v36  ;;  %v3172_v12 = vadd.f32 %v3171_v7, %v3170_v41  ;;  %v2815_v39 = vmul.f32 %v2559_v25, %v2303_v24  ;;  %v6024_v4 = vld [vmem:[#allocation18_spill] sm:$0xff]  ;;  %v6027_v25 = vld [vmem:[#allocation9_spill] sm:$0xff] }
 0x2a7   :  { %v5822_v49 = vpop.eup %4437  ;;  %v2560_v33 = vmul.f32 %v2304_v5, %v2304_v5  ;;  %v2561_v36 = vmul.f32 %v2305_v14, %v2305_v14  ;;  %v3134_v15 = vrot.slane %v3133_v17, 2  ;;  %v2306_v35 = vmax.f32 %v2048_v63, %v4661_v43 }
 0x2a8   :  { %v3073_v53 = vadd.f32 %v3072_v38, %v5671_v9  ;;  %v5827_v27 = vpop.eup %4439  ;;  %v3279_v9 = vadd.f32 %v3278_v56, %v2989_v55  ;;  %v2307_v48 = vmax.f32 %v2049_v46, %v4661_v43  ;;  %v4271_v6 = vmul.f32 %v5822_v49, %v5822_v49  ;;  %v6026_v38 = vld [vmem:[#allocation8_spill] sm:$0xff] }
 0x2a9   :  { %v2051_v13 = vmax.f32 %v1542_v18, 0.0  ;;  %v4247_v28 = vmul.f32 %v5827_v27, %v5827_v27  ;;  %v3208_v44 = vrot.slane %v3207_v47, 2  ;;  %v3246_v24 = vadd.f32 %v3245_v3, %v3244_v26  ;;  %v6025_v26 = vld [vmem:[#allocation17_spill] sm:$0xff] }
 0x2aa   :  { %v3074_v30 = vadd.f32 %v3073_v53, %v5686_v62  ;;  %v2308_v62 = vmax.f32 %v2050_v51, %v4661_v43  ;;  %v3173_v21 = vrot.slane %v3172_v12, 1  ;;  %v3280_v16 = vrot.slane %v3279_v9, 4 }
 0x2ab   :  { %v2816_v57 = vmul.f32 %v2560_v33, %v2304_v5  ;;  %v2817_v20 = vmul.f32 %v2561_v36, %v2305_v14  ;;  %v1545_v23 = vadd.f32 %v5567_v31, %v6023_v8  ;;  %v3135_v42 = vadd.f32 %v3134_v15, %v3133_v17  ;;  %v6028_v33 = vld [vmem:[#allocation10_spill] sm:$0xff]  ;;  %v6029_v15 = vld [vmem:[#allocation11_spill] sm:$0xff] }
 0x2ac   :  { %v3075_v50 = vadd.f32 %v3074_v30, %v5691_v45  ;;  %v2562_v45 = vmul.f32 %v2306_v35, %v2306_v35  ;;  %v2563_v58 = vmul.f32 %v2307_v48, %v2307_v48  ;;  %v4272_v60 = vmul.f32 %v4271_v6, %v5774_v1 }
 0x2ad   :  { %v2564_v59 = vmul.f32 %v2308_v62, %v2308_v62  ;;  %v2309_v61 = vmax.f32 %v2051_v13, %v4661_v43  ;;  %v4248_v32 = vmul.f32 %v4247_v28, %v6024_v4  ;;  %v3247_v11 = vrot.slane %v3246_v24, 1 }
 0x2ae   :  { %v3076_v41 = vadd.f32 %v3075_v50, %v5696_v0  ;;  %v3209_v0 = vadd.f32 %v3208_v44, %v3207_v47  ;;  %v3174_v34 = vadd.f32 %v3173_v21, %v3172_v12  ;;  %v3281_v7 = vadd.f32 %v3280_v16, %v3279_v9  ;;  %v6030_v50 = vld [vmem:[#allocation12_spill] sm:$0xff] }
 0x2af   :  { %v2052_v37 = vmax.f32 %v1545_v23, 0.0  ;;  %v1547_v55 = vadd.f32 %v5567_v31, %v6026_v38  ;;  %v1550_v5 = vadd.f32 %v5567_v31, %v6027_v25  ;;  %v3136_v14 = vrot.slane %v3135_v42, 1 }
 0x2b0   :  { %v3077_v52 = vadd.f32 %v3076_v41, %v5699_v2  ;;  %v2818_v2 = vmul.f32 %v2562_v45, %v2306_v35  ;;  %v2819_v17 = vmul.f32 %v2563_v58, %v2307_v48  ;;  %v4273_v63 = vmul.f32 %v4272_v60, %v4271_v6 }
 0x2b1   :  { %v2820_v56 = vmul.f32 %v2564_v59, %v2308_v62  ;;  %v2565_v53 = vmul.f32 %v2309_v61, %v2309_v61  ;;  %v4249_v22 = vmul.f32 %v4248_v32, %v4247_v28  ;;  %v3210_v51 = vrot.slane %v3209_v0, 1 }
 0x2b2   :  { %v3078_v54 = vadd.f32 %v3077_v52, %v6025_v26  ;;  %v3248_v10 = vadd.f32 %v3247_v11, %v3246_v24  ;;  %v5853_v18 = vmul.f32 0.00390625, %v3174_v34  ;;  %v3282_v3 = vrot.slane %v3281_v7, 2  ;;  %v6031_v52 = vld [vmem:[#allocation13_spill] sm:$0xff] }
 0x2b3   :  { %v2310_v12 = vmax.f32 %v2052_v37, %v4661_v43  ;;  %v2053_v30 = vmax.f32 %v1547_v55, 0.0  ;;  %v2054_v9 = vmax.f32 %v1550_v5, 0.0  ;;  %v3137_v29 = vadd.f32 %v3136_v14, %v3135_v42 }
 0x2b4   :  { %v3079_v46 = vadd.f32 %v3078_v54, %v2814_v40  ;;  %v1552_v36 = vadd.f32 %v5567_v31, %v6028_v33  ;;  %v1555_v40 = vadd.f32 %v5567_v31, %v6029_v15  ;;  %v4274_v35 = vsub.f32 %v4273_v63, %v5822_v49  ;;  %v6032_v54 = vld [vmem:[#allocation14_spill] sm:$0xff] }
 0x2b5   :  { %v2821_v6 = vmul.f32 %v2565_v53, %v2309_v61  ;;  %v1557_v62 = vadd.f32 %v5567_v31, %v6030_v50  ;;  %v3211_v13 = vadd.f32 %v3210_v51, %v3209_v0  ;;  %v5864_v28 = vmul.f32 0.00390625, %v3248_v10 }
 0x2b6   :  { %v3080_v47 = vadd.f32 %v3079_v46, %v2815_v39  ;;  %v4250_v39 = vsub.f32 %v4249_v22, %v5827_v27  ;;  %v5867_v44 = vand.u32 2147483647, %v5853_v18  ;;  %v3283_v21 = vadd.f32 %v3282_v3, %v3281_v7 }
 0x2b7   :  { %v2566_v41 = vmul.f32 %v2310_v12, %v2310_v12  ;;  %v2311_v16 = vmax.f32 %v2053_v30, %v4661_v43  ;;  %v2312_v8 = vmax.f32 %v2054_v9, %v4661_v43  ;;  %v2055_v23 = vmax.f32 %v1552_v36, 0.0  ;;  %v6033_v9 = vld [vmem:[#allocation16_spill] sm:$0xff] }
 0x2b8   :  { %v3081_v48 = vadd.f32 %v3080_v47, %v2816_v57  ;;  %v5871_v57 = vmul.f32 0.00390625, %v3137_v29  ;;  %v2056_v42 = vmax.f32 %v1555_v40, 0.0  ;;  %v4275_v45 = vmul.f32 -0.33333334, %v4274_v35 }
 0x2b9   :  { %v2057_v60 = vmax.f32 %v1557_v62, 0.0  ;;  %v1560_v59 = vadd.f32 %v5567_v31, %v6031_v52  ;;  %v4251_v61 = vmul.f32 -0.33333334, %v4250_v39  ;;  %v5875_v32 = vmul.f32 0.00390625, %v3211_v13 }
 0x2ba   :  { %v3082_v24 = vadd.f32 %v3081_v48, %v2817_v20  ;;  %4441 = vlog2.f32 %v5867_v44  ;;  %v3284_v0 = vrot.slane %v3283_v21, 1  ;;  %v5879_v11 = vand.u32 2147483647, %v5864_v28 }
 0x2bb   :  { %v2822_v34 = vmul.f32 %v2566_v41, %v2310_v12  ;;  %v2567_v26 = vmul.f32 %v2311_v16, %v2311_v16  ;;  %v1562_v7 = vadd.f32 %v5567_v31, %v6032_v54  ;;  %v5884_v37 = vand.u32 2147483647, %v5871_v57 }
 0x2bc   :  { %v3083_v58 = vadd.f32 %v3082_v24, %v2818_v2  ;;  %v2568_v38 = vmul.f32 %v2312_v8, %v2312_v8  ;;  %v2313_v55 = vmax.f32 %v2055_v23, %v4661_v43  ;;  %v4276_v25 = vadd.f32 %v5822_v49, %v4275_v45 }
 0x2bd   :  { %v2314_v14 = vmax.f32 %v2056_v42, %v4661_v43  ;;  %v2315_v2 = vmax.f32 %v2057_v60, %v4661_v43  ;;  %v5891_v63 = vand.u32 2147483647, %v5875_v32  ;;  %v4252_v46 = vadd.f32 %v5827_v27, %v4251_v61 }
 0x2be   :  { %v3084_v20 = vadd.f32 %v3083_v58, %v2819_v17  ;;  %v2058_v17 = vmax.f32 %v1560_v59, 0.0  ;;  %v3285_v53 = vadd.f32 %v3284_v0, %v3283_v21  ;;  %4443 = vlog2.f32 %v5879_v11 }
 0x2bf   :  { %v2059_v22 = vmax.f32 %v1562_v7, 0.0  ;;  %4445 = vlog2.f32 %v5884_v37  ;;  %v2823_v49 = vmul.f32 %v2567_v26, %v2311_v16  ;;  %v4277_v10 = vmul.f32 %v4276_v25, %v5769_v19 }
 0x2c0   :  { %v3085_v5 = vadd.f32 %v3084_v20, %v2820_v56  ;;  %v4442_v51 = vpop.eup %4441  ;;  %v2569_v56 = vmul.f32 %v2313_v55, %v2313_v55  ;;  %v2824_v3 = vmul.f32 %v2568_v38, %v2312_v8  ;;  %v2570_v12 = vmul.f32 %v2314_v14, %v2314_v14 }
 0x2c1   :  { %v2316_v30 = vmax.f32 %v2058_v17, %v4661_v43  ;;  %4447 = vlog2.f32 %v5891_v63  ;;  %v2571_v27 = vmul.f32 %v2315_v2, %v2315_v2  ;;  %v4253_v29 = vmul.f32 %v4252_v46, %v6033_v9 }
 0x2c2   :  { %v3086_v31 = vadd.f32 %v3085_v5, %v2821_v6  ;;  %v5900_v36 = vmul.f32 0.00390625, %v3285_v53  ;;  %v2317_v15 = vmax.f32 %v2059_v22, %v4661_v43  ;;  %v4341_v40 = vmul.f32 -0.33333334, %v4442_v51 }
 0x2c3   :  { %v2825_v48 = vmul.f32 %v2569_v56, %v2313_v55  ;;  %v4278_v6 = vmul.f32 %v4277_v10, %v4276_v25  ;;  %v2826_v39 = vmul.f32 %v2570_v12, %v2314_v14  ;;  %v2572_v13 = vmul.f32 %v2316_v30, %v2316_v30 }
 0x2c4   :  { %v3087_v47 = vadd.f32 %v3086_v31, %v2822_v34  ;;  %v4444_v35 = vpop.eup %4443  ;;  %v2827_v24 = vmul.f32 %v2571_v27, %v2315_v2  ;;  %v4254_v21 = vmul.f32 %v4253_v29, %v4252_v46  ;;  %v5904_v16 = vand.u32 2147483647, %v5900_v36 }
 0x2c5   :  { %v4446_v62 = vpop.eup %4445  ;;  %v2573_v23 = vmul.f32 %v2317_v15, %v2317_v15  ;;  %vm4279_vm2 = vweird.f32 %v5774_v1  ;;  %4449 = vpow2.f32 %v4341_v40  ;;  %v4389_v43 = vmul.f32 -0.33333334, %v4444_v35 }
 0x2c6   :  { %v3088_v33 = vadd.f32 %v3087_v47, %v2823_v49  ;;  %v4280_v42 = vsel %vm4279_vm2, %v5769_v19, %v4278_v6  ;;  %v4317_v58 = vmul.f32 -0.33333334, %v4446_v62  ;;  %4451 = vlog2.f32 %v5904_v16 }
 0x2c7   :  { %v4448_v8 = vpop.eup %4447  ;;  %v2828_v60 = vmul.f32 %v2572_v13, %v2316_v30  ;;  %v4282_v52 = vand.u32 2147483648, %v5769_v19  ;;  %vm4255_vm3 = vweird.f32 %v6024_v4  ;;  %vm4281_vm4 = vcmp.eq.f32.partialorder %v5774_v1, 0.0 }
 0x2c8   :  { %v3089_v50 = vadd.f32 %v3088_v33, %v2824_v3  ;;  %v4256_v61 = vsel %vm4255_vm3, %v6033_v9, %v4254_v21  ;;  %v4365_v20 = vmul.f32 -0.33333334, %v4448_v8  ;;  %v4258_v0 = vand.u32 2147483648, %v6033_v9 }
 0x2c9   :  { %v4283_v34 = vsel %vm4281_vm4, %v4282_v52, %v4280_v42  ;;  %4453 = vpow2.f32 %v4389_v43  ;;  %v2829_v26 = vmul.f32 %v2573_v23, %v2317_v15  ;;  %vm4257_vm5 = vcmp.eq.f32.partialorder %v6024_v4, 0.0 }
 0x2ca   :  { %v3090_v41 = vadd.f32 %v3089_v50, %v2825_v48  ;;  %4455 = vpow2.f32 %v4317_v58  ;;  %v4259_v38 = vsel %vm4257_vm5, %v4258_v0, %v4256_v61  ;;  %vm4264_vm6 = vcmp.lt.f32.partialorder %v5769_v19, 0.0 }
 0x2cb   :  { %v4450_v7 = vpop.eup %4449  ;;  %v4284_v5 = vsel %vm4264_vm6, nan, %v4283_v34  ;;  %4457 = vpow2.f32 %v4365_v20  ;;  %vm4240_vm7 = vcmp.lt.f32.partialorder %v6033_v9, 0.0  ;;  %vm4263_vm8 = vcmp.eq.f32.partialorder %v5769_v19, 0.0 }
 0x2cc   :  { %v3091_v45 = vadd.f32 %v3090_v41, %v2826_v39  ;;  %v4452_v55 = vpop.eup %4451  ;;  %v4260_v17 = vsel %vm4240_vm7, nan, %v4259_v38  ;;  %v4343_v46 = vmul.f32 %v4450_v7, %v4450_v7  ;;  %v4285_v53 = vsel %vm4263_vm8, 0.0, %v4284_v5 }
 0x2cd   :  { %v4413_v14 = vmul.f32 -0.33333334, %v4452_v55  ;;  %vm4239_vm9 = vcmp.eq.f32.partialorder %v6033_v9, 0.0  ;;  %vm4266_vm10 = vcmp.eq.f32.partialorder %v5774_v1, inf  ;;  %vm4242_vm11 = vcmp.eq.f32.partialorder %v6024_v4, inf }
 0x2ce   :  { %v3092_v59 = vadd.f32 %v3091_v45, %v2827_v24  ;;  %v4261_v49 = vsel %vm4239_vm9, 0.0, %v4260_v17  ;;  %v4286_v47 = vsel %vm4266_vm10, inf, %v4285_v53  ;;  %v4344_v3 = vmul.f32 %v4343_v46, %v5867_v44 }
 0x2cf   :  { %v4454_v31 = vpop.eup %4453  ;;  %4459 = vpow2.f32 %v4413_v14  ;;  %v4262_v27 = vsel %vm4242_vm11, inf, %v4261_v49  ;;  %v3303_v15 = vpack.c.bf16 %v4286_v47, %v4286_v47  ;;  %vm4351_vm13 = vweird.f32 %v5867_v44 }
 0x2d0   :  { %v3093_v54 = vadd.f32 %v3092_v59, %v2828_v60  ;;  %v4456_v22 = vpop.eup %4455  ;;  %v4391_v12 = vmul.f32 %v4454_v31, %v4454_v31  ;;  %v4345_v35 = vmul.f32 %v4344_v3, %v4343_v46  ;;  %v3302_v6 = vpack.c.bf16 %v4262_v27, %v4262_v27 }
 0x2d1   :  { %v4458_v56 = vpop.eup %4457  ;;  %v4319_v19 = vmul.f32 %v4456_v22, %v4456_v22  ;;  %v3339_v39 = vunpack.c.l.b16 %v3303_v15  ;;  %vm4353_vm14 = vcmp.eq.f32.partialorder %v5867_v44, 0.0  ;;  %vm4399_vm15 = vweird.f32 %v5879_v11 }
 0x2d2   :  { %v3094_v25 = vadd.f32 %v3093_v54, %v2829_v26  ;;  %v4367_v33 = vmul.f32 %v4458_v56, %v4458_v56  ;;  %v4392_v9 = vmul.f32 %v4391_v12, %v5879_v11  ;;  %v4346_v4 = vsub.f32 %v4345_v35, %v4450_v7 }
 0x2d3   :  { %v4320_v1 = vmul.f32 %v4319_v19, %v5884_v37  ;;  %v3338_v8 = vunpack.c.l.b16 %v3302_v6  ;;  %vm4327_vm0 = vweird.f32 %v5884_v37  ;;  %vm4336_vm1 = vcmp.lt.f32.partialorder %v5853_v18, 0.0 }
 0x2d4   :  { %v3095_v2 = vrot.slane %v3094_v25, 4  ;;  %v4368_v62 = vmul.f32 %v4367_v33, %v5891_v63  ;;  %v4393_v24 = vmul.f32 %v4392_v9, %v4391_v12  ;;  %v4347_v45 = vmul.f32 -0.33333334, %v4346_v4 }
 0x2d5   :  { %v4460_v29 = vpop.eup %4459  ;;  %v4321_v21 = vmul.f32 %v4320_v1, %v4319_v19  ;;  %v5931_v42 = vsel %vm3346_vm12, %v3339_v39, %v3338_v8  ;;  %vm4401_vm2 = vcmp.eq.f32.partialorder %v5879_v11, 0.0  ;;  %v4402_v15 = vand.u32 2147483648, %v5864_v28 }
 0x2d6   :  { %v3096_v51 = vadd.f32 %v3095_v2, %v3094_v25  ;;  %v4415_v48 = vmul.f32 %v4460_v29, %v4460_v29  ;;  %v4369_v43 = vmul.f32 %v4368_v62, %v4367_v33  ;;  %v4394_v58 = vsub.f32 %v4393_v24, %v4454_v31 }
 0x2d7   :  { %v4322_v60 = vsub.f32 %v4321_v21, %v4456_v22  ;;  %v4348_v61 = vadd.f32 %v4450_v7, %v4347_v45  ;;  %v4330_v9 = vand.u32 2147483648, %v5871_v57  ;;  %vm4375_vm3 = vweird.f32 %v5891_v63 }
 0x2d8   :  { %v3097_v10 = vrot.slane %v3096_v51, 2  ;;  %v4416_v41 = vmul.f32 %v4415_v48, %v5904_v16  ;;  %v4370_v59 = vsub.f32 %v4369_v43, %v4458_v56  ;;  %v4395_v20 = vmul.f32 -0.33333334, %v4394_v58 }
 0x2d9   :  { %v4323_v0 = vmul.f32 -0.33333334, %v4322_v60  ;;  %v4349_v55 = vmul.f32 %v4348_v61, %v5853_v18  ;;  %vm4329_vm4 = vcmp.eq.f32.partialorder %v5884_v37, 0.0  ;;  %vm4335_vm5 = vcmp.eq.f32.partialorder %v5853_v18, 0.0 }
 0x2da   :  { %v3098_v30 = vadd.f32 %v3097_v10, %v3096_v51  ;;  %v4417_v52 = vmul.f32 %v4416_v41, %v4415_v48  ;;  %v4371_v38 = vmul.f32 -0.33333334, %v4370_v59  ;;  %v4396_v25 = vadd.f32 %v4454_v31, %v4395_v20 }
 0x2db   :  { %v4324_v5 = vadd.f32 %v4456_v22, %v4323_v0  ;;  %v4350_v17 = vmul.f32 %v4349_v55, %v4348_v61  ;;  %v4354_v22 = vand.u32 2147483648, %v5853_v18  ;;  %v4378_v39 = vand.u32 2147483648, %v5875_v32 }
 0x2dc   :  { %v3099_v40 = vrot.slane %v3098_v30, 1  ;;  %v4418_v34 = vsub.f32 %v4417_v52, %v4460_v29  ;;  %v4372_v2 = vadd.f32 %v4458_v56, %v4371_v38  ;;  %v4397_v46 = vmul.f32 %v4396_v25, %v5864_v28 }
 0x2dd   :  { %v4325_v53 = vmul.f32 %v4324_v5, %v5871_v57  ;;  %v4352_v47 = vsel %vm4351_vm13, %v5853_v18, %v4350_v17  ;;  %vm4423_vm6 = vweird.f32 %v5904_v16  ;;  %vm4377_vm7 = vcmp.eq.f32.partialorder %v5891_v63, 0.0 }
 0x2de   :  { %v3100_v50 = vadd.f32 %v3099_v40, %v3098_v30  ;;  %v4419_v14 = vmul.f32 -0.33333334, %v4418_v34  ;;  %v4373_v49 = vmul.f32 %v4372_v2, %v5875_v32  ;;  %v4398_v3 = vmul.f32 %v4397_v46, %v4396_v25 }
 0x2df   :  { %v4326_v31 = vmul.f32 %v4325_v53, %v4324_v5  ;;  %v4355_v19 = vsel %vm4353_vm14, %v4354_v22, %v4352_v47  ;;  %vm4384_vm8 = vcmp.lt.f32.partialorder %v5864_v28, 0.0  ;;  %vm4312_vm9 = vcmp.lt.f32.partialorder %v5871_v57, 0.0 }
 0x2e0   :  { %v5925_v13 = vmul.f32 0.00390625, %v3100_v50  ;;  %v4420_v51 = vadd.f32 %v4460_v29, %v4419_v14  ;;  %v4374_v30 = vmul.f32 %v4373_v49, %v4372_v2  ;;  %v4400_v29 = vsel %vm4399_vm15, %v5864_v28, %v4398_v3 }
 0x2e1   :  { %v4328_v33 = vsel %vm4327_vm0, %v5871_v57, %v4326_v31  ;;  %v4356_v1 = vsel %vm4336_vm1, nan, %v4355_v19  ;;  %v4403_v6 = vsel %vm4401_vm2, %v4402_v15, %v4400_v29  ;;  %v4426_v41 = vand.u32 2147483648, %v5900_v36 }
 0x2e2   :  { %v5929_v23 = vand.u32 2147483647, %v5925_v13  ;;  %v4421_v56 = vmul.f32 %v4420_v51, %v5900_v36  ;;  %v4376_v48 = vsel %vm4375_vm3, %v5875_v32, %v4374_v30  ;;  %v4331_v62 = vsel %vm4329_vm4, %v4330_v9, %v4328_v33 }
 0x2e3   :  { %v4357_v4 = vsel %vm4335_vm5, 0.0, %v4356_v1  ;;  %v4379_v18 = vsel %vm4377_vm7, %v4378_v39, %v4376_v48  ;;  %v4332_v8 = vsel %vm4312_vm9, nan, %v4331_v62  ;;  %v4404_v43 = vsel %vm4384_vm8, nan, %v4403_v6 }
 0x2e4   :  { %4461 = vlog2.f32 %v5929_v23  ;;  %v4422_v40 = vmul.f32 %v4421_v56, %v4420_v51  ;;  %vm4425_vm10 = vcmp.eq.f32.partialorder %v5904_v16, 0.0  ;;  %vm4338_vm11 = vcmp.eq.f32.partialorder %v5867_v44, inf  ;;  %v4432_v56 = vld [vmem:[%s5995_s5] ss:$0 sm:$0xff] }
 0x2e5   :  { %vm4360_vm12 = vcmp.lt.f32.partialorder %v5875_v32, 0.0  ;;  %vm4311_vm13 = vcmp.eq.f32.partialorder %v5871_v57, 0.0  ;;  %v4358_v60 = vsel %vm4338_vm11, inf, %v4357_v4  ;;  %vm4383_vm14 = vcmp.eq.f32.partialorder %v5864_v28, 0.0 }
 0x2e6   :  { %v4424_v24 = vsel %vm4423_vm6, %v5900_v36, %v4422_v40  ;;  %v4380_v52 = vsel %vm4360_vm12, nan, %v4379_v18  ;;  %v4333_v61 = vsel %vm4311_vm13, 0.0, %v4332_v8  ;;  %v4405_v20 = vsel %vm4383_vm14, 0.0, %v4404_v43 }
 0x2e7   :  { %v4427_v58 = vsel %vm4425_vm10, %v4426_v41, %v4424_v24  ;;  %vm4408_vm15 = vcmp.lt.f32.partialorder %v5900_v36, 0.0  ;;  %vm4303_vm0 = vweird.f32 %v5929_v23  ;;  %v4306_v0 = vand.u32 2147483648, %v5925_v13 }
 0x2e8   :  { %vm4359_vm1 = vcmp.eq.f32.partialorder %v5875_v32, 0.0  ;;  %v4428_v44 = vsel %vm4408_vm15, nan, %v4427_v58  ;;  %vm4305_vm2 = vcmp.eq.f32.partialorder %v5929_v23, 0.0  ;;  %vm4314_vm3 = vcmp.eq.f32.partialorder %v5884_v37, inf }
 0x2e9   :  { %v4381_v57 = vsel %vm4359_vm1, 0.0, %v4380_v52  ;;  %vm4288_vm4 = vcmp.lt.f32.partialorder %v5925_v13, 0.0  ;;  %vm4407_vm5 = vcmp.eq.f32.partialorder %v5900_v36, 0.0  ;;  %vm4287_vm6 = vcmp.eq.f32.partialorder %v5925_v13, 0.0 }
 0x2ea   :  { %v4462_v26 = vpop.eup %4461  ;;  %vm4362_vm7 = vcmp.eq.f32.partialorder %v5891_v63, inf  ;;  %v4429_v32 = vsel %vm4407_vm5, 0.0, %v4428_v44  ;;  %vm4290_vm8 = vcmp.eq.f32.partialorder %v5929_v23, inf  ;;  %vm4386_vm9 = vcmp.eq.f32.partialorder %v5879_v11, inf }
 0x2eb   :  { %v4293_v54 = vmul.f32 -0.33333334, %v4462_v26  ;;  %v4334_v26 = vsel %vm4314_vm3, inf, %v4333_v61  ;;  %v4382_v55 = vsel %vm4362_vm7, inf, %v4381_v57  ;;  %v4406_v25 = vsel %vm4386_vm9, inf, %v4405_v20 }
 0x2ec   :  { %vm4410_vm10 = vcmp.eq.f32.partialorder %v5904_v16, inf  ;;  %v3305_v5 = vpack.c.bf16 %v4334_v26, %v4334_v26  ;;  %v3306_v36 = vpack.c.bf16 %v4358_v60, %v4358_v60  ;;  %v3307_v17 = vpack.c.bf16 %v4382_v55, %v4382_v55 }
 0x2ed   :  { %4463 = vpow2.f32 %v4293_v54  ;;  %v4430_v14 = vsel %vm4410_vm10, inf, %v4429_v32  ;;  %vm3348_vm11 = vcmask 1042434   ;;  %vm3350_vm12 = vcmask 1043459  }
 0x2ee   :  { %v3309_v63 = vpack.c.bf16 %v4430_v14, %v4430_v14  ;;  %v3341_v53 = vunpack.c.l.b16 %v3305_v5  ;;  %vm3352_vm13 = vcmask 1044484   ;;  %vm3354_vm14 = vcmask 1045509  }
 0x2ef   :  { %v3343_v11 = vunpack.c.l.b16 %v3307_v17  ;;  %vm3356_vm15 = vcmask 1046534  }
 0x2f3   :  { %v4464_v7 = vpop.eup %4463 }
 0x2f4   :  { %v4295_v10 = vmul.f32 %v4464_v7, %v4464_v7 }
 0x2f6   :  { %v4296_v12 = vmul.f32 %v4295_v10, %v5929_v23  ;;  %v3342_v23 = vunpack.c.l.b16 %v3306_v36 }
 0x2f8   :  { %v4297_v27 = vmul.f32 %v4296_v12, %v4295_v10  ;;  %v3345_v10 = vunpack.c.l.b16 %v3309_v63 }
 0x2fa   :  { %v4298_v35 = vsub.f32 %v4297_v27, %v4464_v7 }
 0x2fc   :  { %v4299_v50 = vmul.f32 -0.33333334, %v4298_v35 }
 0x2fe   :  { %v4300_v21 = vadd.f32 %v4464_v7, %v4299_v50 }
 0x300   :  { %v4301_v45 = vmul.f32 %v4300_v21, %v5925_v13 }
 0x302   :  { %v4302_v59 = vmul.f32 %v4301_v45, %v4300_v21 }
 0x304   :  { %v4304_v34 = vsel %vm4303_vm0, %v5925_v13, %v4302_v59  ;;  %v3308_v13 = vpack.c.bf16 %v4406_v25, %v4406_v25  ;;  %vm3358_vm0 = vcmask 1047559  }
 0x305   :  { %v4307_v28 = vsel %vm4305_vm2, %v4306_v0, %v4304_v34 }
 0x306   :  { %v4308_v54 = vsel %vm4288_vm4, nan, %v4307_v28  ;;  %v3344_v16 = vunpack.c.l.b16 %v3308_v13 }
 0x307   :  { %v4309_v38 = vsel %vm4287_vm6, 0.0, %v4308_v54 }
 0x308   :  { %v4310_v37 = vsel %vm4290_vm8, inf, %v4309_v38 }
 0x309   :  { %v3304_v2 = vpack.c.bf16 %v4310_v37, %v4310_v37 }
 0x30b   :  { %v3340_v46 = vunpack.c.l.b16 %v3304_v2 }
 0x30d   :  { %v3349_v51 = vsel %vm3348_vm11, %v3340_v46, %v5931_v42 }
 0x30e   :  { %v3351_v7 = vsel %vm3350_vm12, %v3341_v53, %v3349_v51 }
 0x30f   :  { %v3353_v49 = vsel %vm3352_vm13, %v3342_v23, %v3351_v7 }
 0x310   :  { %v3355_v47 = vsel %vm3354_vm14, %v3343_v11, %v3353_v49 }
 0x311   :  { %v3357_v3 = vsel %vm3356_vm15, %v3344_v16, %v3355_v47 }
 0x312   :  { %v3359_v31 = vsel %vm3358_vm0, %v3345_v10, %v3357_v3 }
 0x313   :  { %v3360_v22 = vpack.c.b16 %v3359_v31, %v3359_v31 }
 0x315   :  { %3418 = vmatmul.bf16.vlgmr.msrb.gmra.mxu1 %v3360_v22 }
 0x392   :  { %v3419_v12 = vpop.f32.mrf.mxu1 }
 0x393   :  { %v3420_v19 = vadd.f32 %v4432_v56, %v3419_v12 }
 0x395   :  { %3423 = vst [vmem:[%s5996_s6] sm:$0xff] %v3420_v19 }
 0x39a   :  { %v3421_v42 = vpop.f32.mrf.mxu1 }

</bundles_post_ra>
